<compile_context>
chip_gen: v6e
topology: v6e:2x2x1
jax: 0.10.0
libtpu: 0.0.40
codegen_flags: <defaults>
</compile_context>

<pallas_src>
import functools

import jax
import jax.numpy as jnp
from jax.experimental import pallas as pl
from jax.experimental.pallas import tpu as pltpu

_MASK_VAL = -1e30  # large finite negative (avoids inf-inf / NaN on degenerate rows)


# ------------------------------ small helpers -------------------------------

def _round_up(x, m):
    return (x + m - 1) // m * m


def _row_tiling(m, cap=256):
    """Tile size / padded size for a row (sublane) dimension (multiple of 8)."""
    mp = _round_up(m, 8)
    if mp <= cap:
        return mp, mp
    for t in (cap, cap // 2, cap // 4, cap // 8):
        if mp % t == 0:
            return t, mp
    mp = _round_up(m, cap)
    return cap, mp


def _col_tiling(n, cap=512):
    """Tile size / padded size for a lane (last) dimension (multiple of 128)."""
    np_ = _round_up(n, 128)
    if np_ <= cap:
        return np_, np_
    for t in (cap, 384, 256, 128):
        if np_ % t == 0:
            return t, np_
    return 128, np_


def _compiler_params(sem):
    return pltpu.CompilerParams(dimension_semantics=sem,
                                vmem_limit_bytes=32 * 1024 * 1024)


# ----------------------------- Pallas kernels -------------------------------

def _linear_kernel(x_ref, w_ref, b_ref, o_ref, acc_ref, *, relu):
    """Tiled matmul with f32 VMEM accumulator; bias (+ optional ReLU) on last K step."""
    @pl.when(pl.program_id(2) == 0)
    def _():
        acc_ref[...] = jnp.zeros_like(acc_ref)

    acc_ref[...] += jnp.dot(x_ref[...], w_ref[...],
                            preferred_element_type=jnp.float32)

    @pl.when(pl.program_id(2) == pl.num_programs(2) - 1)
    def _():
        y = acc_ref[...] + b_ref[...]
        if relu:
            y = jnp.maximum(y, 0.0)
        o_ref[...] = y.astype(o_ref.dtype)


def linear(x, w, b, relu=False, out_dtype=jnp.float32):
    """x: (M, K); w: (K, N) pre-transposed; b: (N,). bf16 MXU operands, f32 accum."""
    M, K = x.shape
    _, Nout = w.shape
    tm, Mp = _row_tiling(M)
    tk, Kp = _col_tiling(K)
    tn, Np = _col_tiling(Nout)

    x = x.astype(jnp.bfloat16)
    w = w.astype(jnp.bfloat16)
    if (Mp, Kp) != (M, K):
        x = jnp.pad(x, ((0, Mp - M), (0, Kp - K)))
    if (Kp, Np) != (K, Nout):
        w = jnp.pad(w, ((0, Kp - K), (0, Np - Nout)))
    b2 = b.astype(jnp.float32).reshape(1, Nout)
    if Np != Nout:
        b2 = jnp.pad(b2, ((0, 0), (0, Np - Nout)))

    out = pl.pallas_call(
        functools.partial(_linear_kernel, relu=relu),
        out_shape=jax.ShapeDtypeStruct((Mp, Np), out_dtype),
        grid=(Mp // tm, Np // tn, Kp // tk),
        in_specs=[pl.BlockSpec((tm, tk), lambda i, j, k: (i, k)),
                  pl.BlockSpec((tk, tn), lambda i, j, k: (k, j)),
                  pl.BlockSpec((1, tn), lambda i, j, k: (0, j))],
        out_specs=pl.BlockSpec((tm, tn), lambda i, j, k: (i, j)),
        scratch_shapes=[pltpu.VMEM((tm, tn), jnp.float32)],
        compiler_params=_compiler_params(("parallel", "parallel", "arbitrary")),
    )(x, w, b2)
    if (Mp, Np) != (M, Nout):
        out = out[:M, :Nout]
    return out


def _ln_math(x, g, b, eps):
    mu = jnp.mean(x, axis=-1, keepdims=True)
    xc = x - mu
    var = jnp.mean(xc * xc, axis=-1, keepdims=True)
    return xc * jax.lax.rsqrt(var + eps) * g + b


def _ln_kernel(x_ref, g_ref, b_ref, o_ref, *, eps):
    o_ref[...] = _ln_math(x_ref[...].astype(jnp.float32),
                          g_ref[...], b_ref[...], eps).astype(o_ref.dtype)


def _add_ln_kernel(x_ref, y_ref, g_ref, b_ref, o_ref, *, eps):
    x = x_ref[...].astype(jnp.float32) + y_ref[...].astype(jnp.float32)
    o_ref[...] = _ln_math(x, g_ref[...], b_ref[...], eps).astype(o_ref.dtype)


def layer_norm(x, g, b, eps=1e-5):
    M, E = x.shape
    tm, Mp = _row_tiling(M)
    xp = jnp.pad(x, ((0, Mp - M), (0, 0))) if Mp != M else x
    out = pl.pallas_call(
        functools.partial(_ln_kernel, eps=eps),
        out_shape=jax.ShapeDtypeStruct((Mp, E), jnp.float32),
        grid=(Mp // tm,),
        in_specs=[pl.BlockSpec((tm, E), lambda i: (i, 0)),
                  pl.BlockSpec((1, E), lambda i: (0, 0)),
                  pl.BlockSpec((1, E), lambda i: (0, 0))],
        out_specs=pl.BlockSpec((tm, E), lambda i: (i, 0)),
        compiler_params=_compiler_params(("parallel",)),
    )(xp, g.reshape(1, E), b.reshape(1, E))
    return out[:M] if Mp != M else out


def add_layer_norm(x, y, g, b, eps=1e-5):
    """LayerNorm(x + y) with the residual add fused into the kernel."""
    M, E = x.shape
    tm, Mp = _row_tiling(M)
    if Mp != M:
        x = jnp.pad(x, ((0, Mp - M), (0, 0)))
        y = jnp.pad(y, ((0, Mp - M), (0, 0)))
    out = pl.pallas_call(
        functools.partial(_add_ln_kernel, eps=eps),
        out_shape=jax.ShapeDtypeStruct((Mp, E), jnp.float32),
        grid=(Mp // tm,),
        in_specs=[pl.BlockSpec((tm, E), lambda i: (i, 0)),
                  pl.BlockSpec((tm, E), lambda i: (i, 0)),
                  pl.BlockSpec((1, E), lambda i: (0, 0)),
                  pl.BlockSpec((1, E), lambda i: (0, 0))],
        out_specs=pl.BlockSpec((tm, E), lambda i: (i, 0)),
        compiler_params=_compiler_params(("parallel",)),
    )(x, y, g.reshape(1, E), b.reshape(1, E))
    return out[:M] if Mp != M else out


def _attn_inner(q_of, k_of, v_of, bias, o_ref, *, H, Dh, scale, causal):
    """All heads of one batch element. bias: (1, Lk) additive f32."""
    Lq = o_ref.shape[1]
    Lk = bias.shape[-1]
    if causal:
        rows = jax.lax.broadcasted_iota(jnp.int32, (Lq, Lk), 0)
        cols = jax.lax.broadcasted_iota(jnp.int32, (Lq, Lk), 1)
        add = jnp.where(cols <= rows, 0.0, _MASK_VAL) + bias
    else:
        add = bias
    for h in range(H):                                    # static unroll over heads
        q = q_of(h)                                       # (Lq, Dh) bf16
        k = k_of(h)                                       # (Lk, Dh) bf16
        v = v_of(h)                                       # (Lk, Dh) bf16
        s = jax.lax.dot_general(q, k, (((1,), (1,)), ((), ())),
                                preferred_element_type=jnp.float32)
        s = s * scale + add
        m = jnp.max(s, axis=-1, keepdims=True)
        p = jnp.exp(s - m)
        inv = pl.reciprocal(jnp.sum(p, axis=-1, keepdims=True), approx=True)
        p = (p * inv).astype(v.dtype)
        o = jnp.dot(p, v, preferred_element_type=jnp.float32)
        o_ref[0, :, h * Dh:(h + 1) * Dh] = o.astype(o_ref.dtype)


def _self_attn_kernel(qkv_ref, bias_ref, o_ref, *, H, Dh, scale, causal):
    E = H * Dh
    _attn_inner(lambda h: qkv_ref[0, :, h * Dh:(h + 1) * Dh],
                lambda h: qkv_ref[0, :, E + h * Dh:E + (h + 1) * Dh],
                lambda h: qkv_ref[0, :, 2 * E + h * Dh:2 * E + (h + 1) * Dh],
                bias_ref[0], o_ref, H=H, Dh=Dh, scale=scale, causal=causal)


def _cross_attn_kernel(q_ref, kv_ref, bias_ref, o_ref, *, H, Dh, scale):
    E = H * Dh
    _attn_inner(lambda h: q_ref[0, :, h * Dh:(h + 1) * Dh],
                lambda h: kv_ref[0, :, h * Dh:(h + 1) * Dh],
                lambda h: kv_ref[0, :, E + h * Dh:E + (h + 1) * Dh],
                bias_ref[0], o_ref, H=H, Dh=Dh, scale=scale, causal=False)


def _attention_call(kernel, inputs, in_specs, N, Lq, E):
    return pl.pallas_call(
        kernel,
        out_shape=jax.ShapeDtypeStruct((N, Lq, E), jnp.bfloat16),
        grid=(N,),
        in_specs=in_specs,
        out_specs=pl.BlockSpec((1, Lq, E), lambda n: (n, 0, 0)),
        compiler_params=_compiler_params(("parallel",)),
    )(*inputs)


# ------------------------- model building blocks ----------------------------

def self_attention(x, p, H, kpm_bias=None, causal=False):
    """x: (N, L, E) f32.  Fused QKV projection + per-batch all-head attention."""
    N, L, E = x.shape
    Dh = E // H
    qkv = linear(x.reshape(N * L, E), p["in_w"], p["in_b"],
                 out_dtype=jnp.bfloat16).reshape(N, L, 3 * E)
    if kpm_bias is None:
        kpm_bias = jnp.zeros((N, 1, L), jnp.float32)
    out = _attention_call(
        functools.partial(_self_attn_kernel, H=H, Dh=Dh,
                          scale=1.0 / float(Dh) ** 0.5, causal=causal),
        (qkv, kpm_bias),
        [pl.BlockSpec((1, L, 3 * E), lambda n: (n, 0, 0)),
         pl.BlockSpec((1, 1, L), lambda n: (n, 0, 0))],
        N, L, E)
    out = linear(out.reshape(N * L, E), p["out_w"], p["out_b"])
    return out.reshape(N, L, E)


def cross_attention(x, memory, p, H):
    """x: (N, Lq, E); memory: (N, Lk, E).  No masks (matches nn.Transformer defaults)."""
    N, Lq, E = x.shape
    Lk = memory.shape[1]
    Dh = E // H
    q = linear(x.reshape(N * Lq, E), p["q_w"], p["q_b"],
               out_dtype=jnp.bfloat16).reshape(N, Lq, E)
    kv = linear(memory.reshape(N * Lk, E), p["kv_w"], p["kv_b"],
                out_dtype=jnp.bfloat16).reshape(N, Lk, 2 * E)
    bias = jnp.zeros((N, 1, Lk), jnp.float32)
    out = _attention_call(
        functools.partial(_cross_attn_kernel, H=H, Dh=Dh,
                          scale=1.0 / float(Dh) ** 0.5),
        (q, kv, bias),
        [pl.BlockSpec((1, Lq, E), lambda n: (n, 0, 0)),
         pl.BlockSpec((1, Lk, 2 * E), lambda n: (n, 0, 0)),
         pl.BlockSpec((1, 1, Lk), lambda n: (n, 0, 0))],
        N, Lq, E)
    out = linear(out.reshape(N * Lq, E), p["out_w"], p["out_b"])
    return out.reshape(N, Lq, E)


def encoder_layer(x, lp, H, kpm_bias):
    N, S, E = x.shape
    a = self_attention(x, lp["self_attn"], H, kpm_bias=kpm_bias)
    x = add_layer_norm(x.reshape(N * S, E), a.reshape(N * S, E),
                       lp["norm1_g"], lp["norm1_b"]).reshape(N, S, E)
    h = linear(x.reshape(N * S, E), lp["lin1_w"], lp["lin1_b"],
               relu=True, out_dtype=jnp.bfloat16)
    f = linear(h, lp["lin2_w"], lp["lin2_b"])
    x = add_layer_norm(x.reshape(N * S, E), f,
                       lp["norm2_g"], lp["norm2_b"]).reshape(N, S, E)
    return x


def decoder_layer(y, memory, lp, H):
    N, T, E = y.shape
    a = self_attention(y, lp["self_attn"], H, causal=True)
    y = add_layer_norm(y.reshape(N * T, E), a.reshape(N * T, E),
                       lp["norm1_g"], lp["norm1_b"]).reshape(N, T, E)
    a = cross_attention(y, memory, lp["cross_attn"], H)
    y = add_layer_norm(y.reshape(N * T, E), a.reshape(N * T, E),
                       lp["norm2_g"], lp["norm2_b"]).reshape(N, T, E)
    h = linear(y.reshape(N * T, E), lp["lin1_w"], lp["lin1_b"],
               relu=True, out_dtype=jnp.bfloat16)
    f = linear(h, lp["lin2_w"], lp["lin2_b"])
    y = add_layer_norm(y.reshape(N * T, E), f,
                       lp["norm3_g"], lp["norm3_b"]).reshape(N, T, E)
    return y


def transformer_forward(params, src, trg, cfg):
    """src, trg: int32 token ids, shape (seq_len, batch). Returns (T, N, trg_vocab)."""
    S, N = src.shape
    T, _ = trg.shape
    E = cfg["embedding_size"]
    H = cfg["num_heads"]

    # embeddings + positional embeddings (batch-major; dropout == identity in eval mode)
    x = params["src_word_emb"][src.T] + params["src_pos_emb"][:S][None]   # (N, S, E)
    y = params["trg_word_emb"][trg.T] + params["trg_pos_emb"][:T][None]   # (N, T, E)

    # key-padding additive bias (N, 1, S): tiny; causal mask is built inside the kernel
    pad = (src.T == cfg["src_pad_idx"])[:, None, :]
    kpm_bias = jnp.where(pad, jnp.float32(_MASK_VAL), jnp.float32(0.0))

    # encoder stack (+ final norm, as nn.Transformer does)
    for lp in params["enc_layers"]:
        x = encoder_layer(x, lp, H, kpm_bias)
    memory = layer_norm(x.reshape(N * S, E),
                        params["enc_norm_g"], params["enc_norm_b"]).reshape(N, S, E)

    # decoder stack (+ final norm)
    for lp in params["dec_layers"]:
        y = decoder_layer(y, memory, lp, H)
    y = layer_norm(y.reshape(N * T, E), params["dec_norm_g"], params["dec_norm_b"])

    # output projection (vocab padded to a lane-dense multiple of 128 at init)
    V = cfg["trg_vocab_size"]
    logits = linear(y, params["fc_out_w"], params["fc_out_b"])            # (N*T, Vpad)
    logits = logits[:, :V].reshape(N, T, V).transpose(1, 0, 2)            # (T, N, V)
    return logits


# ---------------------------------- init -------------------------------------

class _KeyGen:
    def __init__(self, key):
        self._key = key
        self._i = 0

    def __call__(self):
        self._i += 1
        return jax.random.fold_in(self._key, self._i)


def _w(kg, shape, scale=0.02):
    return scale * jax.random.normal(kg(), shape, jnp.float32)


def _self_attn_params(kg, E):
    # pre-transposed (in, out) bf16 weights; fused q|k|v projection
    return dict(in_w=_w(kg, (E, 3 * E)).astype(jnp.bfloat16),
                in_b=jnp.zeros((3 * E,), jnp.float32),
                out_w=_w(kg, (E, E)).astype(jnp.bfloat16),
                out_b=jnp.zeros((E,), jnp.float32))


def _cross_attn_params(kg, E):
    return dict(q_w=_w(kg, (E, E)).astype(jnp.bfloat16),
                q_b=jnp.zeros((E,), jnp.float32),
                kv_w=_w(kg, (E, 2 * E)).astype(jnp.bfloat16),
                kv_b=jnp.zeros((2 * E,), jnp.float32),
                out_w=_w(kg, (E, E)).astype(jnp.bfloat16),
                out_b=jnp.zeros((E,), jnp.float32))


def _enc_layer_params(kg, E, F):
    return dict(self_attn=_self_attn_params(kg, E),
                lin1_w=_w(kg, (E, F)).astype(jnp.bfloat16),
                lin1_b=jnp.zeros((F,), jnp.float32),
                lin2_w=_w(kg, (F, E)).astype(jnp.bfloat16),
                lin2_b=jnp.zeros((E,), jnp.float32),
                norm1_g=jnp.ones((E,), jnp.float32), norm1_b=jnp.zeros((E,), jnp.float32),
                norm2_g=jnp.ones((E,), jnp.float32), norm2_b=jnp.zeros((E,), jnp.float32))


def _dec_layer_params(kg, E, F):
    p = _enc_layer_params(kg, E, F)
    p["cross_attn"] = _cross_attn_params(kg, E)
    p["norm3_g"] = jnp.ones((E,), jnp.float32)
    p["norm3_b"] = jnp.zeros((E,), jnp.float32)
    return p


def init_params(key, cfg):
    kg = _KeyGen(key)
    E = cfg["embedding_size"]
    F = cfg["forward_expansion"]          # passed as dim_feedforward, as in the torch module
    Vp = _round_up(cfg["trg_vocab_size"], 128)   # lane-dense fc_out width
    return dict(
        src_word_emb=_w(kg, (cfg["src_vocab_size"], E), 1.0),
        src_pos_emb=_w(kg, (cfg["max_len"], E), 1.0),
        trg_word_emb=_w(kg, (cfg["trg_vocab_size"], E), 1.0),
        trg_pos_emb=_w(kg, (cfg["max_len"], E), 1.0),
        enc_layers=[_enc_layer_params(kg, E, F) for _ in range(cfg["num_encoder_layers"])],
        dec_layers=[_dec_layer_params(kg, E, F) for _ in range(cfg["num_decoder_layers"])],
        enc_norm_g=jnp.ones((E,), jnp.float32), enc_norm_b=jnp.zeros((E,), jnp.float32),
        dec_norm_g=jnp.ones((E,), jnp.float32), dec_norm_b=jnp.zeros((E,), jnp.float32),
        fc_out_w=_w(kg, (E, Vp)).astype(jnp.bfloat16),
        fc_out_b=jnp.zeros((Vp,), jnp.float32),
    )


# ---------------------------------- main --------------------------------------

if __name__ == "__main__":
    cfg = dict(embedding_size=256, num_heads=2,
               num_encoder_layers=2, num_decoder_layers=2,
               forward_expansion=256, max_len=16,
               src_vocab_size=293, trg_vocab_size=311, src_pad_idx=1)

    key = jax.random.PRNGKey(0)
    params = init_params(key, cfg)

    S, T, N = 8, 8, 2
    k_src, k_trg = jax.random.split(jax.random.fold_in(key, 12345))
    src = jax.random.randint(k_src, (S, N), 2, cfg["src_vocab_size"], dtype=jnp.int32)
    src = src.at[:2, 0].set(cfg["src_pad_idx"])   # a couple of pad tokens (pad_first style)
    trg = jax.random.randint(k_trg, (T, N), 0, cfg["trg_vocab_size"], dtype=jnp.int32)

    fwd = jax.jit(functools.partial(transformer_forward, cfg=cfg))
    out = fwd(params, src, trg)
    out = jax.block_until_ready(out)
    assert out.shape == (T, N, cfg["trg_vocab_size"]), out.shape
    assert bool(jnp.all(jnp.isfinite(out)))
    print("KERNEL_OK")
</pallas_src>

<mosaic_0001>
module attributes {stable_mosaic.version = 11 : i64} {
  func.func @_linear_kernel(%arg0: i32, %arg1: i32, %arg2: i32, %arg3: memref<16x256xbf16, #tpu.memory_space<vmem>>, %arg4: memref<256x384xbf16, #tpu.memory_space<vmem>>, %arg5: memref<1x384xf32, #tpu.memory_space<vmem>>, %arg6: memref<16x384xbf16, #tpu.memory_space<vmem>>, %arg7: memref<16x384xf32, #tpu.memory_space<vmem>>) attributes {dimension_semantics = [#tpu.dimension_semantics<parallel>, #tpu.dimension_semantics<parallel>, #tpu.dimension_semantics<arbitrary>], iteration_bounds = array<i64: 1, 2, 1>, scalar_prefetch = 0 : i64, scratch_operands = 1 : i64, tpu.core_type = #tpu.core_type<tc>, window_params = [{transform_indices = @transform_0, window_bounds = array<i64: 16, 256>}, {transform_indices = @transform_1, window_bounds = array<i64: 256, 384>}, {transform_indices = @transform_2, window_bounds = array<i64: 1, 384>}, {transform_indices = @transform_3, window_bounds = array<i64: 16, 384>}]} {
    %c0_i32 = arith.constant 0 : i32
    %0 = arith.cmpi eq, %arg2, %c0_i32 : i32
    %1 = arith.extui %0 : i1 to i32
    %c0_i32_0 = arith.constant 0 : i32
    %2 = arith.cmpi ne, %1, %c0_i32_0 : i32
    scf.if %2 {
      %cst_10 = arith.constant 0.000000e+00 : f32
      %12 = vector.broadcast %cst_10 : f32 to vector<16x384xf32>
      %c0_11 = arith.constant 0 : index
      %c0_12 = arith.constant 0 : index
      %13 = vector.load %arg7[%c0_11, %c0_12] : memref<16x384xf32, #tpu.memory_space<vmem>>, vector<16x384xf32>
      tpu.vector_store %arg7[%c0_11, %c0_12], %12 {strides = array<i32>} : memref<16x384xf32, #tpu.memory_space<vmem>>, vector<16x384xf32>,
    } else {
    }
    %c0 = arith.constant 0 : index
    %c0_1 = arith.constant 0 : index
    %3 = vector.load %arg7[%c0, %c0_1] : memref<16x384xf32, #tpu.memory_space<vmem>>, vector<16x384xf32>
    %c0_2 = arith.constant 0 : index
    %c0_3 = arith.constant 0 : index
    %4 = vector.load %arg3[%c0_2, %c0_3] : memref<16x256xbf16, #tpu.memory_space<vmem>>, vector<16x256xbf16>
    %c0_4 = arith.constant 0 : index
    %c0_5 = arith.constant 0 : index
    %5 = vector.load %arg4[%c0_4, %c0_5] : memref<256x384xbf16, #tpu.memory_space<vmem>>, vector<256x384xbf16>
    %cst = arith.constant dense<0.000000e+00> : vector<16x384xf32>
    %6 = tpu.matmul %4, %5, %cst {dimension_numbers = #tpu.dot_dimension_numbers<[1], [0], [0], [1], [0, 0, 1, 1], [], []>} : vector<16x256xbf16>, vector<256x384xbf16>, vector<16x384xf32> -> vector<16x384xf32>
    %7 = arith.addf %3, %6 : vector<16x384xf32>
    %c0_6 = arith.constant 0 : index
    %c0_7 = arith.constant 0 : index
    %8 = vector.load %arg7[%c0_6, %c0_7] : memref<16x384xf32, #tpu.memory_space<vmem>>, vector<16x384xf32>
    tpu.vector_store %arg7[%c0_6, %c0_7], %7 {strides = array<i32>} : memref<16x384xf32, #tpu.memory_space<vmem>>, vector<16x384xf32>,
    %c0_i32_8 = arith.constant 0 : i32
    %9 = arith.cmpi eq, %arg2, %c0_i32_8 : i32
    %10 = arith.extui %9 : i1 to i32
    %c0_i32_9 = arith.constant 0 : i32
    %11 = arith.cmpi ne, %10, %c0_i32_9 : i32
    scf.if %11 {
      %c0_10 = arith.constant 0 : index
      %c0_11 = arith.constant 0 : index
      %12 = vector.load %arg7[%c0_10, %c0_11] : memref<16x384xf32, #tpu.memory_space<vmem>>, vector<16x384xf32>
      %c0_12 = arith.constant 0 : index
      %c0_13 = arith.constant 0 : index
      %13 = vector.load %arg5[%c0_12, %c0_13] : memref<1x384xf32, #tpu.memory_space<vmem>>, vector<1x384xf32>
      %14 = vector.broadcast %13 : vector<1x384xf32> to vector<16x384xf32>
      %15 = arith.addf %12, %14 : vector<16x384xf32>
      %16 = arith.truncf %15 : vector<16x384xf32> to vector<16x384xbf16>
      %c0_14 = arith.constant 0 : index
      %c0_15 = arith.constant 0 : index
      %17 = vector.load %arg6[%c0_14, %c0_15] : memref<16x384xbf16, #tpu.memory_space<vmem>>, vector<16x384xbf16>
      tpu.vector_store %arg6[%c0_14, %c0_15], %16 {strides = array<i32>} : memref<16x384xbf16, #tpu.memory_space<vmem>>, vector<16x384xbf16>,
    } else {
    }
    return
  }
  func.func @transform_0(%arg0: i32, %arg1: i32, %arg2: i32) -> (i32, i32) {
    %c0_i32 = arith.constant 0 : i32
    return %arg0, %arg2 : i32, i32
  }
  func.func @transform_1(%arg0: i32, %arg1: i32, %arg2: i32) -> (i32, i32) {
    %c0_i32 = arith.constant 0 : i32
    return %arg2, %arg1 : i32, i32
  }
  func.func @transform_2(%arg0: i32, %arg1: i32, %arg2: i32) -> (i32, i32) {
    %c0_i32 = arith.constant 0 : i32
    %c0_i32_0 = arith.constant 0 : i32
    return %c0_i32, %arg1 : i32, i32
  }
  func.func @transform_3(%arg0: i32, %arg1: i32, %arg2: i32) -> (i32, i32) {
    %c0_i32 = arith.constant 0 : i32
    return %arg0, %arg1 : i32, i32
  }
}

module attributes {stable_mosaic.version = 11 : i64} {
  func.func @_self_attn_kernel(%arg0: i32, %arg1: memref<1x8x768xbf16, #tpu.memory_space<vmem>>, %arg2: memref<1x1x8xf32, #tpu.memory_space<vmem>>, %arg3: memref<1x8x256xbf16, #tpu.memory_space<vmem>>) attributes {dimension_semantics = [#tpu.dimension_semantics<parallel>], iteration_bounds = array<i64: 2>, scalar_prefetch = 0 : i64, scratch_operands = 0 : i64, tpu.core_type = #tpu.core_type<tc>, window_params = [{transform_indices = @transform_0, window_bounds = array<i64: 1, 8, 768>}, {transform_indices = @transform_1, window_bounds = array<i64: 1, 1, 8>}, {transform_indices = @transform_2, window_bounds = array<i64: 1, 8, 256>}]} {
    %c0 = arith.constant 0 : index
    %c0_0 = arith.constant 0 : index
    %c0_1 = arith.constant 0 : index
    %0 = vector.load %arg2[%c0, %c0_0, %c0_1] : memref<1x1x8xf32, #tpu.memory_space<vmem>>, vector<1x1x8xf32>
    %1 = vector.shape_cast %0 : vector<1x1x8xf32> to vector<1x8xf32>
    %c0_2 = arith.constant 0 : index
    %c0_3 = arith.constant 0 : index
    %c0_4 = arith.constant 0 : index
    %2 = vector.load %arg1[%c0_2, %c0_3, %c0_4] : memref<1x8x768xbf16, #tpu.memory_space<vmem>>, vector<1x8x128xbf16>
    %3 = vector.shape_cast %2 : vector<1x8x128xbf16> to vector<8x128xbf16>
    %c0_5 = arith.constant 0 : index
    %c0_6 = arith.constant 0 : index
    %c256 = arith.constant 256 : index
    %4 = vector.load %arg1[%c0_5, %c0_6, %c256] : memref<1x8x768xbf16, #tpu.memory_space<vmem>>, vector<1x8x128xbf16>
    %5 = vector.shape_cast %4 : vector<1x8x128xbf16> to vector<8x128xbf16>
    %c0_7 = arith.constant 0 : index
    %c0_8 = arith.constant 0 : index
    %c512 = arith.constant 512 : index
    %6 = vector.load %arg1[%c0_7, %c0_8, %c512] : memref<1x8x768xbf16, #tpu.memory_space<vmem>>, vector<1x8x128xbf16>
    %7 = vector.shape_cast %6 : vector<1x8x128xbf16> to vector<8x128xbf16>
    %cst = arith.constant dense<0.000000e+00> : vector<8x8xf32>
    %8 = tpu.matmul %3, %5, %cst {dimension_numbers = #tpu.dot_dimension_numbers<[1], [1], [0], [0], [0, 0, 1, 0], [], []>} : vector<8x128xbf16>, vector<8x128xbf16>, vector<8x8xf32> -> vector<8x8xf32>
    %cst_9 = arith.constant 0.0883883461 : f32
    %9 = vector.broadcast %cst_9 : f32 to vector<8x8xf32>
    %10 = arith.mulf %8, %9 : vector<8x8xf32>
    %11 = vector.broadcast %1 : vector<1x8xf32> to vector<8x8xf32>
    %12 = arith.addf %10, %11 : vector<8x8xf32>
    %cst_10 = arith.constant dense<0xFF800000> : vector<8xf32>
    %13 = vector.multi_reduction <maximumf>, %12, %cst_10 [1] : vector<8x8xf32> to vector<8xf32>
    %14 = vector.shape_cast %13 : vector<8xf32> to vector<8x1xf32>
    %15 = vector.broadcast %14 : vector<8x1xf32> to vector<8x8xf32>
    %16 = arith.subf %12, %15 : vector<8x8xf32>
    %17 = math.exp %16 : vector<8x8xf32>
    %cst_11 = arith.constant dense<0.000000e+00> : vector<8xf32>
    %18 = vector.multi_reduction <add>, %17, %cst_11 [1] : vector<8x8xf32> to vector<8xf32>
    %19 = vector.shape_cast %18 : vector<8xf32> to vector<8x1xf32>
    %20 = tpu.reciprocal %19 {approx = true} : vector<8x1xf32> -> vector<8x1xf32>
    %21 = vector.broadcast %20 : vector<8x1xf32> to vector<8x8xf32>
    %22 = arith.mulf %17, %21 : vector<8x8xf32>
    %23 = arith.truncf %22 : vector<8x8xf32> to vector<8x8xbf16>
    %cst_12 = arith.constant dense<0.000000e+00> : vector<8x128xf32>
    %24 = tpu.matmul %23, %7, %cst_12 {dimension_numbers = #tpu.dot_dimension_numbers<[1], [0], [0], [1], [0, 0, 1, 1], [], []>} : vector<8x8xbf16>, vector<8x128xbf16>, vector<8x128xf32> -> vector<8x128xf32>
    %25 = arith.truncf %24 : vector<8x128xf32> to vector<8x128xbf16>
    %c0_13 = arith.constant 0 : index
    %c0_14 = arith.constant 0 : index
    %c0_15 = arith.constant 0 : index
    %26 = vector.load %arg3[%c0_13, %c0_14, %c0_15] : memref<1x8x256xbf16, #tpu.memory_space<vmem>>, vector<1x8x128xbf16>
    %27 = vector.shape_cast %26 : vector<1x8x128xbf16> to vector<8x128xbf16>
    %28 = vector.shape_cast %25 : vector<8x128xbf16> to vector<1x8x128xbf16>
    tpu.vector_store %arg3[%c0_13, %c0_14, %c0_15], %28 {strides = array<i32>} : memref<1x8x256xbf16, #tpu.memory_space<vmem>>, vector<1x8x128xbf16>,
    %c0_16 = arith.constant 0 : index
    %c0_17 = arith.constant 0 : index
    %c128 = arith.constant 128 : index
    %29 = vector.load %arg1[%c0_16, %c0_17, %c128] : memref<1x8x768xbf16, #tpu.memory_space<vmem>>, vector<1x8x128xbf16>
    %30 = vector.shape_cast %29 : vector<1x8x128xbf16> to vector<8x128xbf16>
    %c0_18 = arith.constant 0 : index
    %c0_19 = arith.constant 0 : index
    %c384 = arith.constant 384 : index
    %31 = vector.load %arg1[%c0_18, %c0_19, %c384] : memref<1x8x768xbf16, #tpu.memory_space<vmem>>, vector<1x8x128xbf16>
    %32 = vector.shape_cast %31 : vector<1x8x128xbf16> to vector<8x128xbf16>
    %c0_20 = arith.constant 0 : index
    %c0_21 = arith.constant 0 : index
    %c640 = arith.constant 640 : index
    %33 = vector.load %arg1[%c0_20, %c0_21, %c640] : memref<1x8x768xbf16, #tpu.memory_space<vmem>>, vector<1x8x128xbf16>
    %34 = vector.shape_cast %33 : vector<1x8x128xbf16> to vector<8x128xbf16>
    %cst_22 = arith.constant dense<0.000000e+00> : vector<8x8xf32>
    %35 = tpu.matmul %30, %32, %cst_22 {dimension_numbers = #tpu.dot_dimension_numbers<[1], [1], [0], [0], [0, 0, 1, 0], [], []>} : vector<8x128xbf16>, vector<8x128xbf16>, vector<8x8xf32> -> vector<8x8xf32>
    %cst_23 = arith.constant 0.0883883461 : f32
    %36 = vector.broadcast %cst_23 : f32 to vector<8x8xf32>
    %37 = arith.mulf %35, %36 : vector<8x8xf32>
    %38 = vector.broadcast %1 : vector<1x8xf32> to vector<8x8xf32>
    %39 = arith.addf %37, %38 : vector<8x8xf32>
    %cst_24 = arith.constant dense<0xFF800000> : vector<8xf32>
    %40 = vector.multi_reduction <maximumf>, %39, %cst_24 [1] : vector<8x8xf32> to vector<8xf32>
    %41 = vector.shape_cast %40 : vector<8xf32> to vector<8x1xf32>
    %42 = vector.broadcast %41 : vector<8x1xf32> to vector<8x8xf32>
    %43 = arith.subf %39, %42 : vector<8x8xf32>
    %44 = math.exp %43 : vector<8x8xf32>
    %cst_25 = arith.constant dense<0.000000e+00> : vector<8xf32>
    %45 = vector.multi_reduction <add>, %44, %cst_25 [1] : vector<8x8xf32> to vector<8xf32>
    %46 = vector.shape_cast %45 : vector<8xf32> to vector<8x1xf32>
    %47 = tpu.reciprocal %46 {approx = true} : vector<8x1xf32> -> vector<8x1xf32>
    %48 = vector.broadcast %47 : vector<8x1xf32> to vector<8x8xf32>
    %49 = arith.mulf %44, %48 : vector<8x8xf32>
    %50 = arith.truncf %49 : vector<8x8xf32> to vector<8x8xbf16>
    %cst_26 = arith.constant dense<0.000000e+00> : vector<8x128xf32>
    %51 = tpu.matmul %50, %34, %cst_26 {dimension_numbers = #tpu.dot_dimension_numbers<[1], [0], [0], [1], [0, 0, 1, 1], [], []>} : vector<8x8xbf16>, vector<8x128xbf16>, vector<8x128xf32> -> vector<8x128xf32>
    %52 = arith.truncf %51 : vector<8x128xf32> to vector<8x128xbf16>
    %c0_27 = arith.constant 0 : index
    %c0_28 = arith.constant 0 : index
    %c128_29 = arith.constant 128 : index
    %53 = vector.load %arg3[%c0_27, %c0_28, %c128_29] : memref<1x8x256xbf16, #tpu.memory_space<vmem>>, vector<1x8x128xbf16>
    %54 = vector.shape_cast %53 : vector<1x8x128xbf16> to vector<8x128xbf16>
    %55 = vector.shape_cast %52 : vector<8x128xbf16> to vector<1x8x128xbf16>
    tpu.vector_store %arg3[%c0_27, %c0_28, %c128_29], %55 {strides = array<i32>} : memref<1x8x256xbf16, #tpu.memory_space<vmem>>, vector<1x8x128xbf16>,
    return
  }
  func.func @transform_0(%arg0: i32) -> (i32, i32, i32) {
    %c0_i32 = arith.constant 0 : i32
    %c0_i32_0 = arith.constant 0 : i32
    %c0_i32_1 = arith.constant 0 : i32
    return %arg0, %c0_i32, %c0_i32_0 : i32, i32, i32
  }
  func.func @transform_1(%arg0: i32) -> (i32, i32, i32) {
    %c0_i32 = arith.constant 0 : i32
    %c0_i32_0 = arith.constant 0 : i32
    %c0_i32_1 = arith.constant 0 : i32
    return %arg0, %c0_i32, %c0_i32_0 : i32, i32, i32
  }
  func.func @transform_2(%arg0: i32) -> (i32, i32, i32) {
    %c0_i32 = arith.constant 0 : i32
    %c0_i32_0 = arith.constant 0 : i32
    %c0_i32_1 = arith.constant 0 : i32
    return %arg0, %c0_i32, %c0_i32_0 : i32, i32, i32
  }
}

module attributes {stable_mosaic.version = 11 : i64} {
  func.func @_add_ln_kernel(%arg0: i32, %arg1: memref<16x256xf32, #tpu.memory_space<vmem>>, %arg2: memref<16x256xf32, #tpu.memory_space<vmem>>, %arg3: memref<1x256xf32, #tpu.memory_space<vmem>>, %arg4: memref<1x256xf32, #tpu.memory_space<vmem>>, %arg5: memref<16x256xf32, #tpu.memory_space<vmem>>) attributes {dimension_semantics = [#tpu.dimension_semantics<parallel>], iteration_bounds = array<i64: 1>, scalar_prefetch = 0 : i64, scratch_operands = 0 : i64, tpu.core_type = #tpu.core_type<tc>, window_params = [{transform_indices = @transform_0, window_bounds = array<i64: 16, 256>}, {transform_indices = @transform_1, window_bounds = array<i64: 16, 256>}, {pipeline_mode = #tpu.pipeline_mode<synchronous>, transform_indices = @transform_2, window_bounds = array<i64: 1, 256>}, {pipeline_mode = #tpu.pipeline_mode<synchronous>, transform_indices = @transform_3, window_bounds = array<i64: 1, 256>}, {transform_indices = @transform_4, window_bounds = array<i64: 16, 256>}]} {
    %c0 = arith.constant 0 : index
    %c0_0 = arith.constant 0 : index
    %0 = vector.load %arg1[%c0, %c0_0] : memref<16x256xf32, #tpu.memory_space<vmem>>, vector<16x256xf32>
    %c0_1 = arith.constant 0 : index
    %c0_2 = arith.constant 0 : index
    %1 = vector.load %arg2[%c0_1, %c0_2] : memref<16x256xf32, #tpu.memory_space<vmem>>, vector<16x256xf32>
    %2 = arith.addf %0, %1 : vector<16x256xf32>
    %c0_3 = arith.constant 0 : index
    %c0_4 = arith.constant 0 : index
    %3 = vector.load %arg3[%c0_3, %c0_4] : memref<1x256xf32, #tpu.memory_space<vmem>>, vector<1x256xf32>
    %c0_5 = arith.constant 0 : index
    %c0_6 = arith.constant 0 : index
    %4 = vector.load %arg4[%c0_5, %c0_6] : memref<1x256xf32, #tpu.memory_space<vmem>>, vector<1x256xf32>
    %cst = arith.constant dense<0.000000e+00> : vector<16xf32>
    %5 = vector.multi_reduction <add>, %2, %cst [1] : vector<16x256xf32> to vector<16xf32>
    %6 = vector.shape_cast %5 : vector<16xf32> to vector<16x1xf32>
    %cst_7 = arith.constant 2.560000e+02 : f32
    %7 = vector.broadcast %cst_7 : f32 to vector<16x1xf32>
    %8 = arith.divf %6, %7 : vector<16x1xf32>
    %9 = vector.broadcast %8 : vector<16x1xf32> to vector<16x256xf32>
    %10 = arith.subf %2, %9 : vector<16x256xf32>
    %11 = arith.mulf %10, %10 : vector<16x256xf32>
    %cst_8 = arith.constant dense<0.000000e+00> : vector<16xf32>
    %12 = vector.multi_reduction <add>, %11, %cst_8 [1] : vector<16x256xf32> to vector<16xf32>
    %13 = vector.shape_cast %12 : vector<16xf32> to vector<16x1xf32>
    %cst_9 = arith.constant 2.560000e+02 : f32
    %14 = vector.broadcast %cst_9 : f32 to vector<16x1xf32>
    %15 = arith.divf %13, %14 : vector<16x1xf32>
    %cst_10 = arith.constant 9.99999974E-6 : f32
    %16 = vector.broadcast %cst_10 : f32 to vector<16x1xf32>
    %17 = arith.addf %15, %16 : vector<16x1xf32>
    %18 = math.rsqrt %17 : vector<16x1xf32>
    %19 = vector.broadcast %18 : vector<16x1xf32> to vector<16x256xf32>
    %20 = arith.mulf %10, %19 : vector<16x256xf32>
    %21 = vector.broadcast %3 : vector<1x256xf32> to vector<16x256xf32>
    %22 = arith.mulf %20, %21 : vector<16x256xf32>
    %23 = vector.broadcast %4 : vector<1x256xf32> to vector<16x256xf32>
    %24 = arith.addf %22, %23 : vector<16x256xf32>
    %c0_11 = arith.constant 0 : index
    %c0_12 = arith.constant 0 : index
    %25 = vector.load %arg5[%c0_11, %c0_12] : memref<16x256xf32, #tpu.memory_space<vmem>>, vector<16x256xf32>
    tpu.vector_store %arg5[%c0_11, %c0_12], %24 {strides = array<i32>} : memref<16x256xf32, #tpu.memory_space<vmem>>, vector<16x256xf32>,
    return
  }
  func.func @transform_0(%arg0: i32) -> (i32, i32) {
    %c0_i32 = arith.constant 0 : i32
    %c0_i32_0 = arith.constant 0 : i32
    return %arg0, %c0_i32 : i32, i32
  }
  func.func @transform_1(%arg0: i32) -> (i32, i32) {
    %c0_i32 = arith.constant 0 : i32
    %c0_i32_0 = arith.constant 0 : i32
    return %arg0, %c0_i32 : i32, i32
  }
  func.func @transform_2(%arg0: i32) -> (i32, i32) {
    %c0_i32 = arith.constant 0 : i32
    %c0_i32_0 = arith.constant 0 : i32
    %c0_i32_1 = arith.constant 0 : i32
    return %c0_i32, %c0_i32_0 : i32, i32
  }
  func.func @transform_3(%arg0: i32) -> (i32, i32) {
    %c0_i32 = arith.constant 0 : i32
    %c0_i32_0 = arith.constant 0 : i32
    %c0_i32_1 = arith.constant 0 : i32
    return %c0_i32, %c0_i32_0 : i32, i32
  }
  func.func @transform_4(%arg0: i32) -> (i32, i32) {
    %c0_i32 = arith.constant 0 : i32
    %c0_i32_0 = arith.constant 0 : i32
    return %arg0, %c0_i32 : i32, i32
  }
}

module attributes {stable_mosaic.version = 11 : i64} {
  func.func @_linear_kernel(%arg0: i32, %arg1: i32, %arg2: i32, %arg3: memref<16x256xbf16, #tpu.memory_space<vmem>>, %arg4: memref<256x256xbf16, #tpu.memory_space<vmem>>, %arg5: memref<1x256xf32, #tpu.memory_space<vmem>>, %arg6: memref<16x256xf32, #tpu.memory_space<vmem>>, %arg7: memref<16x256xf32, #tpu.memory_space<vmem>>) attributes {dimension_semantics = [#tpu.dimension_semantics<parallel>, #tpu.dimension_semantics<parallel>, #tpu.dimension_semantics<arbitrary>], iteration_bounds = array<i64: 1, 1, 1>, scalar_prefetch = 0 : i64, scratch_operands = 1 : i64, tpu.core_type = #tpu.core_type<tc>, window_params = [{transform_indices = @transform_0, window_bounds = array<i64: 16, 256>}, {transform_indices = @transform_1, window_bounds = array<i64: 256, 256>}, {transform_indices = @transform_2, window_bounds = array<i64: 1, 256>}, {transform_indices = @transform_3, window_bounds = array<i64: 16, 256>}]} {
    %c0_i32 = arith.constant 0 : i32
    %0 = arith.cmpi eq, %arg2, %c0_i32 : i32
    %1 = arith.extui %0 : i1 to i32
    %c0_i32_0 = arith.constant 0 : i32
    %2 = arith.cmpi ne, %1, %c0_i32_0 : i32
    scf.if %2 {
      %cst_10 = arith.constant 0.000000e+00 : f32
      %12 = vector.broadcast %cst_10 : f32 to vector<16x256xf32>
      %c0_11 = arith.constant 0 : index
      %c0_12 = arith.constant 0 : index
      %13 = vector.load %arg7[%c0_11, %c0_12] : memref<16x256xf32, #tpu.memory_space<vmem>>, vector<16x256xf32>
      tpu.vector_store %arg7[%c0_11, %c0_12], %12 {strides = array<i32>} : memref<16x256xf32, #tpu.memory_space<vmem>>, vector<16x256xf32>,
    } else {
    }
    %c0 = arith.constant 0 : index
    %c0_1 = arith.constant 0 : index
    %3 = vector.load %arg7[%c0, %c0_1] : memref<16x256xf32, #tpu.memory_space<vmem>>, vector<16x256xf32>
    %c0_2 = arith.constant 0 : index
    %c0_3 = arith.constant 0 : index
    %4 = vector.load %arg3[%c0_2, %c0_3] : memref<16x256xbf16, #tpu.memory_space<vmem>>, vector<16x256xbf16>
    %c0_4 = arith.constant 0 : index
    %c0_5 = arith.constant 0 : index
    %5 = vector.load %arg4[%c0_4, %c0_5] : memref<256x256xbf16, #tpu.memory_space<vmem>>, vector<256x256xbf16>
    %cst = arith.constant dense<0.000000e+00> : vector<16x256xf32>
    %6 = tpu.matmul %4, %5, %cst {dimension_numbers = #tpu.dot_dimension_numbers<[1], [0], [0], [1], [0, 0, 1, 1], [], []>} : vector<16x256xbf16>, vector<256x256xbf16>, vector<16x256xf32> -> vector<16x256xf32>
    %7 = arith.addf %3, %6 : vector<16x256xf32>
    %c0_6 = arith.constant 0 : index
    %c0_7 = arith.constant 0 : index
    %8 = vector.load %arg7[%c0_6, %c0_7] : memref<16x256xf32, #tpu.memory_space<vmem>>, vector<16x256xf32>
    tpu.vector_store %arg7[%c0_6, %c0_7], %7 {strides = array<i32>} : memref<16x256xf32, #tpu.memory_space<vmem>>, vector<16x256xf32>,
    %c0_i32_8 = arith.constant 0 : i32
    %9 = arith.cmpi eq, %arg2, %c0_i32_8 : i32
    %10 = arith.extui %9 : i1 to i32
    %c0_i32_9 = arith.constant 0 : i32
    %11 = arith.cmpi ne, %10, %c0_i32_9 : i32
    scf.if %11 {
      %c0_10 = arith.constant 0 : index
      %c0_11 = arith.constant 0 : index
      %12 = vector.load %arg7[%c0_10, %c0_11] : memref<16x256xf32, #tpu.memory_space<vmem>>, vector<16x256xf32>
      %c0_12 = arith.constant 0 : index
      %c0_13 = arith.constant 0 : index
      %13 = vector.load %arg5[%c0_12, %c0_13] : memref<1x256xf32, #tpu.memory_space<vmem>>, vector<1x256xf32>
      %14 = vector.broadcast %13 : vector<1x256xf32> to vector<16x256xf32>
      %15 = arith.addf %12, %14 : vector<16x256xf32>
      %c0_14 = arith.constant 0 : index
      %c0_15 = arith.constant 0 : index
      %16 = vector.load %arg6[%c0_14, %c0_15] : memref<16x256xf32, #tpu.memory_space<vmem>>, vector<16x256xf32>
      tpu.vector_store %arg6[%c0_14, %c0_15], %15 {strides = array<i32>} : memref<16x256xf32, #tpu.memory_space<vmem>>, vector<16x256xf32>,
    } else {
    }
    return
  }
  func.func @transform_0(%arg0: i32, %arg1: i32, %arg2: i32) -> (i32, i32) {
    %c0_i32 = arith.constant 0 : i32
    return %arg0, %arg2 : i32, i32
  }
  func.func @transform_1(%arg0: i32, %arg1: i32, %arg2: i32) -> (i32, i32) {
    %c0_i32 = arith.constant 0 : i32
    return %arg2, %arg1 : i32, i32
  }
  func.func @transform_2(%arg0: i32, %arg1: i32, %arg2: i32) -> (i32, i32) {
    %c0_i32 = arith.constant 0 : i32
    %c0_i32_0 = arith.constant 0 : i32
    return %c0_i32, %arg1 : i32, i32
  }
  func.func @transform_3(%arg0: i32, %arg1: i32, %arg2: i32) -> (i32, i32) {
    %c0_i32 = arith.constant 0 : i32
    return %arg0, %arg1 : i32, i32
  }
}

module attributes {stable_mosaic.version = 11 : i64} {
  func.func @_linear_kernel(%arg0: i32, %arg1: i32, %arg2: i32, %arg3: memref<16x256xbf16, #tpu.memory_space<vmem>>, %arg4: memref<256x256xbf16, #tpu.memory_space<vmem>>, %arg5: memref<1x256xf32, #tpu.memory_space<vmem>>, %arg6: memref<16x256xbf16, #tpu.memory_space<vmem>>, %arg7: memref<16x256xf32, #tpu.memory_space<vmem>>) attributes {dimension_semantics = [#tpu.dimension_semantics<parallel>, #tpu.dimension_semantics<parallel>, #tpu.dimension_semantics<arbitrary>], iteration_bounds = array<i64: 1, 1, 1>, scalar_prefetch = 0 : i64, scratch_operands = 1 : i64, tpu.core_type = #tpu.core_type<tc>, window_params = [{transform_indices = @transform_0, window_bounds = array<i64: 16, 256>}, {transform_indices = @transform_1, window_bounds = array<i64: 256, 256>}, {transform_indices = @transform_2, window_bounds = array<i64: 1, 256>}, {transform_indices = @transform_3, window_bounds = array<i64: 16, 256>}]} {
    %c0_i32 = arith.constant 0 : i32
    %0 = arith.cmpi eq, %arg2, %c0_i32 : i32
    %1 = arith.extui %0 : i1 to i32
    %c0_i32_0 = arith.constant 0 : i32
    %2 = arith.cmpi ne, %1, %c0_i32_0 : i32
    scf.if %2 {
      %cst_10 = arith.constant 0.000000e+00 : f32
      %12 = vector.broadcast %cst_10 : f32 to vector<16x256xf32>
      %c0_11 = arith.constant 0 : index
      %c0_12 = arith.constant 0 : index
      %13 = vector.load %arg7[%c0_11, %c0_12] : memref<16x256xf32, #tpu.memory_space<vmem>>, vector<16x256xf32>
      tpu.vector_store %arg7[%c0_11, %c0_12], %12 {strides = array<i32>} : memref<16x256xf32, #tpu.memory_space<vmem>>, vector<16x256xf32>,
    } else {
    }
    %c0 = arith.constant 0 : index
    %c0_1 = arith.constant 0 : index
    %3 = vector.load %arg7[%c0, %c0_1] : memref<16x256xf32, #tpu.memory_space<vmem>>, vector<16x256xf32>
    %c0_2 = arith.constant 0 : index
    %c0_3 = arith.constant 0 : index
    %4 = vector.load %arg3[%c0_2, %c0_3] : memref<16x256xbf16, #tpu.memory_space<vmem>>, vector<16x256xbf16>
    %c0_4 = arith.constant 0 : index
    %c0_5 = arith.constant 0 : index
    %5 = vector.load %arg4[%c0_4, %c0_5] : memref<256x256xbf16, #tpu.memory_space<vmem>>, vector<256x256xbf16>
    %cst = arith.constant dense<0.000000e+00> : vector<16x256xf32>
    %6 = tpu.matmul %4, %5, %cst {dimension_numbers = #tpu.dot_dimension_numbers<[1], [0], [0], [1], [0, 0, 1, 1], [], []>} : vector<16x256xbf16>, vector<256x256xbf16>, vector<16x256xf32> -> vector<16x256xf32>
    %7 = arith.addf %3, %6 : vector<16x256xf32>
    %c0_6 = arith.constant 0 : index
    %c0_7 = arith.constant 0 : index
    %8 = vector.load %arg7[%c0_6, %c0_7] : memref<16x256xf32, #tpu.memory_space<vmem>>, vector<16x256xf32>
    tpu.vector_store %arg7[%c0_6, %c0_7], %7 {strides = array<i32>} : memref<16x256xf32, #tpu.memory_space<vmem>>, vector<16x256xf32>,
    %c0_i32_8 = arith.constant 0 : i32
    %9 = arith.cmpi eq, %arg2, %c0_i32_8 : i32
    %10 = arith.extui %9 : i1 to i32
    %c0_i32_9 = arith.constant 0 : i32
    %11 = arith.cmpi ne, %10, %c0_i32_9 : i32
    scf.if %11 {
      %c0_10 = arith.constant 0 : index
      %c0_11 = arith.constant 0 : index
      %12 = vector.load %arg7[%c0_10, %c0_11] : memref<16x256xf32, #tpu.memory_space<vmem>>, vector<16x256xf32>
      %c0_12 = arith.constant 0 : index
      %c0_13 = arith.constant 0 : index
      %13 = vector.load %arg5[%c0_12, %c0_13] : memref<1x256xf32, #tpu.memory_space<vmem>>, vector<1x256xf32>
      %14 = vector.broadcast %13 : vector<1x256xf32> to vector<16x256xf32>
      %15 = arith.addf %12, %14 : vector<16x256xf32>
      %cst_14 = arith.constant 0.000000e+00 : f32
      %16 = vector.broadcast %cst_14 : f32 to vector<16x256xf32>
      %17 = arith.maximumf %15, %16 : vector<16x256xf32>
      %18 = arith.truncf %17 : vector<16x256xf32> to vector<16x256xbf16>
      %c0_15 = arith.constant 0 : index
      %c0_16 = arith.constant 0 : index
      %19 = vector.load %arg6[%c0_15, %c0_16] : memref<16x256xbf16, #tpu.memory_space<vmem>>, vector<16x256xbf16>
      tpu.vector_store %arg6[%c0_15, %c0_16], %18 {strides = array<i32>} : memref<16x256xbf16, #tpu.memory_space<vmem>>, vector<16x256xbf16>,
    } else {
    }
    return
  }
  func.func @transform_0(%arg0: i32, %arg1: i32, %arg2: i32) -> (i32, i32) {
    %c0_i32 = arith.constant 0 : i32
    return %arg0, %arg2 : i32, i32
  }
  func.func @transform_1(%arg0: i32, %arg1: i32, %arg2: i32) -> (i32, i32) {
    %c0_i32 = arith.constant 0 : i32
    return %arg2, %arg1 : i32, i32
  }
  func.func @transform_2(%arg0: i32, %arg1: i32, %arg2: i32) -> (i32, i32) {
    %c0_i32 = arith.constant 0 : i32
    %c0_i32_0 = arith.constant 0 : i32
    return %c0_i32, %arg1 : i32, i32
  }
  func.func @transform_3(%arg0: i32, %arg1: i32, %arg2: i32) -> (i32, i32) {
    %c0_i32 = arith.constant 0 : i32
    return %arg0, %arg1 : i32, i32
  }
}

module attributes {stable_mosaic.version = 11 : i64} {
  func.func @_linear_kernel(%arg0: i32, %arg1: i32, %arg2: i32, %arg3: memref<16x256xbf16, #tpu.memory_space<vmem>>, %arg4: memref<256x384xbf16, #tpu.memory_space<vmem>>, %arg5: memref<1x384xf32, #tpu.memory_space<vmem>>, %arg6: memref<16x384xbf16, #tpu.memory_space<vmem>>, %arg7: memref<16x384xf32, #tpu.memory_space<vmem>>) attributes {dimension_semantics = [#tpu.dimension_semantics<parallel>, #tpu.dimension_semantics<parallel>, #tpu.dimension_semantics<arbitrary>], iteration_bounds = array<i64: 1, 2, 1>, scalar_prefetch = 0 : i64, scratch_operands = 1 : i64, tpu.core_type = #tpu.core_type<tc>, window_params = [{transform_indices = @transform_0, window_bounds = array<i64: 16, 256>}, {transform_indices = @transform_1, window_bounds = array<i64: 256, 384>}, {transform_indices = @transform_2, window_bounds = array<i64: 1, 384>}, {transform_indices = @transform_3, window_bounds = array<i64: 16, 384>}]} {
    %c0_i32 = arith.constant 0 : i32
    %0 = arith.cmpi eq, %arg2, %c0_i32 : i32
    %1 = arith.extui %0 : i1 to i32
    %c0_i32_0 = arith.constant 0 : i32
    %2 = arith.cmpi ne, %1, %c0_i32_0 : i32
    scf.if %2 {
      %cst_10 = arith.constant 0.000000e+00 : f32
      %12 = vector.broadcast %cst_10 : f32 to vector<16x384xf32>
      %c0_11 = arith.constant 0 : index
      %c0_12 = arith.constant 0 : index
      %13 = vector.load %arg7[%c0_11, %c0_12] : memref<16x384xf32, #tpu.memory_space<vmem>>, vector<16x384xf32>
      tpu.vector_store %arg7[%c0_11, %c0_12], %12 {strides = array<i32>} : memref<16x384xf32, #tpu.memory_space<vmem>>, vector<16x384xf32>,
    } else {
    }
    %c0 = arith.constant 0 : index
    %c0_1 = arith.constant 0 : index
    %3 = vector.load %arg7[%c0, %c0_1] : memref<16x384xf32, #tpu.memory_space<vmem>>, vector<16x384xf32>
    %c0_2 = arith.constant 0 : index
    %c0_3 = arith.constant 0 : index
    %4 = vector.load %arg3[%c0_2, %c0_3] : memref<16x256xbf16, #tpu.memory_space<vmem>>, vector<16x256xbf16>
    %c0_4 = arith.constant 0 : index
    %c0_5 = arith.constant 0 : index
    %5 = vector.load %arg4[%c0_4, %c0_5] : memref<256x384xbf16, #tpu.memory_space<vmem>>, vector<256x384xbf16>
    %cst = arith.constant dense<0.000000e+00> : vector<16x384xf32>
    %6 = tpu.matmul %4, %5, %cst {dimension_numbers = #tpu.dot_dimension_numbers<[1], [0], [0], [1], [0, 0, 1, 1], [], []>} : vector<16x256xbf16>, vector<256x384xbf16>, vector<16x384xf32> -> vector<16x384xf32>
    %7 = arith.addf %3, %6 : vector<16x384xf32>
    %c0_6 = arith.constant 0 : index
    %c0_7 = arith.constant 0 : index
    %8 = vector.load %arg7[%c0_6, %c0_7] : memref<16x384xf32, #tpu.memory_space<vmem>>, vector<16x384xf32>
    tpu.vector_store %arg7[%c0_6, %c0_7], %7 {strides = array<i32>} : memref<16x384xf32, #tpu.memory_space<vmem>>, vector<16x384xf32>,
    %c0_i32_8 = arith.constant 0 : i32
    %9 = arith.cmpi eq, %arg2, %c0_i32_8 : i32
    %10 = arith.extui %9 : i1 to i32
    %c0_i32_9 = arith.constant 0 : i32
    %11 = arith.cmpi ne, %10, %c0_i32_9 : i32
    scf.if %11 {
      %c0_10 = arith.constant 0 : index
      %c0_11 = arith.constant 0 : index
      %12 = vector.load %arg7[%c0_10, %c0_11] : memref<16x384xf32, #tpu.memory_space<vmem>>, vector<16x384xf32>
      %c0_12 = arith.constant 0 : index
      %c0_13 = arith.constant 0 : index
      %13 = vector.load %arg5[%c0_12, %c0_13] : memref<1x384xf32, #tpu.memory_space<vmem>>, vector<1x384xf32>
      %14 = vector.broadcast %13 : vector<1x384xf32> to vector<16x384xf32>
      %15 = arith.addf %12, %14 : vector<16x384xf32>
      %16 = arith.truncf %15 : vector<16x384xf32> to vector<16x384xbf16>
      %c0_14 = arith.constant 0 : index
      %c0_15 = arith.constant 0 : index
      %17 = vector.load %arg6[%c0_14, %c0_15] : memref<16x384xbf16, #tpu.memory_space<vmem>>, vector<16x384xbf16>
      tpu.vector_store %arg6[%c0_14, %c0_15], %16 {strides = array<i32>} : memref<16x384xbf16, #tpu.memory_space<vmem>>, vector<16x384xbf16>,
    } else {
    }
    return
  }
  func.func @transform_0(%arg0: i32, %arg1: i32, %arg2: i32) -> (i32, i32) {
    %c0_i32 = arith.constant 0 : i32
    return %arg0, %arg2 : i32, i32
  }
  func.func @transform_1(%arg0: i32, %arg1: i32, %arg2: i32) -> (i32, i32) {
    %c0_i32 = arith.constant 0 : i32
    return %arg2, %arg1 : i32, i32
  }
  func.func @transform_2(%arg0: i32, %arg1: i32, %arg2: i32) -> (i32, i32) {
    %c0_i32 = arith.constant 0 : i32
    %c0_i32_0 = arith.constant 0 : i32
    return %c0_i32, %arg1 : i32, i32
  }
  func.func @transform_3(%arg0: i32, %arg1: i32, %arg2: i32) -> (i32, i32) {
    %c0_i32 = arith.constant 0 : i32
    return %arg0, %arg1 : i32, i32
  }
}

module attributes {stable_mosaic.version = 11 : i64} {
  func.func @_ln_kernel(%arg0: i32, %arg1: memref<16x256xf32, #tpu.memory_space<vmem>>, %arg2: memref<1x256xf32, #tpu.memory_space<vmem>>, %arg3: memref<1x256xf32, #tpu.memory_space<vmem>>, %arg4: memref<16x256xf32, #tpu.memory_space<vmem>>) attributes {dimension_semantics = [#tpu.dimension_semantics<parallel>], iteration_bounds = array<i64: 1>, scalar_prefetch = 0 : i64, scratch_operands = 0 : i64, tpu.core_type = #tpu.core_type<tc>, window_params = [{transform_indices = @transform_0, window_bounds = array<i64: 16, 256>}, {pipeline_mode = #tpu.pipeline_mode<synchronous>, transform_indices = @transform_1, window_bounds = array<i64: 1, 256>}, {pipeline_mode = #tpu.pipeline_mode<synchronous>, transform_indices = @transform_2, window_bounds = array<i64: 1, 256>}, {transform_indices = @transform_3, window_bounds = array<i64: 16, 256>}]} {
    %c0 = arith.constant 0 : index
    %c0_0 = arith.constant 0 : index
    %0 = vector.load %arg1[%c0, %c0_0] : memref<16x256xf32, #tpu.memory_space<vmem>>, vector<16x256xf32>
    %c0_1 = arith.constant 0 : index
    %c0_2 = arith.constant 0 : index
    %1 = vector.load %arg2[%c0_1, %c0_2] : memref<1x256xf32, #tpu.memory_space<vmem>>, vector<1x256xf32>
    %c0_3 = arith.constant 0 : index
    %c0_4 = arith.constant 0 : index
    %2 = vector.load %arg3[%c0_3, %c0_4] : memref<1x256xf32, #tpu.memory_space<vmem>>, vector<1x256xf32>
    %cst = arith.constant dense<0.000000e+00> : vector<16xf32>
    %3 = vector.multi_reduction <add>, %0, %cst [1] : vector<16x256xf32> to vector<16xf32>
    %4 = vector.shape_cast %3 : vector<16xf32> to vector<16x1xf32>
    %cst_5 = arith.constant 2.560000e+02 : f32
    %5 = vector.broadcast %cst_5 : f32 to vector<16x1xf32>
    %6 = arith.divf %4, %5 : vector<16x1xf32>
    %7 = vector.broadcast %6 : vector<16x1xf32> to vector<16x256xf32>
    %8 = arith.subf %0, %7 : vector<16x256xf32>
    %9 = arith.mulf %8, %8 : vector<16x256xf32>
    %cst_6 = arith.constant dense<0.000000e+00> : vector<16xf32>
    %10 = vector.multi_reduction <add>, %9, %cst_6 [1] : vector<16x256xf32> to vector<16xf32>
    %11 = vector.shape_cast %10 : vector<16xf32> to vector<16x1xf32>
    %cst_7 = arith.constant 2.560000e+02 : f32
    %12 = vector.broadcast %cst_7 : f32 to vector<16x1xf32>
    %13 = arith.divf %11, %12 : vector<16x1xf32>
    %cst_8 = arith.constant 9.99999974E-6 : f32
    %14 = vector.broadcast %cst_8 : f32 to vector<16x1xf32>
    %15 = arith.addf %13, %14 : vector<16x1xf32>
    %16 = math.rsqrt %15 : vector<16x1xf32>
    %17 = vector.broadcast %16 : vector<16x1xf32> to vector<16x256xf32>
    %18 = arith.mulf %8, %17 : vector<16x256xf32>
    %19 = vector.broadcast %1 : vector<1x256xf32> to vector<16x256xf32>
    %20 = arith.mulf %18, %19 : vector<16x256xf32>
    %21 = vector.broadcast %2 : vector<1x256xf32> to vector<16x256xf32>
    %22 = arith.addf %20, %21 : vector<16x256xf32>
    %c0_9 = arith.constant 0 : index
    %c0_10 = arith.constant 0 : index
    %23 = vector.load %arg4[%c0_9, %c0_10] : memref<16x256xf32, #tpu.memory_space<vmem>>, vector<16x256xf32>
    tpu.vector_store %arg4[%c0_9, %c0_10], %22 {strides = array<i32>} : memref<16x256xf32, #tpu.memory_space<vmem>>, vector<16x256xf32>,
    return
  }
  func.func @transform_0(%arg0: i32) -> (i32, i32) {
    %c0_i32 = arith.constant 0 : i32
    %c0_i32_0 = arith.constant 0 : i32
    return %arg0, %c0_i32 : i32, i32
  }
  func.func @transform_1(%arg0: i32) -> (i32, i32) {
    %c0_i32 = arith.constant 0 : i32
    %c0_i32_0 = arith.constant 0 : i32
    %c0_i32_1 = arith.constant 0 : i32
    return %c0_i32, %c0_i32_0 : i32, i32
  }
  func.func @transform_2(%arg0: i32) -> (i32, i32) {
    %c0_i32 = arith.constant 0 : i32
    %c0_i32_0 = arith.constant 0 : i32
    %c0_i32_1 = arith.constant 0 : i32
    return %c0_i32, %c0_i32_0 : i32, i32
  }
  func.func @transform_3(%arg0: i32) -> (i32, i32) {
    %c0_i32 = arith.constant 0 : i32
    %c0_i32_0 = arith.constant 0 : i32
    return %arg0, %c0_i32 : i32, i32
  }
}

module attributes {stable_mosaic.version = 11 : i64} {
  func.func @_linear_kernel(%arg0: i32, %arg1: i32, %arg2: i32, %arg3: memref<16x256xbf16, #tpu.memory_space<vmem>>, %arg4: memref<256x512xbf16, #tpu.memory_space<vmem>>, %arg5: memref<1x512xf32, #tpu.memory_space<vmem>>, %arg6: memref<16x512xbf16, #tpu.memory_space<vmem>>, %arg7: memref<16x512xf32, #tpu.memory_space<vmem>>) attributes {dimension_semantics = [#tpu.dimension_semantics<parallel>, #tpu.dimension_semantics<parallel>, #tpu.dimension_semantics<arbitrary>], iteration_bounds = array<i64: 1, 1, 1>, scalar_prefetch = 0 : i64, scratch_operands = 1 : i64, tpu.core_type = #tpu.core_type<tc>, window_params = [{transform_indices = @transform_0, window_bounds = array<i64: 16, 256>}, {transform_indices = @transform_1, window_bounds = array<i64: 256, 512>}, {transform_indices = @transform_2, window_bounds = array<i64: 1, 512>}, {transform_indices = @transform_3, window_bounds = array<i64: 16, 512>}]} {
    %c0_i32 = arith.constant 0 : i32
    %0 = arith.cmpi eq, %arg2, %c0_i32 : i32
    %1 = arith.extui %0 : i1 to i32
    %c0_i32_0 = arith.constant 0 : i32
    %2 = arith.cmpi ne, %1, %c0_i32_0 : i32
    scf.if %2 {
      %cst_10 = arith.constant 0.000000e+00 : f32
      %12 = vector.broadcast %cst_10 : f32 to vector<16x512xf32>
      %c0_11 = arith.constant 0 : index
      %c0_12 = arith.constant 0 : index
      %13 = vector.load %arg7[%c0_11, %c0_12] : memref<16x512xf32, #tpu.memory_space<vmem>>, vector<16x512xf32>
      tpu.vector_store %arg7[%c0_11, %c0_12], %12 {strides = array<i32>} : memref<16x512xf32, #tpu.memory_space<vmem>>, vector<16x512xf32>,
    } else {
    }
    %c0 = arith.constant 0 : index
    %c0_1 = arith.constant 0 : index
    %3 = vector.load %arg7[%c0, %c0_1] : memref<16x512xf32, #tpu.memory_space<vmem>>, vector<16x512xf32>
    %c0_2 = arith.constant 0 : index
    %c0_3 = arith.constant 0 : index
    %4 = vector.load %arg3[%c0_2, %c0_3] : memref<16x256xbf16, #tpu.memory_space<vmem>>, vector<16x256xbf16>
    %c0_4 = arith.constant 0 : index
    %c0_5 = arith.constant 0 : index
    %5 = vector.load %arg4[%c0_4, %c0_5] : memref<256x512xbf16, #tpu.memory_space<vmem>>, vector<256x512xbf16>
    %cst = arith.constant dense<0.000000e+00> : vector<16x512xf32>
    %6 = tpu.matmul %4, %5, %cst {dimension_numbers = #tpu.dot_dimension_numbers<[1], [0], [0], [1], [0, 0, 1, 1], [], []>} : vector<16x256xbf16>, vector<256x512xbf16>, vector<16x512xf32> -> vector<16x512xf32>
    %7 = arith.addf %3, %6 : vector<16x512xf32>
    %c0_6 = arith.constant 0 : index
    %c0_7 = arith.constant 0 : index
    %8 = vector.load %arg7[%c0_6, %c0_7] : memref<16x512xf32, #tpu.memory_space<vmem>>, vector<16x512xf32>
    tpu.vector_store %arg7[%c0_6, %c0_7], %7 {strides = array<i32>} : memref<16x512xf32, #tpu.memory_space<vmem>>, vector<16x512xf32>,
    %c0_i32_8 = arith.constant 0 : i32
    %9 = arith.cmpi eq, %arg2, %c0_i32_8 : i32
    %10 = arith.extui %9 : i1 to i32
    %c0_i32_9 = arith.constant 0 : i32
    %11 = arith.cmpi ne, %10, %c0_i32_9 : i32
    scf.if %11 {
      %c0_10 = arith.constant 0 : index
      %c0_11 = arith.constant 0 : index
      %12 = vector.load %arg7[%c0_10, %c0_11] : memref<16x512xf32, #tpu.memory_space<vmem>>, vector<16x512xf32>
      %c0_12 = arith.constant 0 : index
      %c0_13 = arith.constant 0 : index
      %13 = vector.load %arg5[%c0_12, %c0_13] : memref<1x512xf32, #tpu.memory_space<vmem>>, vector<1x512xf32>
      %14 = vector.broadcast %13 : vector<1x512xf32> to vector<16x512xf32>
      %15 = arith.addf %12, %14 : vector<16x512xf32>
      %16 = arith.truncf %15 : vector<16x512xf32> to vector<16x512xbf16>
      %c0_14 = arith.constant 0 : index
      %c0_15 = arith.constant 0 : index
      %17 = vector.load %arg6[%c0_14, %c0_15] : memref<16x512xbf16, #tpu.memory_space<vmem>>, vector<16x512xbf16>
      tpu.vector_store %arg6[%c0_14, %c0_15], %16 {strides = array<i32>} : memref<16x512xbf16, #tpu.memory_space<vmem>>, vector<16x512xbf16>,
    } else {
    }
    return
  }
  func.func @transform_0(%arg0: i32, %arg1: i32, %arg2: i32) -> (i32, i32) {
    %c0_i32 = arith.constant 0 : i32
    return %arg0, %arg2 : i32, i32
  }
  func.func @transform_1(%arg0: i32, %arg1: i32, %arg2: i32) -> (i32, i32) {
    %c0_i32 = arith.constant 0 : i32
    return %arg2, %arg1 : i32, i32
  }
  func.func @transform_2(%arg0: i32, %arg1: i32, %arg2: i32) -> (i32, i32) {
    %c0_i32 = arith.constant 0 : i32
    %c0_i32_0 = arith.constant 0 : i32
    return %c0_i32, %arg1 : i32, i32
  }
  func.func @transform_3(%arg0: i32, %arg1: i32, %arg2: i32) -> (i32, i32) {
    %c0_i32 = arith.constant 0 : i32
    return %arg0, %arg1 : i32, i32
  }
}

module attributes {stable_mosaic.version = 11 : i64} {
  func.func @_self_attn_kernel(%arg0: i32, %arg1: memref<1x8x768xbf16, #tpu.memory_space<vmem>>, %arg2: memref<1x1x8xf32, #tpu.memory_space<vmem>>, %arg3: memref<1x8x256xbf16, #tpu.memory_space<vmem>>) attributes {dimension_semantics = [#tpu.dimension_semantics<parallel>], iteration_bounds = array<i64: 2>, scalar_prefetch = 0 : i64, scratch_operands = 0 : i64, tpu.core_type = #tpu.core_type<tc>, window_params = [{transform_indices = @transform_0, window_bounds = array<i64: 1, 8, 768>}, {transform_indices = @transform_1, window_bounds = array<i64: 1, 1, 8>}, {transform_indices = @transform_2, window_bounds = array<i64: 1, 8, 256>}]} {
    %c0 = arith.constant 0 : index
    %c0_0 = arith.constant 0 : index
    %c0_1 = arith.constant 0 : index
    %0 = vector.load %arg2[%c0, %c0_0, %c0_1] : memref<1x1x8xf32, #tpu.memory_space<vmem>>, vector<1x1x8xf32>
    %1 = vector.shape_cast %0 : vector<1x1x8xf32> to vector<1x8xf32>
    %2 = tpu.iota {dimensions = array<i32: 0>} : vector<8x8xi32>
    %3 = tpu.iota {dimensions = array<i32: 1>} : vector<8x8xi32>
    %4 = arith.cmpi sle, %3, %2 : vector<8x8xi32>
    %cst = arith.constant 0.000000e+00 : f32
    %cst_2 = arith.constant -1.000000e+30 : f32
    %5 = vector.broadcast %cst : f32 to vector<8x8xf32>
    %6 = vector.broadcast %cst_2 : f32 to vector<8x8xf32>
    %7 = arith.select %4, %5, %6 : vector<8x8xi1>, vector<8x8xf32>
    %8 = vector.broadcast %1 : vector<1x8xf32> to vector<8x8xf32>
    %9 = arith.addf %7, %8 : vector<8x8xf32>
    %c0_3 = arith.constant 0 : index
    %c0_4 = arith.constant 0 : index
    %c0_5 = arith.constant 0 : index
    %10 = vector.load %arg1[%c0_3, %c0_4, %c0_5] : memref<1x8x768xbf16, #tpu.memory_space<vmem>>, vector<1x8x128xbf16>
    %11 = vector.shape_cast %10 : vector<1x8x128xbf16> to vector<8x128xbf16>
    %c0_6 = arith.constant 0 : index
    %c0_7 = arith.constant 0 : index
    %c256 = arith.constant 256 : index
    %12 = vector.load %arg1[%c0_6, %c0_7, %c256] : memref<1x8x768xbf16, #tpu.memory_space<vmem>>, vector<1x8x128xbf16>
    %13 = vector.shape_cast %12 : vector<1x8x128xbf16> to vector<8x128xbf16>
    %c0_8 = arith.constant 0 : index
    %c0_9 = arith.constant 0 : index
    %c512 = arith.constant 512 : index
    %14 = vector.load %arg1[%c0_8, %c0_9, %c512] : memref<1x8x768xbf16, #tpu.memory_space<vmem>>, vector<1x8x128xbf16>
    %15 = vector.shape_cast %14 : vector<1x8x128xbf16> to vector<8x128xbf16>
    %cst_10 = arith.constant dense<0.000000e+00> : vector<8x8xf32>
    %16 = tpu.matmul %11, %13, %cst_10 {dimension_numbers = #tpu.dot_dimension_numbers<[1], [1], [0], [0], [0, 0, 1, 0], [], []>} : vector<8x128xbf16>, vector<8x128xbf16>, vector<8x8xf32> -> vector<8x8xf32>
    %cst_11 = arith.constant 0.0883883461 : f32
    %17 = vector.broadcast %cst_11 : f32 to vector<8x8xf32>
    %18 = arith.mulf %16, %17 : vector<8x8xf32>
    %19 = arith.addf %18, %9 : vector<8x8xf32>
    %cst_12 = arith.constant dense<0xFF800000> : vector<8xf32>
    %20 = vector.multi_reduction <maximumf>, %19, %cst_12 [1] : vector<8x8xf32> to vector<8xf32>
    %21 = vector.shape_cast %20 : vector<8xf32> to vector<8x1xf32>
    %22 = vector.broadcast %21 : vector<8x1xf32> to vector<8x8xf32>
    %23 = arith.subf %19, %22 : vector<8x8xf32>
    %24 = math.exp %23 : vector<8x8xf32>
    %cst_13 = arith.constant dense<0.000000e+00> : vector<8xf32>
    %25 = vector.multi_reduction <add>, %24, %cst_13 [1] : vector<8x8xf32> to vector<8xf32>
    %26 = vector.shape_cast %25 : vector<8xf32> to vector<8x1xf32>
    %27 = tpu.reciprocal %26 {approx = true} : vector<8x1xf32> -> vector<8x1xf32>
    %28 = vector.broadcast %27 : vector<8x1xf32> to vector<8x8xf32>
    %29 = arith.mulf %24, %28 : vector<8x8xf32>
    %30 = arith.truncf %29 : vector<8x8xf32> to vector<8x8xbf16>
    %cst_14 = arith.constant dense<0.000000e+00> : vector<8x128xf32>
    %31 = tpu.matmul %30, %15, %cst_14 {dimension_numbers = #tpu.dot_dimension_numbers<[1], [0], [0], [1], [0, 0, 1, 1], [], []>} : vector<8x8xbf16>, vector<8x128xbf16>, vector<8x128xf32> -> vector<8x128xf32>
    %32 = arith.truncf %31 : vector<8x128xf32> to vector<8x128xbf16>
    %c0_15 = arith.constant 0 : index
    %c0_16 = arith.constant 0 : index
    %c0_17 = arith.constant 0 : index
    %33 = vector.load %arg3[%c0_15, %c0_16, %c0_17] : memref<1x8x256xbf16, #tpu.memory_space<vmem>>, vector<1x8x128xbf16>
    %34 = vector.shape_cast %33 : vector<1x8x128xbf16> to vector<8x128xbf16>
    %35 = vector.shape_cast %32 : vector<8x128xbf16> to vector<1x8x128xbf16>
    tpu.vector_store %arg3[%c0_15, %c0_16, %c0_17], %35 {strides = array<i32>} : memref<1x8x256xbf16, #tpu.memory_space<vmem>>, vector<1x8x128xbf16>,
    %c0_18 = arith.constant 0 : index
    %c0_19 = arith.constant 0 : index
    %c128 = arith.constant 128 : index
    %36 = vector.load %arg1[%c0_18, %c0_19, %c128] : memref<1x8x768xbf16, #tpu.memory_space<vmem>>, vector<1x8x128xbf16>
    %37 = vector.shape_cast %36 : vector<1x8x128xbf16> to vector<8x128xbf16>
    %c0_20 = arith.constant 0 : index
    %c0_21 = arith.constant 0 : index
    %c384 = arith.constant 384 : index
    %38 = vector.load %arg1[%c0_20, %c0_21, %c384] : memref<1x8x768xbf16, #tpu.memory_space<vmem>>, vector<1x8x128xbf16>
    %39 = vector.shape_cast %38 : vector<1x8x128xbf16> to vector<8x128xbf16>
    %c0_22 = arith.constant 0 : index
    %c0_23 = arith.constant 0 : index
    %c640 = arith.constant 640 : index
    %40 = vector.load %arg1[%c0_22, %c0_23, %c640] : memref<1x8x768xbf16, #tpu.memory_space<vmem>>, vector<1x8x128xbf16>
    %41 = vector.shape_cast %40 : vector<1x8x128xbf16> to vector<8x128xbf16>
    %cst_24 = arith.constant dense<0.000000e+00> : vector<8x8xf32>
    %42 = tpu.matmul %37, %39, %cst_24 {dimension_numbers = #tpu.dot_dimension_numbers<[1], [1], [0], [0], [0, 0, 1, 0], [], []>} : vector<8x128xbf16>, vector<8x128xbf16>, vector<8x8xf32> -> vector<8x8xf32>
    %cst_25 = arith.constant 0.0883883461 : f32
    %43 = vector.broadcast %cst_25 : f32 to vector<8x8xf32>
    %44 = arith.mulf %42, %43 : vector<8x8xf32>
    %45 = arith.addf %44, %9 : vector<8x8xf32>
    %cst_26 = arith.constant dense<0xFF800000> : vector<8xf32>
    %46 = vector.multi_reduction <maximumf>, %45, %cst_26 [1] : vector<8x8xf32> to vector<8xf32>
    %47 = vector.shape_cast %46 : vector<8xf32> to vector<8x1xf32>
    %48 = vector.broadcast %47 : vector<8x1xf32> to vector<8x8xf32>
    %49 = arith.subf %45, %48 : vector<8x8xf32>
    %50 = math.exp %49 : vector<8x8xf32>
    %cst_27 = arith.constant dense<0.000000e+00> : vector<8xf32>
    %51 = vector.multi_reduction <add>, %50, %cst_27 [1] : vector<8x8xf32> to vector<8xf32>
    %52 = vector.shape_cast %51 : vector<8xf32> to vector<8x1xf32>
    %53 = tpu.reciprocal %52 {approx = true} : vector<8x1xf32> -> vector<8x1xf32>
    %54 = vector.broadcast %53 : vector<8x1xf32> to vector<8x8xf32>
    %55 = arith.mulf %50, %54 : vector<8x8xf32>
    %56 = arith.truncf %55 : vector<8x8xf32> to vector<8x8xbf16>
    %cst_28 = arith.constant dense<0.000000e+00> : vector<8x128xf32>
    %57 = tpu.matmul %56, %41, %cst_28 {dimension_numbers = #tpu.dot_dimension_numbers<[1], [0], [0], [1], [0, 0, 1, 1], [], []>} : vector<8x8xbf16>, vector<8x128xbf16>, vector<8x128xf32> -> vector<8x128xf32>
    %58 = arith.truncf %57 : vector<8x128xf32> to vector<8x128xbf16>
    %c0_29 = arith.constant 0 : index
    %c0_30 = arith.constant 0 : index
    %c128_31 = arith.constant 128 : index
    %59 = vector.load %arg3[%c0_29, %c0_30, %c128_31] : memref<1x8x256xbf16, #tpu.memory_space<vmem>>, vector<1x8x128xbf16>
    %60 = vector.shape_cast %59 : vector<1x8x128xbf16> to vector<8x128xbf16>
    %61 = vector.shape_cast %58 : vector<8x128xbf16> to vector<1x8x128xbf16>
    tpu.vector_store %arg3[%c0_29, %c0_30, %c128_31], %61 {strides = array<i32>} : memref<1x8x256xbf16, #tpu.memory_space<vmem>>, vector<1x8x128xbf16>,
    return
  }
  func.func @transform_0(%arg0: i32) -> (i32, i32, i32) {
    %c0_i32 = arith.constant 0 : i32
    %c0_i32_0 = arith.constant 0 : i32
    %c0_i32_1 = arith.constant 0 : i32
    return %arg0, %c0_i32, %c0_i32_0 : i32, i32, i32
  }
  func.func @transform_1(%arg0: i32) -> (i32, i32, i32) {
    %c0_i32 = arith.constant 0 : i32
    %c0_i32_0 = arith.constant 0 : i32
    %c0_i32_1 = arith.constant 0 : i32
    return %arg0, %c0_i32, %c0_i32_0 : i32, i32, i32
  }
  func.func @transform_2(%arg0: i32) -> (i32, i32, i32) {
    %c0_i32 = arith.constant 0 : i32
    %c0_i32_0 = arith.constant 0 : i32
    %c0_i32_1 = arith.constant 0 : i32
    return %arg0, %c0_i32, %c0_i32_0 : i32, i32, i32
  }
}

module attributes {stable_mosaic.version = 11 : i64} {
  func.func @_linear_kernel(%arg0: i32, %arg1: i32, %arg2: i32, %arg3: memref<16x256xbf16, #tpu.memory_space<vmem>>, %arg4: memref<256x256xbf16, #tpu.memory_space<vmem>>, %arg5: memref<1x256xf32, #tpu.memory_space<vmem>>, %arg6: memref<16x256xbf16, #tpu.memory_space<vmem>>, %arg7: memref<16x256xf32, #tpu.memory_space<vmem>>) attributes {dimension_semantics = [#tpu.dimension_semantics<parallel>, #tpu.dimension_semantics<parallel>, #tpu.dimension_semantics<arbitrary>], iteration_bounds = array<i64: 1, 1, 1>, scalar_prefetch = 0 : i64, scratch_operands = 1 : i64, tpu.core_type = #tpu.core_type<tc>, window_params = [{transform_indices = @transform_0, window_bounds = array<i64: 16, 256>}, {transform_indices = @transform_1, window_bounds = array<i64: 256, 256>}, {transform_indices = @transform_2, window_bounds = array<i64: 1, 256>}, {transform_indices = @transform_3, window_bounds = array<i64: 16, 256>}]} {
    %c0_i32 = arith.constant 0 : i32
    %0 = arith.cmpi eq, %arg2, %c0_i32 : i32
    %1 = arith.extui %0 : i1 to i32
    %c0_i32_0 = arith.constant 0 : i32
    %2 = arith.cmpi ne, %1, %c0_i32_0 : i32
    scf.if %2 {
      %cst_10 = arith.constant 0.000000e+00 : f32
      %12 = vector.broadcast %cst_10 : f32 to vector<16x256xf32>
      %c0_11 = arith.constant 0 : index
      %c0_12 = arith.constant 0 : index
      %13 = vector.load %arg7[%c0_11, %c0_12] : memref<16x256xf32, #tpu.memory_space<vmem>>, vector<16x256xf32>
      tpu.vector_store %arg7[%c0_11, %c0_12], %12 {strides = array<i32>} : memref<16x256xf32, #tpu.memory_space<vmem>>, vector<16x256xf32>,
    } else {
    }
    %c0 = arith.constant 0 : index
    %c0_1 = arith.constant 0 : index
    %3 = vector.load %arg7[%c0, %c0_1] : memref<16x256xf32, #tpu.memory_space<vmem>>, vector<16x256xf32>
    %c0_2 = arith.constant 0 : index
    %c0_3 = arith.constant 0 : index
    %4 = vector.load %arg3[%c0_2, %c0_3] : memref<16x256xbf16, #tpu.memory_space<vmem>>, vector<16x256xbf16>
    %c0_4 = arith.constant 0 : index
    %c0_5 = arith.constant 0 : index
    %5 = vector.load %arg4[%c0_4, %c0_5] : memref<256x256xbf16, #tpu.memory_space<vmem>>, vector<256x256xbf16>
    %cst = arith.constant dense<0.000000e+00> : vector<16x256xf32>
    %6 = tpu.matmul %4, %5, %cst {dimension_numbers = #tpu.dot_dimension_numbers<[1], [0], [0], [1], [0, 0, 1, 1], [], []>} : vector<16x256xbf16>, vector<256x256xbf16>, vector<16x256xf32> -> vector<16x256xf32>
    %7 = arith.addf %3, %6 : vector<16x256xf32>
    %c0_6 = arith.constant 0 : index
    %c0_7 = arith.constant 0 : index
    %8 = vector.load %arg7[%c0_6, %c0_7] : memref<16x256xf32, #tpu.memory_space<vmem>>, vector<16x256xf32>
    tpu.vector_store %arg7[%c0_6, %c0_7], %7 {strides = array<i32>} : memref<16x256xf32, #tpu.memory_space<vmem>>, vector<16x256xf32>,
    %c0_i32_8 = arith.constant 0 : i32
    %9 = arith.cmpi eq, %arg2, %c0_i32_8 : i32
    %10 = arith.extui %9 : i1 to i32
    %c0_i32_9 = arith.constant 0 : i32
    %11 = arith.cmpi ne, %10, %c0_i32_9 : i32
    scf.if %11 {
      %c0_10 = arith.constant 0 : index
      %c0_11 = arith.constant 0 : index
      %12 = vector.load %arg7[%c0_10, %c0_11] : memref<16x256xf32, #tpu.memory_space<vmem>>, vector<16x256xf32>
      %c0_12 = arith.constant 0 : index
      %c0_13 = arith.constant 0 : index
      %13 = vector.load %arg5[%c0_12, %c0_13] : memref<1x256xf32, #tpu.memory_space<vmem>>, vector<1x256xf32>
      %14 = vector.broadcast %13 : vector<1x256xf32> to vector<16x256xf32>
      %15 = arith.addf %12, %14 : vector<16x256xf32>
      %16 = arith.truncf %15 : vector<16x256xf32> to vector<16x256xbf16>
      %c0_14 = arith.constant 0 : index
      %c0_15 = arith.constant 0 : index
      %17 = vector.load %arg6[%c0_14, %c0_15] : memref<16x256xbf16, #tpu.memory_space<vmem>>, vector<16x256xbf16>
      tpu.vector_store %arg6[%c0_14, %c0_15], %16 {strides = array<i32>} : memref<16x256xbf16, #tpu.memory_space<vmem>>, vector<16x256xbf16>,
    } else {
    }
    return
  }
  func.func @transform_0(%arg0: i32, %arg1: i32, %arg2: i32) -> (i32, i32) {
    %c0_i32 = arith.constant 0 : i32
    return %arg0, %arg2 : i32, i32
  }
  func.func @transform_1(%arg0: i32, %arg1: i32, %arg2: i32) -> (i32, i32) {
    %c0_i32 = arith.constant 0 : i32
    return %arg2, %arg1 : i32, i32
  }
  func.func @transform_2(%arg0: i32, %arg1: i32, %arg2: i32) -> (i32, i32) {
    %c0_i32 = arith.constant 0 : i32
    %c0_i32_0 = arith.constant 0 : i32
    return %c0_i32, %arg1 : i32, i32
  }
  func.func @transform_3(%arg0: i32, %arg1: i32, %arg2: i32) -> (i32, i32) {
    %c0_i32 = arith.constant 0 : i32
    return %arg0, %arg1 : i32, i32
  }
}

module attributes {stable_mosaic.version = 11 : i64} {
  func.func @_cross_attn_kernel(%arg0: i32, %arg1: memref<1x8x256xbf16, #tpu.memory_space<vmem>>, %arg2: memref<1x8x512xbf16, #tpu.memory_space<vmem>>, %arg3: memref<1x1x8xf32, #tpu.memory_space<vmem>>, %arg4: memref<1x8x256xbf16, #tpu.memory_space<vmem>>) attributes {dimension_semantics = [#tpu.dimension_semantics<parallel>], iteration_bounds = array<i64: 2>, scalar_prefetch = 0 : i64, scratch_operands = 0 : i64, tpu.core_type = #tpu.core_type<tc>, window_params = [{transform_indices = @transform_0, window_bounds = array<i64: 1, 8, 256>}, {transform_indices = @transform_1, window_bounds = array<i64: 1, 8, 512>}, {transform_indices = @transform_2, window_bounds = array<i64: 1, 1, 8>}, {transform_indices = @transform_3, window_bounds = array<i64: 1, 8, 256>}]} {
    %c0 = arith.constant 0 : index
    %c0_0 = arith.constant 0 : index
    %c0_1 = arith.constant 0 : index
    %0 = vector.load %arg3[%c0, %c0_0, %c0_1] : memref<1x1x8xf32, #tpu.memory_space<vmem>>, vector<1x1x8xf32>
    %1 = vector.shape_cast %0 : vector<1x1x8xf32> to vector<1x8xf32>
    %c0_2 = arith.constant 0 : index
    %c0_3 = arith.constant 0 : index
    %c0_4 = arith.constant 0 : index
    %2 = vector.load %arg1[%c0_2, %c0_3, %c0_4] : memref<1x8x256xbf16, #tpu.memory_space<vmem>>, vector<1x8x128xbf16>
    %3 = vector.shape_cast %2 : vector<1x8x128xbf16> to vector<8x128xbf16>
    %c0_5 = arith.constant 0 : index
    %c0_6 = arith.constant 0 : index
    %c0_7 = arith.constant 0 : index
    %4 = vector.load %arg2[%c0_5, %c0_6, %c0_7] : memref<1x8x512xbf16, #tpu.memory_space<vmem>>, vector<1x8x128xbf16>
    %5 = vector.shape_cast %4 : vector<1x8x128xbf16> to vector<8x128xbf16>
    %c0_8 = arith.constant 0 : index
    %c0_9 = arith.constant 0 : index
    %c256 = arith.constant 256 : index
    %6 = vector.load %arg2[%c0_8, %c0_9, %c256] : memref<1x8x512xbf16, #tpu.memory_space<vmem>>, vector<1x8x128xbf16>
    %7 = vector.shape_cast %6 : vector<1x8x128xbf16> to vector<8x128xbf16>
    %cst = arith.constant dense<0.000000e+00> : vector<8x8xf32>
    %8 = tpu.matmul %3, %5, %cst {dimension_numbers = #tpu.dot_dimension_numbers<[1], [1], [0], [0], [0, 0, 1, 0], [], []>} : vector<8x128xbf16>, vector<8x128xbf16>, vector<8x8xf32> -> vector<8x8xf32>
    %cst_10 = arith.constant 0.0883883461 : f32
    %9 = vector.broadcast %cst_10 : f32 to vector<8x8xf32>
    %10 = arith.mulf %8, %9 : vector<8x8xf32>
    %11 = vector.broadcast %1 : vector<1x8xf32> to vector<8x8xf32>
    %12 = arith.addf %10, %11 : vector<8x8xf32>
    %cst_11 = arith.constant dense<0xFF800000> : vector<8xf32>
    %13 = vector.multi_reduction <maximumf>, %12, %cst_11 [1] : vector<8x8xf32> to vector<8xf32>
    %14 = vector.shape_cast %13 : vector<8xf32> to vector<8x1xf32>
    %15 = vector.broadcast %14 : vector<8x1xf32> to vector<8x8xf32>
    %16 = arith.subf %12, %15 : vector<8x8xf32>
    %17 = math.exp %16 : vector<8x8xf32>
    %cst_12 = arith.constant dense<0.000000e+00> : vector<8xf32>
    %18 = vector.multi_reduction <add>, %17, %cst_12 [1] : vector<8x8xf32> to vector<8xf32>
    %19 = vector.shape_cast %18 : vector<8xf32> to vector<8x1xf32>
    %20 = tpu.reciprocal %19 {approx = true} : vector<8x1xf32> -> vector<8x1xf32>
    %21 = vector.broadcast %20 : vector<8x1xf32> to vector<8x8xf32>
    %22 = arith.mulf %17, %21 : vector<8x8xf32>
    %23 = arith.truncf %22 : vector<8x8xf32> to vector<8x8xbf16>
    %cst_13 = arith.constant dense<0.000000e+00> : vector<8x128xf32>
    %24 = tpu.matmul %23, %7, %cst_13 {dimension_numbers = #tpu.dot_dimension_numbers<[1], [0], [0], [1], [0, 0, 1, 1], [], []>} : vector<8x8xbf16>, vector<8x128xbf16>, vector<8x128xf32> -> vector<8x128xf32>
    %25 = arith.truncf %24 : vector<8x128xf32> to vector<8x128xbf16>
    %c0_14 = arith.constant 0 : index
    %c0_15 = arith.constant 0 : index
    %c0_16 = arith.constant 0 : index
    %26 = vector.load %arg4[%c0_14, %c0_15, %c0_16] : memref<1x8x256xbf16, #tpu.memory_space<vmem>>, vector<1x8x128xbf16>
    %27 = vector.shape_cast %26 : vector<1x8x128xbf16> to vector<8x128xbf16>
    %28 = vector.shape_cast %25 : vector<8x128xbf16> to vector<1x8x128xbf16>
    tpu.vector_store %arg4[%c0_14, %c0_15, %c0_16], %28 {strides = array<i32>} : memref<1x8x256xbf16, #tpu.memory_space<vmem>>, vector<1x8x128xbf16>,
    %c0_17 = arith.constant 0 : index
    %c0_18 = arith.constant 0 : index
    %c128 = arith.constant 128 : index
    %29 = vector.load %arg1[%c0_17, %c0_18, %c128] : memref<1x8x256xbf16, #tpu.memory_space<vmem>>, vector<1x8x128xbf16>
    %30 = vector.shape_cast %29 : vector<1x8x128xbf16> to vector<8x128xbf16>
    %c0_19 = arith.constant 0 : index
    %c0_20 = arith.constant 0 : index
    %c128_21 = arith.constant 128 : index
    %31 = vector.load %arg2[%c0_19, %c0_20, %c128_21] : memref<1x8x512xbf16, #tpu.memory_space<vmem>>, vector<1x8x128xbf16>
    %32 = vector.shape_cast %31 : vector<1x8x128xbf16> to vector<8x128xbf16>
    %c0_22 = arith.constant 0 : index
    %c0_23 = arith.constant 0 : index
    %c384 = arith.constant 384 : index
    %33 = vector.load %arg2[%c0_22, %c0_23, %c384] : memref<1x8x512xbf16, #tpu.memory_space<vmem>>, vector<1x8x128xbf16>
    %34 = vector.shape_cast %33 : vector<1x8x128xbf16> to vector<8x128xbf16>
    %cst_24 = arith.constant dense<0.000000e+00> : vector<8x8xf32>
    %35 = tpu.matmul %30, %32, %cst_24 {dimension_numbers = #tpu.dot_dimension_numbers<[1], [1], [0], [0], [0, 0, 1, 0], [], []>} : vector<8x128xbf16>, vector<8x128xbf16>, vector<8x8xf32> -> vector<8x8xf32>
    %cst_25 = arith.constant 0.0883883461 : f32
    %36 = vector.broadcast %cst_25 : f32 to vector<8x8xf32>
    %37 = arith.mulf %35, %36 : vector<8x8xf32>
    %38 = vector.broadcast %1 : vector<1x8xf32> to vector<8x8xf32>
    %39 = arith.addf %37, %38 : vector<8x8xf32>
    %cst_26 = arith.constant dense<0xFF800000> : vector<8xf32>
    %40 = vector.multi_reduction <maximumf>, %39, %cst_26 [1] : vector<8x8xf32> to vector<8xf32>
    %41 = vector.shape_cast %40 : vector<8xf32> to vector<8x1xf32>
    %42 = vector.broadcast %41 : vector<8x1xf32> to vector<8x8xf32>
    %43 = arith.subf %39, %42 : vector<8x8xf32>
    %44 = math.exp %43 : vector<8x8xf32>
    %cst_27 = arith.constant dense<0.000000e+00> : vector<8xf32>
    %45 = vector.multi_reduction <add>, %44, %cst_27 [1] : vector<8x8xf32> to vector<8xf32>
    %46 = vector.shape_cast %45 : vector<8xf32> to vector<8x1xf32>
    %47 = tpu.reciprocal %46 {approx = true} : vector<8x1xf32> -> vector<8x1xf32>
    %48 = vector.broadcast %47 : vector<8x1xf32> to vector<8x8xf32>
    %49 = arith.mulf %44, %48 : vector<8x8xf32>
    %50 = arith.truncf %49 : vector<8x8xf32> to vector<8x8xbf16>
    %cst_28 = arith.constant dense<0.000000e+00> : vector<8x128xf32>
    %51 = tpu.matmul %50, %34, %cst_28 {dimension_numbers = #tpu.dot_dimension_numbers<[1], [0], [0], [1], [0, 0, 1, 1], [], []>} : vector<8x8xbf16>, vector<8x128xbf16>, vector<8x128xf32> -> vector<8x128xf32>
    %52 = arith.truncf %51 : vector<8x128xf32> to vector<8x128xbf16>
    %c0_29 = arith.constant 0 : index
    %c0_30 = arith.constant 0 : index
    %c128_31 = arith.constant 128 : index
    %53 = vector.load %arg4[%c0_29, %c0_30, %c128_31] : memref<1x8x256xbf16, #tpu.memory_space<vmem>>, vector<1x8x128xbf16>
    %54 = vector.shape_cast %53 : vector<1x8x128xbf16> to vector<8x128xbf16>
    %55 = vector.shape_cast %52 : vector<8x128xbf16> to vector<1x8x128xbf16>
    tpu.vector_store %arg4[%c0_29, %c0_30, %c128_31], %55 {strides = array<i32>} : memref<1x8x256xbf16, #tpu.memory_space<vmem>>, vector<1x8x128xbf16>,
    return
  }
  func.func @transform_0(%arg0: i32) -> (i32, i32, i32) {
    %c0_i32 = arith.constant 0 : i32
    %c0_i32_0 = arith.constant 0 : i32
    %c0_i32_1 = arith.constant 0 : i32
    return %arg0, %c0_i32, %c0_i32_0 : i32, i32, i32
  }
  func.func @transform_1(%arg0: i32) -> (i32, i32, i32) {
    %c0_i32 = arith.constant 0 : i32
    %c0_i32_0 = arith.constant 0 : i32
    %c0_i32_1 = arith.constant 0 : i32
    return %arg0, %c0_i32, %c0_i32_0 : i32, i32, i32
  }
  func.func @transform_2(%arg0: i32) -> (i32, i32, i32) {
    %c0_i32 = arith.constant 0 : i32
    %c0_i32_0 = arith.constant 0 : i32
    %c0_i32_1 = arith.constant 0 : i32
    return %arg0, %c0_i32, %c0_i32_0 : i32, i32, i32
  }
  func.func @transform_3(%arg0: i32) -> (i32, i32, i32) {
    %c0_i32 = arith.constant 0 : i32
    %c0_i32_0 = arith.constant 0 : i32
    %c0_i32_1 = arith.constant 0 : i32
    return %arg0, %c0_i32, %c0_i32_0 : i32, i32, i32
  }
}

module attributes {stable_mosaic.version = 11 : i64} {
  func.func @_linear_kernel(%arg0: i32, %arg1: i32, %arg2: i32, %arg3: memref<16x256xbf16, #tpu.memory_space<vmem>>, %arg4: memref<256x384xbf16, #tpu.memory_space<vmem>>, %arg5: memref<1x384xf32, #tpu.memory_space<vmem>>, %arg6: memref<16x384xf32, #tpu.memory_space<vmem>>, %arg7: memref<16x384xf32, #tpu.memory_space<vmem>>) attributes {dimension_semantics = [#tpu.dimension_semantics<parallel>, #tpu.dimension_semantics<parallel>, #tpu.dimension_semantics<arbitrary>], iteration_bounds = array<i64: 1, 1, 1>, scalar_prefetch = 0 : i64, scratch_operands = 1 : i64, tpu.core_type = #tpu.core_type<tc>, window_params = [{transform_indices = @transform_0, window_bounds = array<i64: 16, 256>}, {transform_indices = @transform_1, window_bounds = array<i64: 256, 384>}, {transform_indices = @transform_2, window_bounds = array<i64: 1, 384>}, {transform_indices = @transform_3, window_bounds = array<i64: 16, 384>}]} {
    %c0_i32 = arith.constant 0 : i32
    %0 = arith.cmpi eq, %arg2, %c0_i32 : i32
    %1 = arith.extui %0 : i1 to i32
    %c0_i32_0 = arith.constant 0 : i32
    %2 = arith.cmpi ne, %1, %c0_i32_0 : i32
    scf.if %2 {
      %cst_10 = arith.constant 0.000000e+00 : f32
      %12 = vector.broadcast %cst_10 : f32 to vector<16x384xf32>
      %c0_11 = arith.constant 0 : index
      %c0_12 = arith.constant 0 : index
      %13 = vector.load %arg7[%c0_11, %c0_12] : memref<16x384xf32, #tpu.memory_space<vmem>>, vector<16x384xf32>
      tpu.vector_store %arg7[%c0_11, %c0_12], %12 {strides = array<i32>} : memref<16x384xf32, #tpu.memory_space<vmem>>, vector<16x384xf32>,
    } else {
    }
    %c0 = arith.constant 0 : index
    %c0_1 = arith.constant 0 : index
    %3 = vector.load %arg7[%c0, %c0_1] : memref<16x384xf32, #tpu.memory_space<vmem>>, vector<16x384xf32>
    %c0_2 = arith.constant 0 : index
    %c0_3 = arith.constant 0 : index
    %4 = vector.load %arg3[%c0_2, %c0_3] : memref<16x256xbf16, #tpu.memory_space<vmem>>, vector<16x256xbf16>
    %c0_4 = arith.constant 0 : index
    %c0_5 = arith.constant 0 : index
    %5 = vector.load %arg4[%c0_4, %c0_5] : memref<256x384xbf16, #tpu.memory_space<vmem>>, vector<256x384xbf16>
    %cst = arith.constant dense<0.000000e+00> : vector<16x384xf32>
    %6 = tpu.matmul %4, %5, %cst {dimension_numbers = #tpu.dot_dimension_numbers<[1], [0], [0], [1], [0, 0, 1, 1], [], []>} : vector<16x256xbf16>, vector<256x384xbf16>, vector<16x384xf32> -> vector<16x384xf32>
    %7 = arith.addf %3, %6 : vector<16x384xf32>
    %c0_6 = arith.constant 0 : index
    %c0_7 = arith.constant 0 : index
    %8 = vector.load %arg7[%c0_6, %c0_7] : memref<16x384xf32, #tpu.memory_space<vmem>>, vector<16x384xf32>
    tpu.vector_store %arg7[%c0_6, %c0_7], %7 {strides = array<i32>} : memref<16x384xf32, #tpu.memory_space<vmem>>, vector<16x384xf32>,
    %c0_i32_8 = arith.constant 0 : i32
    %9 = arith.cmpi eq, %arg2, %c0_i32_8 : i32
    %10 = arith.extui %9 : i1 to i32
    %c0_i32_9 = arith.constant 0 : i32
    %11 = arith.cmpi ne, %10, %c0_i32_9 : i32
    scf.if %11 {
      %c0_10 = arith.constant 0 : index
      %c0_11 = arith.constant 0 : index
      %12 = vector.load %arg7[%c0_10, %c0_11] : memref<16x384xf32, #tpu.memory_space<vmem>>, vector<16x384xf32>
      %c0_12 = arith.constant 0 : index
      %c0_13 = arith.constant 0 : index
      %13 = vector.load %arg5[%c0_12, %c0_13] : memref<1x384xf32, #tpu.memory_space<vmem>>, vector<1x384xf32>
      %14 = vector.broadcast %13 : vector<1x384xf32> to vector<16x384xf32>
      %15 = arith.addf %12, %14 : vector<16x384xf32>
      %c0_14 = arith.constant 0 : index
      %c0_15 = arith.constant 0 : index
      %16 = vector.load %arg6[%c0_14, %c0_15] : memref<16x384xf32, #tpu.memory_space<vmem>>, vector<16x384xf32>
      tpu.vector_store %arg6[%c0_14, %c0_15], %15 {strides = array<i32>} : memref<16x384xf32, #tpu.memory_space<vmem>>, vector<16x384xf32>,
    } else {
    }
    return
  }
  func.func @transform_0(%arg0: i32, %arg1: i32, %arg2: i32) -> (i32, i32) {
    %c0_i32 = arith.constant 0 : i32
    return %arg0, %arg2 : i32, i32
  }
  func.func @transform_1(%arg0: i32, %arg1: i32, %arg2: i32) -> (i32, i32) {
    %c0_i32 = arith.constant 0 : i32
    return %arg2, %arg1 : i32, i32
  }
  func.func @transform_2(%arg0: i32, %arg1: i32, %arg2: i32) -> (i32, i32) {
    %c0_i32 = arith.constant 0 : i32
    %c0_i32_0 = arith.constant 0 : i32
    return %c0_i32, %arg1 : i32, i32
  }
  func.func @transform_3(%arg0: i32, %arg1: i32, %arg2: i32) -> (i32, i32) {
    %c0_i32 = arith.constant 0 : i32
    return %arg0, %arg1 : i32, i32
  }
}

</mosaic_0001>

<bundles_post_ra>
// kernel: transformer_forward.44
= control target key start
LH: loop header
LB: loop body
LE: loop exit
PB: predicated region body
PF: predicated region fallthrough
CT: control target
= control target key end

     0   :  { %v65_v32 = vlaneseq  ;;  %s173_s0 = inlined_call_operand.vmem [shape: f32[16,256], index: 0, kind: input, shape index: {}]   ;;  %s174_s1 = inlined_call_operand.vmem [shape: f32[16,256], index: 1, kind: input, shape index: {}]   ;;  %s175_s2 = inlined_call_operand.vmem [shape: f32[1,256], index: 2, kind: input, shape index: {}]   ;;  %s176_s3 = inlined_call_operand.vmem [shape: f32[1,256], index: 3, kind: input, shape index: {}]   ;;  %s177_s4 = inlined_call_operand.vmem [shape: f32[16,256], index: 4, kind: output, shape index: {}]  }
   0x1   :  { %v17_v0 = vld [vmem:[%s173_s0] sm:$0xff]  ;;  %v18_v1 = vld [vmem:[%s173_s0 + $0x8] sm:$0xff]  ;;  %v19_v5 = vld [vmem:[%s173_s0 + $0x10] sm:$0xff] }
   0x2   :  { %v21_v2 = vld [vmem:[%s174_s1] sm:$0xff]  ;;  %v22_v3 = vld [vmem:[%s174_s1 + $0x8] sm:$0xff]  ;;  %v20_v6 = vld [vmem:[%s173_s0 + $0x18] sm:$0xff]  ;;  %v66_v35 = vshrl.u32 %v65_v32, 7 }
   0x3   :  { %v25_v4 = vadd.f32 %v21_v2, %v17_v0  ;;  %v26_v7 = vadd.f32 %v22_v3, %v18_v1  ;;  %v23_v8 = vld [vmem:[%s174_s1 + $0x10] sm:$0xff]  ;;  %v24_v9 = vld [vmem:[%s174_s1 + $0x18] sm:$0xff]  ;;  %v29_v38 = vld [vmem:[%s175_s2] sm:$0x3] }
   0x4   :  { %v27_v10 = vadd.f32 %v23_v8, %v19_v5  ;;  %v28_v11 = vadd.f32 %v24_v9, %v20_v6  ;;  %v67_v36 = vsub.s32 0, %v66_v35  ;;  %v71_v37 = vsub.s32 1, %v66_v35  ;;  %v30_v39 = vld [vmem:[%s176_s3] sm:$0x3] }
   0x5   :  { %v31_v12 = vadd.f32 %v26_v7, %v25_v4 }
   0x6   :  { %v34_v13 = vadd.f32 %v28_v11, %v27_v10  ;;  %v68_v40 = vrot.slane %v29_v38, %v67_v36  ;;  %v72_v41 = vrot.slane %v29_v38, %v71_v37  ;;  %v83_v43 = vrot.slane %v30_v39, %v67_v36 }
   0x7   :  { %32 = vadd.xlane.f32.xlu0 %v31_v12  ;;  %v87_v44 = vrot.slane %v30_v39, %v71_v37 }
   0xb   :  { %35 = vadd.xlane.f32.xlu0 %v34_v13 }
  0x90   :  { %v33_v14 = vpop.xlane.xlu0 %32 }
  0x91   :  { %v38_v15 = vmul.f32 0.00390625, %v33_v14 }
  0x93   :  { %v40_v16 = vsub.f32 %v25_v4, %v38_v15  ;;  %v41_v17 = vsub.f32 %v26_v7, %v38_v15 }
  0x94   :  { %v36_v18 = vpop.xlane.xlu0 %35 }
  0x95   :  { %v39_v19 = vmul.f32 0.00390625, %v36_v18  ;;  %v44_v20 = vmul.f32 %v40_v16, %v40_v16  ;;  %v45_v21 = vmul.f32 %v41_v17, %v41_v17 }
  0x97   :  { %v42_v22 = vsub.f32 %v27_v10, %v39_v19  ;;  %v43_v23 = vsub.f32 %v28_v11, %v39_v19  ;;  %v48_v24 = vadd.f32 %v45_v21, %v44_v20 }
  0x99   :  { %49 = vadd.xlane.f32.xlu1 %v48_v24  ;;  %v46_v25 = vmul.f32 %v42_v22, %v42_v22  ;;  %v47_v26 = vmul.f32 %v43_v23, %v43_v23 }
  0x9b   :  { %v51_v27 = vadd.f32 %v47_v26, %v46_v25 }
  0x9d   :  { %52 = vadd.xlane.f32.xlu1 %v51_v27 }
 0x122   :  { %v50_v28 = vpop.xlane.xlu1 %49 }
 0x123   :  { %v54_v29 = vmul.f32 0.00390625, %v50_v28 }
 0x125   :  { %v56_v30 = vadd.f32 1e-05, %v54_v29 }
 0x126   :  { %v53_v31 = vpop.xlane.xlu1 %52 }
 0x127   :  { %102 = vrsqrt.f32 %v56_v30  ;;  %v55_v33 = vmul.f32 0.00390625, %v53_v31 }
 0x129   :  { %v57_v34 = vadd.f32 1e-05, %v55_v33 }
 0x12b   :  { %104 = vrsqrt.f32 %v57_v34 }
 0x134   :  { %v103_v42 = vpop.eup %102 }
 0x135   :  { %v60_v45 = vmul.f32 %v103_v42, %v40_v16  ;;  %v61_v46 = vmul.f32 %v103_v42, %v41_v17 }
 0x137   :  { %v75_v47 = vmul.f32 %v68_v40, %v60_v45  ;;  %v76_v48 = vmul.f32 %v72_v41, %v61_v46 }
 0x138   :  { %v105_v49 = vpop.eup %104 }
 0x139   :  { %v90_v50 = vadd.f32 %v83_v43, %v75_v47  ;;  %v91_v51 = vadd.f32 %v87_v44, %v76_v48  ;;  %v62_v52 = vmul.f32 %v105_v49, %v42_v22  ;;  %v63_v53 = vmul.f32 %v105_v49, %v43_v23 }
 0x13b   :  { %94 = vst [vmem:[%s177_s4] sm:$0xff] %v90_v50  ;;  %95 = vst [vmem:[%s177_s4 + $0x8] sm:$0xff] %v91_v51  ;;  %v77_v54 = vmul.f32 %v68_v40, %v62_v52  ;;  %v78_v55 = vmul.f32 %v72_v41, %v63_v53 }
 0x13d   :  { %v92_v56 = vadd.f32 %v83_v43, %v77_v54  ;;  %v93_v57 = vadd.f32 %v87_v44, %v78_v55 }
 0x13f   :  { %96 = vst [vmem:[%s177_s4 + $0x10] sm:$0xff] %v92_v56  ;;  %97 = vst [vmem:[%s177_s4 + $0x18] sm:$0xff] %v93_v57 }

// kernel: transformer_forward.42
= control target key start
LH: loop header
LB: loop body
LE: loop exit
PB: predicated region body
PF: predicated region fallthrough
CT: control target
= control target key end

     0   :  { %s532_s9 = smov 0   ;;  %s579_s0 = inlined_call_operand.vmem [shape: bf16[2,8,768], index: 0, kind: input, shape index: {}]   ;;  %s580_s1 = inlined_call_operand.vmem [shape: f32[2,1,8], index: 1, kind: input, shape index: {}]   ;;  %s581_s2 = inlined_call_operand.vmem [shape: bf16[2,8,256], index: 2, kind: output, shape index: {}]  }
   0x1 LB: > { %s442_s10 = sadd.s32 4294967295, %s513_s9   ;;  %p446_p0 = scmp.ge.s32.totalorder %s513_s9, 1  ;;  %s513_s9 = sphi %s532_s9, %s12_s9  }
   0x2   : > { %p120_p1 = scmp.lt.s32.totalorder %s513_s9, 3 }
   0x4   : > { %p121_p2 = pnand %p446_p0, %p120_p1 }
   0x5   : > { %p145_p3 = scmp.lt.s32.totalorder (!%p121_p2), %s442_s10, 1 }
   0x6   : > { %124 = sbr.rel (%p121_p2) target bundleno = 1252 (0x4e4), region = 28 }
   0xb   : > { %v515_v0 = vmov 0.0   ;;  %vm516_vm0 = vmmov 0   ;;  %s583_s10 = smov (!%p145_p3, %s442_s10), 1  ;;  %vm211_vm1 = vcmask 64512   ;;  %vm227_vm2 = vcmask 1043456  }
   0xc   : > { %464 = vmatprep.subr.bf16.mxu0 %v515_v0  ;;  %466 = vmatprep.mubr.msk.bf16.mxu0 %vm516_vm0, %v515_v0  ;;  %s488_s11 = smul.u32 24, %s583_s10  ;;  %s152_s17 = scalar_lea.vmem %s580_s1, %s583_s10 }
   0xd   : > { %470 = vmatprep.subr.bf16.mxu1 %v515_v0  ;;  %472 = vmatprep.mubr.msk.bf16.mxu1 %vm516_vm0, %v515_v0  ;;  %v450_v4 = vld [vmem:[%s152_s17] ss:$0 sm:$0xff]  ;;  %s455_s18 = sshll.u32 %s583_s10, 3 }
   0xe   : > { %s548_s14 = scalar_lea.vmem %s579_s0, %s488_s11  ;;  %s569_s21 = scalar_lea.vmem %s581_s2, %s455_s18 }
   0xf   : > { %v161_v1 = vld [vmem:[%s548_s14 + $0x8] sm:$0xf]  ;;  %v160_v2 = vld [vmem:[%s548_s14] sm:$0xf]  ;;  %v162_v16 = vld [vmem:[%s548_s14 + $0x10] sm:$0xf] }
  0x10   : > { %465 = vmatpush3.bf16.xpose.msra.mxu0 %v161_v1  ;;  %v275_v17 = vld [vmem:[%s548_s14 + $0x14] sm:$0xf]  ;;  %v229_v18 = vsel %vm227_vm2, %v162_v16, 0  ;;  %v274_v24 = vld [vmem:[%s548_s14 + $0xc] sm:$0xf] }
  0x11   : > { %482 = vmatprep.subr.bf16.mxu0 %v515_v0  ;;  %v334_v19 = vsel %vm227_vm2, %v275_v17, 0  ;;  %471 = vmatpush3.bf16.msra.mxu1 %v229_v18  ;;  %v273_v25 = vld [vmem:[%s548_s14 + $0x4] sm:$0xf] }
  0x12   : > { %476 = vmatprep.subr.bf16.mxu1 %v515_v0 }
  0x17   : > { %467 = vmatmul.mubr.bf16.vlgmr.msra.gmra.mxu0 %v160_v2 }
  0x18   : > { %484 = vmatprep.mubr.msk.bf16.mxu0 %vm516_vm0, %v515_v0  ;;  %483 = vmatpush3.bf16.msra.mxu0 %v334_v19 }
  0xd7   : > { %v197_v3 = vpop.f32.mrf.mxu0 }
  0xd8   : > { %v203_v5 = vmul.f32 0.088388346, %v197_v3 }
  0xd9   : > { %v468_v6 = vpop.f32.mrf.mxu0 }
  0xda   : > { %v210_v7 = vadd.f32 %v450_v4, %v203_v5 }
  0xdb   : > { %v200_v8 = vpop.f32.mrf.mxu0 }
  0xdc   : > { %v212_v9 = vsel %vm211_vm1, %v210_v7, -inf }
  0xdd   : > { %213 = vmax.xlane.f32.xlu0 %v212_v9  ;;  %v469_v10 = vpop.f32.mrf.mxu0 }
 0x166   : > { %v214_v11 = vpop.xlane.xlu0 %213 }
 0x167   : > { %v215_v12 = vsub.f32 %v210_v7, %v214_v11 }
 0x169   : > { %v216_v13 = vmul.f32 1.442695, %v215_v12 }
 0x16b   : > { %499 = vpow2.f32 %v216_v13 }
 0x178   : > { %v500_v14 = vpop.eup %499 }
 0x179   : > { %v218_v15 = vsel %vm211_vm1, %v500_v14, 0.0 }
 0x17a   : > { %219 = vadd.xlane.f32.xlu0 %v218_v15 }
 0x203   : > { %v220_v20 = vpop.xlane.xlu0 %219 }
 0x204   : > { %501 = vrcp.f32 %v220_v20 }
 0x211   : > { %v502_v21 = vpop.eup %501 }
 0x212   : > { %v222_v22 = vmul.f32 %v502_v21, %v500_v14 }
 0x214   : > { %v223_v23 = vpack.c.bf16 %v222_v22, %v222_v22 }
 0x216   : > { %473 = vmatmul.mubr.msk.bf16.vlgmr.msra.gmra.mxu1 %vm211_vm1, %v223_v23 }
 0x217   : > { %477 = vmatpush3.bf16.xpose.msra.mxu1 %v274_v24  ;;  %478 = vmatprep.mubr.msk.bf16.mxu1 %vm516_vm0, %v515_v0 }
 0x21e   : > { %479 = vmatmul.mubr.bf16.vlgmr.msra.gmra.mxu1 %v273_v25 }
 0x2d6   : > { %v265_v26 = vpop.f32.mrf.mxu1 }
 0x2d7   : > { %v271_v27 = vpack.c.bf16 %v265_v26, %v265_v26 }
 0x2d8   : > { %v474_v28 = vpop.f32.mrf.mxu1 }
 0x2d9   : > { %272 = vst [vmem:[%s569_s21] sm:$0xf] %v271_v27 }
 0x2da   : > { %v268_v29 = vpop.f32.mrf.mxu1 }
 0x2dc   : > { %v475_v30 = vpop.f32.mrf.mxu1 }
 0x2de   : > { %v310_v31 = vpop.f32.mrf.mxu1 }
 0x2df   : > { %v316_v32 = vmul.f32 0.088388346, %v310_v31 }
 0x2e0   : > { %v480_v33 = vpop.f32.mrf.mxu1 }
 0x2e1   : > { %v317_v34 = vadd.f32 %v450_v4, %v316_v32 }
 0x2e2   : > { %v313_v35 = vpop.f32.mrf.mxu1 }
 0x2e3   : > { %v318_v36 = vsel %vm211_vm1, %v317_v34, -inf }
 0x2e4   : > { %319 = vmax.xlane.f32.xlu1 %v318_v36  ;;  %v481_v37 = vpop.f32.mrf.mxu1 }
 0x36d   : > { %v320_v38 = vpop.xlane.xlu1 %319 }
 0x36e   : > { %v321_v39 = vsub.f32 %v317_v34, %v320_v38 }
 0x370   : > { %v322_v40 = vmul.f32 1.442695, %v321_v39 }
 0x372   : > { %503 = vpow2.f32 %v322_v40 }
 0x37f   : > { %v504_v41 = vpop.eup %503 }
 0x380   : > { %v324_v42 = vsel %vm211_vm1, %v504_v41, 0.0 }
 0x381   : > { %325 = vadd.xlane.f32.xlu1 %v324_v42 }
 0x40a   : > { %v326_v43 = vpop.xlane.xlu1 %325 }
 0x40b   : > { %505 = vrcp.f32 %v326_v43 }
 0x418   : > { %v506_v44 = vpop.eup %505 }
 0x419   : > { %v328_v45 = vmul.f32 %v506_v44, %v504_v41 }
 0x41b   : > { %v329_v46 = vpack.c.bf16 %v328_v45, %v328_v45 }
 0x41d   : > { %485 = vmatmul.mubr.msk.bf16.vlgmr.msra.gmra.mxu0 %vm211_vm1, %v329_v46 }
 0x4dd   : > { %v370_v47 = vpop.f32.mrf.mxu0 }
 0x4de   : > { %v376_v48 = vpack.c.bf16 %v370_v47, %v370_v47 }
 0x4df   : > { %v486_v49 = vpop.f32.mrf.mxu0 }
 0x4e0   : > { %377 = vst [vmem:[%s569_s21 + $0x4] sm:$0xf] %v376_v48 }
 0x4e1   : > { %v373_v50 = vpop.f32.mrf.mxu0 }
 0x4e3   : > { %v487_v51 = vpop.f32.mrf.mxu0 }
 0x4e4 PF: > { %s12_s9 = sadd.s32 1, %s513_s9  }
 0x4e5   : > { %p9_p4 = scmp.ge.s32.totalorder %s12_s9, 4  }
 0x4e7   :  { %11 = sbr.rel (!%p9_p4) target bundleno = 1 (0x1), region = 61 }

// kernel: transformer_forward.43
= control target key start
LH: loop header
LB: loop body
LE: loop exit
PB: predicated region body
PF: predicated region fallthrough
CT: control target
= control target key end

     0   :  { %v290_v34 = vlaneseq  ;;  %s534_s1 = inlined_call_operand.vmem [shape: bf16[256,256], index: 1, kind: input, shape index: {}]   ;;  %s535_s0 = inlined_call_operand.vmem [shape: bf16[16,256], index: 0, kind: input, shape index: {}]   ;;  %s536_s2 = inlined_call_operand.vmem [shape: f32[1,256], index: 2, kind: input, shape index: {}]   ;;  %s537_s3 = inlined_call_operand.vmem [shape: f32[16,256], index: 3, kind: output, shape index: {}]  }
   0x1   :  { %v346_v0 = vld [vmem:[%s534_s1 + $0x74] ss:$8 sps:$4 sm:$0xff]   ;;  %v348_v1 = vld [vmem:[%s534_s1 + $0x70] ss:$8 sps:$4 sm:$0xff]   ;;  %v349_v2 = vld [vmem:[%s534_s1 + $0x64] ss:$8 sps:$4 sm:$0xff]  }
   0x2   :  { %230 = vmatprep.subr.bf16.mxu0 %v346_v0  ;;  %v351_v3 = vld [vmem:[%s534_s1 + $0x60] ss:$8 sps:$4 sm:$0xff]   ;;  %v352_v4 = vld [vmem:[%s534_s1 + $0x54] ss:$8 sps:$4 sm:$0xff]   ;;  %v354_v5 = vld [vmem:[%s534_s1 + $0x50] ss:$8 sps:$4 sm:$0xff]  }
   0x3   :  { %231 = vmatpush1.bf16.msra.mxu0 %v348_v1  ;;  %v355_v6 = vld [vmem:[%s534_s1 + $0x44] ss:$8 sps:$4 sm:$0xff]   ;;  %v357_v7 = vld [vmem:[%s534_s1 + $0x40] ss:$8 sps:$4 sm:$0xff]   ;;  %v358_v8 = vld [vmem:[%s534_s1 + $0x34] ss:$8 sps:$4 sm:$0xff]  }
   0x4   :  { %232 = vmatprep.subr.bf16.mxu0 %v349_v2  ;;  %v360_v9 = vld [vmem:[%s534_s1 + $0x30] ss:$8 sps:$4 sm:$0xff]   ;;  %v361_v10 = vld [vmem:[%s534_s1 + $0x24] ss:$8 sps:$4 sm:$0xff]   ;;  %v363_v11 = vld [vmem:[%s534_s1 + $0x20] ss:$8 sps:$4 sm:$0xff]  }
   0x5   :  { %v364_v12 = vld [vmem:[%s534_s1 + $0x14] ss:$8 sps:$4 sm:$0xff]   ;;  %v396_v13 = vld [vmem:[%s535_s0 + $0x4] ss:$8 sps:$4 sm:$0xff]   ;;  %v366_v14 = vld [vmem:[%s534_s1 + $0x10] ss:$8 sps:$4 sm:$0xff]  }
   0x6   :  { %v367_v15 = vld [vmem:[%s534_s1 + $0x4] ss:$8 sps:$4 sm:$0xff]   ;;  %262 = vmatprep.mubr.bf16.mxu0 %v396_v13  ;;  %v369_v16 = vld [vmem:[%s534_s1] ss:$8 sps:$4 sm:$0xff]   ;;  %v370_v17 = vld [vmem:[%s534_s1 + $0xf4] ss:$8 sps:$4 sm:$0xff]  }
   0x7   :  { %233 = vmatpush1.bf16.msra.mxu0 %v351_v3  ;;  %v372_v18 = vld [vmem:[%s534_s1 + $0xf0] ss:$8 sps:$4 sm:$0xff]   ;;  %v373_v19 = vld [vmem:[%s534_s1 + $0xe4] ss:$8 sps:$4 sm:$0xff]   ;;  %v375_v20 = vld [vmem:[%s534_s1 + $0xe0] ss:$8 sps:$4 sm:$0xff]  }
   0x8   :  { %234 = vmatprep.subr.bf16.mxu0 %v352_v4  ;;  %v376_v21 = vld [vmem:[%s534_s1 + $0xd4] ss:$8 sps:$4 sm:$0xff]   ;;  %v378_v22 = vld [vmem:[%s534_s1 + $0xd0] ss:$8 sps:$4 sm:$0xff]   ;;  %v379_v23 = vld [vmem:[%s534_s1 + $0xc4] ss:$8 sps:$4 sm:$0xff]  }
   0x9   :  { %v381_v24 = vld [vmem:[%s534_s1 + $0xc0] ss:$8 sps:$4 sm:$0xff]   ;;  %v382_v25 = vld [vmem:[%s534_s1 + $0xb4] ss:$8 sps:$4 sm:$0xff]   ;;  %v384_v26 = vld [vmem:[%s534_s1 + $0xb0] ss:$8 sps:$4 sm:$0xff]  }
   0xa   :  { %v385_v27 = vld [vmem:[%s534_s1 + $0xa4] ss:$8 sps:$4 sm:$0xff]   ;;  %v387_v28 = vld [vmem:[%s534_s1 + $0xa0] ss:$8 sps:$4 sm:$0xff]   ;;  %v388_v29 = vld [vmem:[%s534_s1 + $0x94] ss:$8 sps:$4 sm:$0xff]  }
   0xb   :  { %235 = vmatpush1.bf16.msra.mxu0 %v354_v5  ;;  %v390_v30 = vld [vmem:[%s534_s1 + $0x90] ss:$8 sps:$4 sm:$0xff]   ;;  %v391_v31 = vld [vmem:[%s534_s1 + $0x84] ss:$8 sps:$4 sm:$0xff]   ;;  %v393_v32 = vld [vmem:[%s534_s1 + $0x80] ss:$8 sps:$4 sm:$0xff]  }
   0xc   :  { %236 = vmatprep.subr.bf16.mxu0 %v355_v6  ;;  %v394_v33 = vld [vmem:[%s535_s0] ss:$8 sps:$4 sm:$0xff]   ;;  %v291_v35 = vshrl.u32 %v290_v34, 7 }
   0xd   :  { %v288_v37 = vld [vmem:[%s536_s2] sm:$0x3] }
   0xe   :  { %v292_v36 = vsub.s32 0, %v291_v35  ;;  %v296_v38 = vsub.s32 1, %v291_v35 }
   0xf   :  { %237 = vmatpush1.bf16.msra.mxu0 %v357_v7 }
  0x10   :  { %238 = vmatprep.subr.bf16.mxu0 %v358_v8  ;;  %v293_v39 = vrot.slane %v288_v37, %v292_v36  ;;  %v297_v40 = vrot.slane %v288_v37, %v296_v38 }
  0x13   :  { %239 = vmatpush1.bf16.msra.mxu0 %v360_v9 }
  0x14   :  { %240 = vmatprep.subr.bf16.mxu0 %v361_v10 }
  0x17   :  { %241 = vmatpush1.bf16.msra.mxu0 %v363_v11 }
  0x18   :  { %242 = vmatprep.subr.bf16.mxu0 %v364_v12 }
  0x1b   :  { %243 = vmatpush1.bf16.msra.mxu0 %v366_v14 }
  0x1c   :  { %244 = vmatprep.subr.bf16.mxu0 %v367_v15 }
  0x1f   :  { %245 = vmatpush1.bf16.msra.mxu0 %v369_v16 }
  0x20   :  { %246 = vmatprep.subr.bf16.mxu0 %v370_v17 }
  0x23   :  { %247 = vmatpush2.bf16.msra.mxu0 %v372_v18 }
  0x24   :  { %248 = vmatprep.subr.bf16.mxu0 %v373_v19 }
  0x27   :  { %249 = vmatpush2.bf16.msra.mxu0 %v375_v20 }
  0x28   :  { %250 = vmatprep.subr.bf16.mxu0 %v376_v21 }
  0x2b   :  { %251 = vmatpush2.bf16.msra.mxu0 %v378_v22 }
  0x2c   :  { %252 = vmatprep.subr.bf16.mxu0 %v379_v23 }
  0x2f   :  { %253 = vmatpush2.bf16.msra.mxu0 %v381_v24 }
  0x30   :  { %254 = vmatprep.subr.bf16.mxu0 %v382_v25 }
  0x33   :  { %255 = vmatpush2.bf16.msra.mxu0 %v384_v26 }
  0x34   :  { %256 = vmatprep.subr.bf16.mxu0 %v385_v27 }
  0x37   :  { %257 = vmatpush2.bf16.msra.mxu0 %v387_v28 }
  0x38   :  { %258 = vmatprep.subr.bf16.mxu0 %v388_v29 }
  0x3b   :  { %259 = vmatpush2.bf16.msra.mxu0 %v390_v30 }
  0x3c   :  { %260 = vmatprep.subr.bf16.mxu0 %v391_v31 }
  0x3f   :  { %261 = vmatpush2.bf16.msra.mxu0 %v393_v32 }
  0x42   :  { %263 = vmatmul.mubr.bf16.vlgmr.msra.gmra.mxu0 %v394_v33 }
 0x102   :  { %v264_v41 = vpop.f32.mrf.mxu0 }
 0x103   :  { %v300_v42 = vadd.f32 %v293_v39, %v264_v41 }
 0x104   :  { %v266_v43 = vpop.f32.mrf.mxu0 }
 0x105   :  { %304 = vst [vmem:[%s537_s3] sm:$0xff] %v300_v42  ;;  %v301_v44 = vadd.f32 %v297_v40, %v266_v43 }
 0x106   :  { %v268_v45 = vpop.f32.mrf.mxu0 }
 0x107   :  { %305 = vst [vmem:[%s537_s3 + $0x8] sm:$0xff] %v301_v44  ;;  %v302_v46 = vadd.f32 %v293_v39, %v268_v45 }
 0x108   :  { %v270_v47 = vpop.f32.mrf.mxu0 }
 0x109   :  { %306 = vst [vmem:[%s537_s3 + $0x10] sm:$0xff] %v302_v46  ;;  %v303_v48 = vadd.f32 %v297_v40, %v270_v47 }
 0x10b   :  { %307 = vst [vmem:[%s537_s3 + $0x18] sm:$0xff] %v303_v48 }

// kernel: transformer_forward.41
= control target key start
LH: loop header
LB: loop body
LE: loop exit
PB: predicated region body
PF: predicated region fallthrough
CT: control target
= control target key end

     0   :  { %8 = vsyncpa [#allocation4], 0  ;;  %s1431_s0 = inlined_call_operand.vmem [shape: bf16[16,256], index: 0, kind: input, shape index: {}]   ;;  %s1432_s1 = inlined_call_operand.hbm [shape: bf16[256,768], index: 1, kind: input, shape index: {}]   ;;  %s1433_s2 = inlined_call_operand.vmem [shape: f32[1,768], index: 2, kind: input, shape index: {}]   ;;  %s1434_s3 = inlined_call_operand.vmem [shape: bf16[16,768], index: 3, kind: output, shape index: {}]  }
   0x1   :  { %10 = vsyncpa [#allocation4 + $0x1], 0  ;;  %s1263_s12 = smov 0   ;;  %s1265_s13 = smov 0  }
   0x2   :  { %s1267_s14 = smov 0   ;;  %s1269_s15 = smov 0  }
   0x3   :  { %s1271_s16 = smov 0   ;;  %s1273_s17 = smov 0  }
   0x4 LB: > { %s935_s18 = sadd.s32 4294967295, %s1237_s17   ;;  %s31_s19 = sadd.s32 1, %s1233_s16  ;;  %s1237_s17 = sphi %s1273_s17, %s16_s17   ;;  %s1233_s16 = sphi %s1271_s16, %s1443_s16   ;;  %s1229_s15 = sphi %s1269_s15, %s1442_s15   ;;  %s1225_s14 = sphi %s1267_s14, %s1441_s14   ;;  %s1221_s13 = sphi %s1265_s13, %s1440_s13   ;;  %s1217_s12 = sphi %s1263_s12, %s1439_s12  }
   0x5   : > { %p33_p0 = scmp.ge.s32.totalorder %s31_s19, 2  ;;  %s72_s20 = sadd.s32 1, %s1225_s14 }
   0x6   : > { %p79_p1 = scmp.ne.s32.totalorder %s1225_s14, %s1221_s13  ;;  %p80_p2 = scmp.eq.s32.totalorder %s1237_s17, 0 }
   0x7   : > { %s1445_s19 = smov (%p33_p0, %s31_s19), 0  ;;  %p85_p4 = scmp.ne.s32.totalorder %s1221_s13, %s1217_s12 }
   0x8   : > { %p1299_p3 = por %p80_p2, %p79_p1  ;;  %s68_s22 = ssub.s32 %s1233_s16, %s1445_s19 }
   0x9   : > { %p86_p5 = scmp.eq.s32.totalorder %s935_s18, 0  ;;  %p70_p6 = scmp.eq.s32.totalorder %s68_s22, 0 }
   0xa   : > { %p137_p7 = scmp.eq.s32.totalorder %s935_s18, 1  ;;  %p1040_p10 = scmp.lt.s32.totalorder %s1237_s17, 2 }
   0xb   : > { %p1306_p8 = por %p86_p5, %p85_p4  ;;  %s178_s26 = sand.u32 1, %s1225_s14  }
   0xc   : > { %s1311_s24 = scalar_select %p70_p6, %s1225_s14, %s72_s20  }
   0xd   : > { %p1313_p9 = por %p137_p7, %p79_p1  ;;  %s1003_s27 = smul.u32 192, %s1233_s16 }
   0xe   : > { %s1031_s28 = smul.u32 384, %s178_s26  ;;  %p1325_p11 = pnand %p1040_p10, %p1299_p3 }
   0xf   : > { %s191_s4 = scalar_lea.hbm %s1432_s1, %s1003_s27  ;;  %p941_p12 = scmp.ge.s32.totalorder %s1237_s17, 1 }
  0x10   : > { %s182_s6 = scalar_lea.vmem [#allocation3], %s1031_s28  ;;  %s179_s8 = scalar_lea.sflag [#allocation4], %s178_s26 }
  0x11   : > { %s192_s7 = sshll.u32 %s182_s6, 4  ;;  %p1161_p13 = pneg %p1325_p11  ;;  %s193_s7 = int_to_ptr.vmem [resolvable:$true] %s192_s7 }
  0x12   : > { %s1172_s9 = scalar_lea.vmem %s193_s7, 6144  ;;  %s1239_s10 = smov [#allocation3]  }
  0x13   : > { %p1173_p0 = scmp.ne.s32.totalorder %s193_s7, %s1172_s9  ;;  %s1177_s11 = sshll.u32 %s1239_s10, 4  ;;  %s1178_s11 = int_to_ptr.vmem [resolvable:$false] %s1177_s11 }
  0x14   : > { %s1179_s12 = scalar_lea.vmem %s1178_s11, 12288  ;;  %p1180_p3 = scmp.lt.s32.totalorder %s193_s7, %s1178_s11 }
  0x15   : > { %p1175_p1 = pnand %p1173_p0, %p1161_p13  ;;  %p1181_p4 = scmp.lt.s32.totalorder %s1179_s12, %s1172_s9 }
  0x17   : > { %p1176_p2 = pneg %p1175_p1  ;;  %p1182_p5 = por %p1181_p4, %p1180_p3 }
  0x19   : > { %p1183_p6 = pnand %p1182_p5, %p1176_p2 }
  0x1b   : > { %1186 = shalt.err (!%p1183_p6)
}
  0x1c   : > { %s1240_s18 = smov 384   ;;  %s1241_s20 = smov 192  }
  0x1d   : > { %s1242_s21 = smov 12   ;;  %p208_p7 = scmp.lt.s32.totalorder %s1237_s17, 3 }
  0x1e   : > { %1039 = dma.hbm_to_vmem [thread:$0]  (!%p1325_p11), %s191_s4, 6144, %s193_s7, %s179_s8, %s1240_s18, %s1241_s20, %s1242_s21  }
  0x1f   : > { %p209_p10 = pnand %p941_p12, %p208_p7 }
  0x20   : > { %s1338_s22 = sand.u32 (!%p209_p10), 1, %s1221_s13  }
  0x21   : > { %212 = sbr.rel (%p209_p10) target bundleno = 316 (0x13c), region = 32  ;;  %s215_s27 = scalar_lea.sflag (!%p209_p10), [#allocation4], %s1338_s22 }
  0x22   : > { %s1032_s26 = smul.u32 (!%p209_p10), 384, %s1338_s22 }
  0x24   : > { %s1342_s28 = scalar_lea.vmem (!%p209_p10), [#allocation3], %s1032_s26 }
  0x26   : > { %1212 = dma.done.wait (%p1306_p8), %s215_s27, 6144  }
  0x27   : > { %1214 = vsyncadd (%p1306_p8), %s215_s27, 4294961152  ;;  %v1092_v0 = vld [vmem:[%s1342_s28 + $0xac] ss:$12 sps:$4 sm:$0xff]   ;;  %v1094_v1 = vld [vmem:[%s1342_s28 + $0xa8] ss:$12 sps:$4 sm:$0xff]   ;;  %s268_s5 = smul.u32 3, %s1229_s15  ;;  %v731_v50 = vlaneseq }
  0x28   : > { %624 = vmatprep.subr.bf16.mxu0 %v1092_v0  ;;  %v1095_v2 = vld [vmem:[%s1342_s28 + $0x94] ss:$12 sps:$4 sm:$0xff]   ;;  %v1097_v3 = vld [vmem:[%s1342_s28 + $0x90] ss:$12 sps:$4 sm:$0xff]   ;;  %v1100_v5 = vld [vmem:[%s1342_s28 + $0x78] ss:$12 sps:$4 sm:$0xff]  }
  0x29   : > { %625 = vmatpush1.bf16.msra.mxu0 %v1094_v1  ;;  %v1098_v4 = vld [vmem:[%s1342_s28 + $0x7c] ss:$12 sps:$4 sm:$0xff]   ;;  %v1101_v6 = vld [vmem:[%s1342_s28 + $0x64] ss:$12 sps:$4 sm:$0xff]   ;;  %v1103_v8 = vld [vmem:[%s1342_s28 + $0x60] ss:$12 sps:$4 sm:$0xff]  }
  0x2a   : > { %626 = vmatprep.subr.bf16.mxu0 %v1095_v2  ;;  %v1112_v7 = vld [vmem:[%s1342_s28 + $0x170] ss:$12 sps:$4 sm:$0xff]   ;;  %v1104_v10 = vld [vmem:[%s1342_s28 + $0x4c] ss:$12 sps:$4 sm:$0xff]   ;;  %v1106_v13 = vld [vmem:[%s1342_s28 + $0x48] ss:$12 sps:$4 sm:$0xff]  }
  0x2b   : > { %1009 = vmatprep.subr.bf16.mxu1 %v1112_v7  ;;  %v1114_v9 = vld [vmem:[%s1342_s28 + $0xb0] ss:$12 sps:$4 sm:$0xff]   ;;  %v1117_v11 = vld [vmem:[%s1342_s28 + $0x158] ss:$12 sps:$4 sm:$0xff]   ;;  %v1107_v14 = vld [vmem:[%s1342_s28 + $0x34] ss:$12 sps:$4 sm:$0xff]  }
  0x2c   : > { %1010 = vmatpush3.bf16.msra.mxu1 %v1114_v9  ;;  %v1119_v12 = vld [vmem:[%s1342_s28 + $0x98] ss:$12 sps:$4 sm:$0xff]   ;;  %v1122_v15 = vld [vmem:[%s1342_s28 + $0x140] ss:$12 sps:$4 sm:$0xff]   ;;  %v1109_v17 = vld [vmem:[%s1342_s28 + $0x30] ss:$12 sps:$4 sm:$0xff]  }
  0x2d   : > { %627 = vmatpush1.bf16.msra.mxu0 %v1097_v3  ;;  %1011 = vmatprep.subr.bf16.mxu1 %v1117_v11  ;;  %v1124_v16 = vld [vmem:[%s1342_s28 + $0x80] ss:$12 sps:$4 sm:$0xff]   ;;  %v1127_v18 = vld [vmem:[%s1342_s28 + $0x128] ss:$12 sps:$4 sm:$0xff]   ;;  %v1113_v21 = vld [vmem:[%s1342_s28 + $0x18] ss:$12 sps:$4 sm:$0xff]  }
  0x2e   : > { %628 = vmatprep.subr.bf16.mxu0 %v1098_v4  ;;  %v1110_v19 = vld [vmem:[%s1342_s28 + $0x1c] ss:$12 sps:$4 sm:$0xff]   ;;  %v1115_v23 = vld [vmem:[%s1342_s28 + $0x4] ss:$12 sps:$4 sm:$0xff]   ;;  %v1118_v26 = vld [vmem:[%s1342_s28] ss:$12 sps:$4 sm:$0xff]  }
  0x2f   : > { %v1129_v20 = vld [vmem:[%s1342_s28 + $0x68] ss:$12 sps:$4 sm:$0xff]   ;;  %v1132_v22 = vld [vmem:[%s1342_s28 + $0x110] ss:$12 sps:$4 sm:$0xff]   ;;  %v1137_v25 = vld [vmem:[%s1342_s28 + $0xf8] ss:$12 sps:$4 sm:$0xff]  }
  0x30   : > { %1012 = vmatpush3.bf16.msra.mxu1 %v1119_v12  ;;  %v1134_v24 = vld [vmem:[%s1342_s28 + $0x50] ss:$12 sps:$4 sm:$0xff]   ;;  %v1120_v27 = vld [vmem:[%s1342_s28 + $0x16c] ss:$12 sps:$4 sm:$0xff]   ;;  %v1123_v30 = vld [vmem:[%s1342_s28 + $0x168] ss:$12 sps:$4 sm:$0xff]  }
  0x31   : > { %629 = vmatpush1.bf16.msra.mxu0 %v1100_v5  ;;  %1013 = vmatprep.subr.bf16.mxu1 %v1122_v15  ;;  %v1139_v28 = vld [vmem:[%s1342_s28 + $0x38] ss:$12 sps:$4 sm:$0xff]   ;;  %v1142_v29 = vld [vmem:[%s1342_s28 + $0xe0] ss:$12 sps:$4 sm:$0xff]   ;;  %v1147_v33 = vld [vmem:[%s1342_s28 + $0xc8] ss:$12 sps:$4 sm:$0xff]  }
  0x32   : > { %630 = vmatprep.subr.bf16.mxu0 %v1101_v6  ;;  %v1125_v31 = vld [vmem:[%s1342_s28 + $0x154] ss:$12 sps:$4 sm:$0xff]   ;;  %v1128_v34 = vld [vmem:[%s1342_s28 + $0x150] ss:$12 sps:$4 sm:$0xff]   ;;  %v1152_v35 = vld [vmem:[%s1431_s0 + $0x4] ss:$8 sps:$4 sm:$0xff]  }
  0x33   : > { %v1144_v32 = vld [vmem:[%s1342_s28 + $0x20] ss:$12 sps:$4 sm:$0xff]   ;;  %v1130_v36 = vld [vmem:[%s1342_s28 + $0x13c] ss:$12 sps:$4 sm:$0xff]   ;;  %699 = vmatprep.mubr.bf16.mxu1 %v1152_v35  ;;  %656 = vmatprep.mubr.bf16.mxu0 %v1152_v35  ;;  %v1133_v38 = vld [vmem:[%s1342_s28 + $0x138] ss:$12 sps:$4 sm:$0xff]  }
  0x34   : > { %1014 = vmatpush3.bf16.msra.mxu1 %v1124_v16  ;;  %v1149_v37 = vld [vmem:[%s1342_s28 + $0x8] ss:$12 sps:$4 sm:$0xff]   ;;  %v1135_v39 = vld [vmem:[%s1342_s28 + $0x124] ss:$12 sps:$4 sm:$0xff]   ;;  %v1138_v41 = vld [vmem:[%s1342_s28 + $0x120] ss:$12 sps:$4 sm:$0xff]  }
  0x35   : > { %631 = vmatpush1.bf16.msra.mxu0 %v1103_v8  ;;  %1015 = vmatprep.subr.bf16.mxu1 %v1127_v18  ;;  %v1150_v40 = vld [vmem:[%s1431_s0] ss:$8 sps:$4 sm:$0xff]   ;;  %v1140_v42 = vld [vmem:[%s1342_s28 + $0x10c] ss:$12 sps:$4 sm:$0xff]   ;;  %v1148_v45 = vld [vmem:[%s1342_s28 + $0xf0] ss:$12 sps:$4 sm:$0xff]  }
  0x36   : > { %632 = vmatprep.subr.bf16.mxu0 %v1104_v10  ;;  %v1143_v43 = vld [vmem:[%s1342_s28 + $0x108] ss:$12 sps:$4 sm:$0xff]   ;;  %v1155_v47 = vld [vmem:[%s1342_s28 + $0xd8] ss:$12 sps:$4 sm:$0xff]   ;;  %v1158_v49 = vld [vmem:[%s1342_s28 + $0xc0] ss:$12 sps:$4 sm:$0xff]  }
  0x37   : > { %v1145_v44 = vld [vmem:[%s1342_s28 + $0xf4] ss:$12 sps:$4 sm:$0xff]   ;;  %v1153_v46 = vld [vmem:[%s1342_s28 + $0xdc] ss:$12 sps:$4 sm:$0xff]   ;;  %v1156_v48 = vld [vmem:[%s1342_s28 + $0xc4] ss:$12 sps:$4 sm:$0xff]  }
  0x38   : > { %1016 = vmatpush3.bf16.msra.mxu1 %v1129_v20  ;;  %p269_p8 = scmp.lt.s32.totalorder %s268_s5, 5  ;;  %v732_v51 = vshrl.u32 %v731_v50, 7  ;;  %s1033_s9 = smul.u32 24, %s1338_s22 }
  0x39   : > { %633 = vmatpush1.bf16.msra.mxu0 %v1106_v13  ;;  %1017 = vmatprep.subr.bf16.mxu1 %v1132_v22  ;;  %s1008_s11 = smul.u32 (%p1313_p9), 12, %s1229_s15 }
  0x3a   : > { %634 = vmatprep.subr.bf16.mxu0 %v1107_v14  ;;  %s1447_s5 = smov (!%p269_p8, %s268_s5), 5  ;;  %v741_v52 = vsub.s32 2, %v732_v51  ;;  %s253_s10 = scalar_lea.vmem [#allocation5], %s1033_s9  ;;  %v733_v1 = vsub.s32 0, %v732_v51  ;;  %v737_v2 = vsub.s32 1, %v732_v51 }
  0x3b   : > { %s271_s8 = scalar_lea.vmem %s1433_s2, %s1447_s5  ;;  %s788_s20 = scalar_lea.vmem (%p1313_p9), %s1434_s3, %s1008_s11 }
  0x3c   : > { %1018 = vmatpush3.bf16.msra.mxu1 %v1134_v24  ;;  %v729_v53 = vld [vmem:[%s271_s8] sm:$0x7] }
  0x3d   : > { %635 = vmatpush1.bf16.msra.mxu0 %v1109_v17  ;;  %1019 = vmatprep.subr.bf16.mxu1 %v1137_v25  ;;  %v742_v55 = vrot.slane %v729_v53, %v741_v52  ;;  %v734_v3 = vrot.slane %v729_v53, %v733_v1  ;;  %v738_v4 = vrot.slane %v729_v53, %v737_v2 }
  0x3e   : > { %636 = vmatprep.subr.bf16.mxu0 %v1110_v19 }
  0x40   : > { %1020 = vmatpush3.bf16.msra.mxu1 %v1139_v28 }
  0x41   : > { %637 = vmatpush1.bf16.msra.mxu0 %v1113_v21  ;;  %1021 = vmatprep.subr.bf16.mxu1 %v1142_v29 }
  0x42   : > { %638 = vmatprep.subr.bf16.mxu0 %v1115_v23 }
  0x44   : > { %1022 = vmatpush3.bf16.msra.mxu1 %v1144_v32 }
  0x45   : > { %639 = vmatpush1.bf16.msra.mxu0 %v1118_v26  ;;  %1023 = vmatprep.subr.bf16.mxu1 %v1147_v33 }
  0x46   : > { %640 = vmatprep.subr.bf16.mxu0 %v1120_v27 }
  0x48   : > { %1024 = vmatpush3.bf16.msra.mxu1 %v1149_v37 }
  0x49   : > { %641 = vmatpush2.bf16.msra.mxu0 %v1123_v30 }
  0x4a   : > { %642 = vmatprep.subr.bf16.mxu0 %v1125_v31 }
  0x4b   : > { %700 = vmatmul.mubr.bf16.vlgmr.msra.gmra.mxu1 %v1150_v40 }
  0x4d   : > { %643 = vmatpush2.bf16.msra.mxu0 %v1128_v34 }
  0x4e   : > { %644 = vmatprep.subr.bf16.mxu0 %v1130_v36 }
  0x51   : > { %645 = vmatpush2.bf16.msra.mxu0 %v1133_v38 }
  0x52   : > { %646 = vmatprep.subr.bf16.mxu0 %v1135_v39 }
  0x55   : > { %647 = vmatpush2.bf16.msra.mxu0 %v1138_v41 }
  0x56   : > { %648 = vmatprep.subr.bf16.mxu0 %v1140_v42 }
  0x59   : > { %649 = vmatpush2.bf16.msra.mxu0 %v1143_v43 }
  0x5a   : > { %650 = vmatprep.subr.bf16.mxu0 %v1145_v44 }
  0x5d   : > { %651 = vmatpush2.bf16.msra.mxu0 %v1148_v45 }
  0x5e   : > { %652 = vmatprep.subr.bf16.mxu0 %v1153_v46 }
  0x61   : > { %653 = vmatpush2.bf16.msra.mxu0 %v1155_v47 }
  0x62   : > { %654 = vmatprep.subr.bf16.mxu0 %v1156_v48 }
  0x65   : > { %655 = vmatpush2.bf16.msra.mxu0 %v1158_v49 }
  0x68   : > { %657 = vmatmul.mubr.bf16.vlgmr.msra.gmra.mxu0 %v1150_v40 }
 0x10b   : > { %v1025_v54 = vpop.f32.mrf.mxu1 }
 0x10d   : > { %v1026_v56 = vpop.f32.mrf.mxu1 }
 0x10e   : > { %v1027_v57 = vadd.f32 %v1026_v56, %v1025_v54 }
 0x10f   : > { %v1028_v58 = vpop.f32.mrf.mxu1 }
 0x110   : > { %v748_v59 = vadd.f32 %v1027_v57, %v742_v55 }
 0x111   : > { %v1029_v60 = vpop.f32.mrf.mxu1 }
 0x112   : > { %v1005_v61 = vpack.c.bf16 %v748_v59, %v748_v59  ;;  %v1030_v62 = vadd.f32 %v1029_v60, %v1028_v58 }
 0x114   : > { %773 = vst [vmem:[%s253_s10 + $0x8] sm:$0xf] %v1005_v61  ;;  %v751_v63 = vadd.f32 %v1030_v62, %v742_v55 }
 0x116   : > { %v1007_v0 = vpack.c.bf16 %v751_v63, %v751_v63 }
 0x118   : > { %775 = vst [vmem:[%s253_s10 + $0x14] sm:$0xf] %v1007_v0 }
 0x11b   : > { %v997_v17 = vld [vmem:[%s253_s10 + $0x8] sm:$0xf] (%p1313_p9) }
 0x11c   : > { %998 = vst [vmem:[%s788_s20 + $0x8] sm:$0xf] (%p1313_p9), %v997_v17 }
 0x11f   : > { %v999_v18 = vld [vmem:[%s253_s10 + $0x14] sm:$0xf] (%p1313_p9) }
 0x120   : > { %1000 = vst [vmem:[%s788_s20 + $0x20] sm:$0xf] (%p1313_p9), %v999_v18 }
 0x128   : > { %v658_v5 = vpop.f32.mrf.mxu0 }
 0x129   : > { %v746_v7 = vadd.f32 %v734_v3, %v658_v5 }
 0x12a   : > { %v660_v6 = vpop.f32.mrf.mxu0 }
 0x12b   : > { %v747_v8 = vadd.f32 %v738_v4, %v660_v6 }
 0x12c   : > { %v662_v9 = vpop.f32.mrf.mxu0 }
 0x12d   : > { %v1004_v10 = vpack.c.bf16 %v747_v8, %v746_v7  ;;  %v749_v12 = vadd.f32 %v734_v3, %v662_v9 }
 0x12e   : > { %v664_v11 = vpop.f32.mrf.mxu0 }
 0x12f   : > { %772 = vst [vmem:[%s253_s10] sm:$0xff] %v1004_v10  ;;  %v750_v13 = vadd.f32 %v738_v4, %v664_v11  ;;  %782 = sbr.rel (!%p1313_p9) target bundleno = 316 (0x13c), region = 48 }
 0x131   : > { %v1006_v14 = vpack.c.bf16 %v750_v13, %v749_v12 }
 0x133   : > { %774 = vst [vmem:[%s253_s10 + $0xc] sm:$0xff] %v1006_v14 }
 0x136   : > { %v803_v15 = vld [vmem:[%s253_s10] sm:$0xff] }
 0x137   : > { %804 = vst [vmem:[%s788_s20] sm:$0xff] %v803_v15 }
 0x13a   : > { %v805_v16 = vld [vmem:[%s253_s10 + $0xc] sm:$0xff] }
 0x13b   : > { %806 = vst [vmem:[%s788_s20 + $0x18] sm:$0xff] %v805_v16 }
 0x13c PF: > { %s16_s17 = sadd.s32 1, %s1237_s17   ;;  %s1439_s12 = smov %s1221_s13 }
 0x13d   : > { %p13_p11 = scmp.ge.s32.totalorder %s16_s17, 4   ;;  %s1440_s13 = smov %s1225_s14 }
 0x13e   : > { %s1441_s14 = smov %s1311_s24  ;;  %s1442_s15 = smov %s1233_s16 }
 0x13f   : > { %s1443_s16 = smov %s1445_s19  ;;  %15 = sbr.rel (!%p13_p11) target bundleno = 4 (0x4), region = 118 }
 0x144   :  { %834 = vsyncpa [#allocation4], 1 }
 0x145   :  { %836 = vsyncpa [#allocation4 + $0x1], 1 }

// kernel: transformer_forward.55
= control target key start
LH: loop header
LB: loop body
LE: loop exit
PB: predicated region body
PF: predicated region fallthrough
CT: control target
= control target key end

     0   :  { %v54_v24 = vlaneseq  ;;  %s145_s0 = inlined_call_operand.vmem [shape: f32[16,256], index: 0, kind: input, shape index: {}]   ;;  %s146_s1 = inlined_call_operand.vmem [shape: f32[1,256], index: 1, kind: input, shape index: {}]   ;;  %s147_s2 = inlined_call_operand.vmem [shape: f32[1,256], index: 2, kind: input, shape index: {}]   ;;  %s148_s3 = inlined_call_operand.vmem [shape: f32[16,256], index: 3, kind: output, shape index: {}]  }
   0x1   :  { %v14_v0 = vld [vmem:[%s145_s0] sm:$0xff]  ;;  %v15_v1 = vld [vmem:[%s145_s0 + $0x8] sm:$0xff]  ;;  %v16_v2 = vld [vmem:[%s145_s0 + $0x10] sm:$0xff] }
   0x2   :  { %v20_v3 = vadd.f32 %v15_v1, %v14_v0  ;;  %v17_v4 = vld [vmem:[%s145_s0 + $0x18] sm:$0xff]  ;;  %v55_v27 = vshrl.u32 %v54_v24, 7  ;;  %v18_v30 = vld [vmem:[%s146_s1] sm:$0x3] }
   0x3   :  { %v23_v5 = vadd.f32 %v17_v4, %v16_v2  ;;  %v19_v31 = vld [vmem:[%s147_s2] sm:$0x3] }
   0x4   :  { %21 = vadd.xlane.f32.xlu0 %v20_v3  ;;  %v56_v28 = vsub.s32 0, %v55_v27  ;;  %v60_v29 = vsub.s32 1, %v55_v27 }
   0x6   :  { %v57_v32 = vrot.slane %v18_v30, %v56_v28  ;;  %v61_v33 = vrot.slane %v18_v30, %v60_v29  ;;  %v72_v35 = vrot.slane %v19_v31, %v56_v28  ;;  %v76_v36 = vrot.slane %v19_v31, %v60_v29 }
   0x8   :  { %24 = vadd.xlane.f32.xlu0 %v23_v5 }
  0x8d   :  { %v22_v6 = vpop.xlane.xlu0 %21 }
  0x8e   :  { %v27_v7 = vmul.f32 0.00390625, %v22_v6 }
  0x90   :  { %v29_v8 = vsub.f32 %v14_v0, %v27_v7  ;;  %v30_v9 = vsub.f32 %v15_v1, %v27_v7 }
  0x91   :  { %v25_v10 = vpop.xlane.xlu0 %24 }
  0x92   :  { %v28_v11 = vmul.f32 0.00390625, %v25_v10  ;;  %v33_v12 = vmul.f32 %v29_v8, %v29_v8  ;;  %v34_v13 = vmul.f32 %v30_v9, %v30_v9 }
  0x94   :  { %v31_v14 = vsub.f32 %v16_v2, %v28_v11  ;;  %v32_v15 = vsub.f32 %v17_v4, %v28_v11  ;;  %v37_v16 = vadd.f32 %v34_v13, %v33_v12 }
  0x96   :  { %38 = vadd.xlane.f32.xlu1 %v37_v16  ;;  %v35_v17 = vmul.f32 %v31_v14, %v31_v14  ;;  %v36_v18 = vmul.f32 %v32_v15, %v32_v15 }
  0x98   :  { %v40_v19 = vadd.f32 %v36_v18, %v35_v17 }
  0x9a   :  { %41 = vadd.xlane.f32.xlu1 %v40_v19 }
 0x11f   :  { %v39_v20 = vpop.xlane.xlu1 %38 }
 0x120   :  { %v43_v21 = vmul.f32 0.00390625, %v39_v20 }
 0x122   :  { %v45_v22 = vadd.f32 1e-05, %v43_v21 }
 0x123   :  { %v42_v23 = vpop.xlane.xlu1 %41 }
 0x124   :  { %91 = vrsqrt.f32 %v45_v22  ;;  %v44_v25 = vmul.f32 0.00390625, %v42_v23 }
 0x126   :  { %v46_v26 = vadd.f32 1e-05, %v44_v25 }
 0x128   :  { %93 = vrsqrt.f32 %v46_v26 }
 0x131   :  { %v92_v34 = vpop.eup %91 }
 0x132   :  { %v49_v37 = vmul.f32 %v92_v34, %v29_v8  ;;  %v50_v38 = vmul.f32 %v92_v34, %v30_v9 }
 0x134   :  { %v64_v39 = vmul.f32 %v57_v32, %v49_v37  ;;  %v65_v40 = vmul.f32 %v61_v33, %v50_v38 }
 0x135   :  { %v94_v41 = vpop.eup %93 }
 0x136   :  { %v79_v42 = vadd.f32 %v72_v35, %v64_v39  ;;  %v80_v43 = vadd.f32 %v76_v36, %v65_v40  ;;  %v51_v44 = vmul.f32 %v94_v41, %v31_v14  ;;  %v52_v45 = vmul.f32 %v94_v41, %v32_v15 }
 0x138   :  { %83 = vst [vmem:[%s148_s3] sm:$0xff] %v79_v42  ;;  %84 = vst [vmem:[%s148_s3 + $0x8] sm:$0xff] %v80_v43  ;;  %v66_v46 = vmul.f32 %v57_v32, %v51_v44  ;;  %v67_v47 = vmul.f32 %v61_v33, %v52_v45 }
 0x13a   :  { %v81_v48 = vadd.f32 %v72_v35, %v66_v46  ;;  %v82_v49 = vadd.f32 %v76_v36, %v67_v47 }
 0x13c   :  { %85 = vst [vmem:[%s148_s3 + $0x10] sm:$0xff] %v81_v48  ;;  %86 = vst [vmem:[%s148_s3 + $0x18] sm:$0xff] %v82_v49 }

// kernel: transformer_forward.45
= control target key start
LH: loop header
LB: loop body
LE: loop exit
PB: predicated region body
PF: predicated region fallthrough
CT: control target
= control target key end

     0   :  { %v290_v34 = vlaneseq  ;;  %s546_s1 = inlined_call_operand.vmem [shape: bf16[256,256], index: 1, kind: input, shape index: {}]   ;;  %s547_s0 = inlined_call_operand.vmem [shape: bf16[16,256], index: 0, kind: input, shape index: {}]   ;;  %s548_s2 = inlined_call_operand.vmem [shape: f32[1,256], index: 2, kind: input, shape index: {}]   ;;  %s549_s3 = inlined_call_operand.vmem [shape: bf16[16,256], index: 3, kind: output, shape index: {}]  }
   0x1   :  { %v364_v0 = vld [vmem:[%s546_s1 + $0x74] ss:$8 sps:$4 sm:$0xff]   ;;  %v366_v1 = vld [vmem:[%s546_s1 + $0x70] ss:$8 sps:$4 sm:$0xff]   ;;  %v367_v2 = vld [vmem:[%s546_s1 + $0x64] ss:$8 sps:$4 sm:$0xff]  }
   0x2   :  { %230 = vmatprep.subr.bf16.mxu0 %v364_v0  ;;  %v369_v3 = vld [vmem:[%s546_s1 + $0x60] ss:$8 sps:$4 sm:$0xff]   ;;  %v370_v4 = vld [vmem:[%s546_s1 + $0x54] ss:$8 sps:$4 sm:$0xff]   ;;  %v372_v5 = vld [vmem:[%s546_s1 + $0x50] ss:$8 sps:$4 sm:$0xff]  }
   0x3   :  { %231 = vmatpush1.bf16.msra.mxu0 %v366_v1  ;;  %v373_v6 = vld [vmem:[%s546_s1 + $0x44] ss:$8 sps:$4 sm:$0xff]   ;;  %v375_v7 = vld [vmem:[%s546_s1 + $0x40] ss:$8 sps:$4 sm:$0xff]   ;;  %v376_v8 = vld [vmem:[%s546_s1 + $0x34] ss:$8 sps:$4 sm:$0xff]  }
   0x4   :  { %232 = vmatprep.subr.bf16.mxu0 %v367_v2  ;;  %v378_v9 = vld [vmem:[%s546_s1 + $0x30] ss:$8 sps:$4 sm:$0xff]   ;;  %v379_v10 = vld [vmem:[%s546_s1 + $0x24] ss:$8 sps:$4 sm:$0xff]   ;;  %v381_v11 = vld [vmem:[%s546_s1 + $0x20] ss:$8 sps:$4 sm:$0xff]  }
   0x5   :  { %v382_v12 = vld [vmem:[%s546_s1 + $0x14] ss:$8 sps:$4 sm:$0xff]   ;;  %v414_v13 = vld [vmem:[%s547_s0 + $0x4] ss:$8 sps:$4 sm:$0xff]   ;;  %v384_v14 = vld [vmem:[%s546_s1 + $0x10] ss:$8 sps:$4 sm:$0xff]  }
   0x6   :  { %v385_v15 = vld [vmem:[%s546_s1 + $0x4] ss:$8 sps:$4 sm:$0xff]   ;;  %262 = vmatprep.mubr.bf16.mxu0 %v414_v13  ;;  %v387_v16 = vld [vmem:[%s546_s1] ss:$8 sps:$4 sm:$0xff]   ;;  %v388_v17 = vld [vmem:[%s546_s1 + $0xf4] ss:$8 sps:$4 sm:$0xff]  }
   0x7   :  { %233 = vmatpush1.bf16.msra.mxu0 %v369_v3  ;;  %v390_v18 = vld [vmem:[%s546_s1 + $0xf0] ss:$8 sps:$4 sm:$0xff]   ;;  %v391_v19 = vld [vmem:[%s546_s1 + $0xe4] ss:$8 sps:$4 sm:$0xff]   ;;  %v393_v20 = vld [vmem:[%s546_s1 + $0xe0] ss:$8 sps:$4 sm:$0xff]  }
   0x8   :  { %234 = vmatprep.subr.bf16.mxu0 %v370_v4  ;;  %v394_v21 = vld [vmem:[%s546_s1 + $0xd4] ss:$8 sps:$4 sm:$0xff]   ;;  %v396_v22 = vld [vmem:[%s546_s1 + $0xd0] ss:$8 sps:$4 sm:$0xff]   ;;  %v397_v23 = vld [vmem:[%s546_s1 + $0xc4] ss:$8 sps:$4 sm:$0xff]  }
   0x9   :  { %v399_v24 = vld [vmem:[%s546_s1 + $0xc0] ss:$8 sps:$4 sm:$0xff]   ;;  %v400_v25 = vld [vmem:[%s546_s1 + $0xb4] ss:$8 sps:$4 sm:$0xff]   ;;  %v402_v26 = vld [vmem:[%s546_s1 + $0xb0] ss:$8 sps:$4 sm:$0xff]  }
   0xa   :  { %v403_v27 = vld [vmem:[%s546_s1 + $0xa4] ss:$8 sps:$4 sm:$0xff]   ;;  %v405_v28 = vld [vmem:[%s546_s1 + $0xa0] ss:$8 sps:$4 sm:$0xff]   ;;  %v406_v29 = vld [vmem:[%s546_s1 + $0x94] ss:$8 sps:$4 sm:$0xff]  }
   0xb   :  { %235 = vmatpush1.bf16.msra.mxu0 %v372_v5  ;;  %v408_v30 = vld [vmem:[%s546_s1 + $0x90] ss:$8 sps:$4 sm:$0xff]   ;;  %v409_v31 = vld [vmem:[%s546_s1 + $0x84] ss:$8 sps:$4 sm:$0xff]   ;;  %v411_v32 = vld [vmem:[%s546_s1 + $0x80] ss:$8 sps:$4 sm:$0xff]  }
   0xc   :  { %236 = vmatprep.subr.bf16.mxu0 %v373_v6  ;;  %v412_v33 = vld [vmem:[%s547_s0] ss:$8 sps:$4 sm:$0xff]   ;;  %v291_v35 = vshrl.u32 %v290_v34, 7 }
   0xd   :  { %v288_v37 = vld [vmem:[%s548_s2] sm:$0x3] }
   0xe   :  { %v292_v36 = vsub.s32 0, %v291_v35  ;;  %v296_v38 = vsub.s32 1, %v291_v35 }
   0xf   :  { %237 = vmatpush1.bf16.msra.mxu0 %v375_v7 }
  0x10   :  { %238 = vmatprep.subr.bf16.mxu0 %v376_v8  ;;  %v293_v39 = vrot.slane %v288_v37, %v292_v36  ;;  %v297_v40 = vrot.slane %v288_v37, %v296_v38 }
  0x13   :  { %239 = vmatpush1.bf16.msra.mxu0 %v378_v9 }
  0x14   :  { %240 = vmatprep.subr.bf16.mxu0 %v379_v10 }
  0x17   :  { %241 = vmatpush1.bf16.msra.mxu0 %v381_v11 }
  0x18   :  { %242 = vmatprep.subr.bf16.mxu0 %v382_v12 }
  0x1b   :  { %243 = vmatpush1.bf16.msra.mxu0 %v384_v14 }
  0x1c   :  { %244 = vmatprep.subr.bf16.mxu0 %v385_v15 }
  0x1f   :  { %245 = vmatpush1.bf16.msra.mxu0 %v387_v16 }
  0x20   :  { %246 = vmatprep.subr.bf16.mxu0 %v388_v17 }
  0x23   :  { %247 = vmatpush2.bf16.msra.mxu0 %v390_v18 }
  0x24   :  { %248 = vmatprep.subr.bf16.mxu0 %v391_v19 }
  0x27   :  { %249 = vmatpush2.bf16.msra.mxu0 %v393_v20 }
  0x28   :  { %250 = vmatprep.subr.bf16.mxu0 %v394_v21 }
  0x2b   :  { %251 = vmatpush2.bf16.msra.mxu0 %v396_v22 }
  0x2c   :  { %252 = vmatprep.subr.bf16.mxu0 %v397_v23 }
  0x2f   :  { %253 = vmatpush2.bf16.msra.mxu0 %v399_v24 }
  0x30   :  { %254 = vmatprep.subr.bf16.mxu0 %v400_v25 }
  0x33   :  { %255 = vmatpush2.bf16.msra.mxu0 %v402_v26 }
  0x34   :  { %256 = vmatprep.subr.bf16.mxu0 %v403_v27 }
  0x37   :  { %257 = vmatpush2.bf16.msra.mxu0 %v405_v28 }
  0x38   :  { %258 = vmatprep.subr.bf16.mxu0 %v406_v29 }
  0x3b   :  { %259 = vmatpush2.bf16.msra.mxu0 %v408_v30 }
  0x3c   :  { %260 = vmatprep.subr.bf16.mxu0 %v409_v31 }
  0x3f   :  { %261 = vmatpush2.bf16.msra.mxu0 %v411_v32 }
  0x42   :  { %263 = vmatmul.mubr.bf16.vlgmr.msra.gmra.mxu0 %v412_v33 }
 0x102   :  { %v264_v41 = vpop.f32.mrf.mxu0 }
 0x103   :  { %v300_v42 = vadd.f32 %v293_v39, %v264_v41 }
 0x104   :  { %v266_v43 = vpop.f32.mrf.mxu0 }
 0x105   :  { %v301_v44 = vadd.f32 %v297_v40, %v266_v43  ;;  %v304_v46 = vmax.f32 %v300_v42, 0.0 }
 0x106   :  { %v268_v45 = vpop.f32.mrf.mxu0 }
 0x107   :  { %v305_v47 = vmax.f32 %v301_v44, 0.0  ;;  %v302_v48 = vadd.f32 %v293_v39, %v268_v45 }
 0x108   :  { %v270_v49 = vpop.f32.mrf.mxu0 }
 0x109   :  { %v362_v50 = vpack.c.bf16 %v305_v47, %v304_v46  ;;  %v303_v51 = vadd.f32 %v297_v40, %v270_v49  ;;  %v306_v52 = vmax.f32 %v302_v48, 0.0 }
 0x10b   :  { %320 = vst [vmem:[%s549_s3] sm:$0xff] %v362_v50  ;;  %v307_v53 = vmax.f32 %v303_v51, 0.0 }
 0x10d   :  { %v363_v54 = vpack.c.bf16 %v307_v53, %v306_v52 }
 0x10f   :  { %321 = vst [vmem:[%s549_s3 + $0x8] sm:$0xff] %v363_v54 }

// kernel: transformer_forward.48
= control target key start
LH: loop header
LB: loop body
LE: loop exit
PB: predicated region body
PF: predicated region fallthrough
CT: control target
= control target key end

     0   :  { %s1400_s12 = smov 0   ;;  %s1402_s13 = smov 0   ;;  %s1668_s0 = inlined_call_operand.vmem [shape: bf16[16,256], index: 0, kind: input, shape index: {}]   ;;  %s1669_s1 = inlined_call_operand.vmem [shape: bf16[256,768], index: 1, kind: input, shape index: {}]   ;;  %s1670_s2 = inlined_call_operand.vmem [shape: f32[1,768], index: 2, kind: input, shape index: {}]   ;;  %s1671_s3 = inlined_call_operand.vmem [shape: bf16[16,768], index: 3, kind: output, shape index: {}]  }
   0x1   :  { %s1404_s14 = smov 0   ;;  %s1406_s15 = smov 0  }
   0x2   :  { %s1408_s16 = smov 0  }
   0x3 LB: > { %s28_s17 = sadd.s32 1, %s1374_s15  ;;  %s1070_s18 = sadd.s32 4294967295, %s1378_s16   ;;  %s1378_s16 = sphi %s1408_s16, %s13_s16   ;;  %s1374_s15 = sphi %s1406_s15, %s1676_s15   ;;  %s1370_s14 = sphi %s1404_s14, %s1675_s14   ;;  %s1366_s13 = sphi %s1402_s13, %s1674_s13   ;;  %s1362_s12 = sphi %s1400_s12, %s1673_s12  }
   0x4   : > { %p30_p0 = scmp.ge.s32.totalorder %s28_s17, 2  ;;  %p76_p1 = scmp.ne.s32.totalorder %s1366_s13, %s1362_s12 }
   0x5   : > { %p77_p2 = scmp.eq.s32.totalorder %s1378_s16, 0  ;;  %p134_p4 = scmp.eq.s32.totalorder %s1070_s18, 1 }
   0x6   : > { %s1678_s17 = smov (%p30_p0, %s28_s17), 0  ;;  %s69_s20 = sadd.s32 1, %s1366_s13 }
   0x7   : > { %p78_p3 = por %p77_p2, %p76_p1  ;;  %s65_s19 = ssub.s32 %s1374_s15, %s1678_s17 }
   0x8   : > { %p67_p5 = scmp.eq.s32.totalorder %s65_s19, 0  ;;  %p1435_p6 = por %p134_p4, %p76_p1 }
   0x9   : > { %p1074_p7 = scmp.ge.s32.totalorder %s1378_s16, 2 }
   0xa   : > { %s1440_s22 = scalar_select %p67_p5, %s1366_s13, %s69_s20  }
   0xb   : > { %171 = sbr.rel (%p1074_p7) target bundleno = 58 (0x3a), region = 20 }
  0x10   : > { %174 = sbr.rel (!%p78_p3) target bundleno = 58 (0x3a), region = 24  ;;  %s176_s23 = sand.u32 (%p78_p3), 1, %s1366_s13  }
  0x11   : > { %s1202_s24 = smul.u32 (%p78_p3), 12, %s1374_s15 }
  0x12   : > { %s1230_s25 = smul.u32 (%p78_p3), 384, %s176_s23 }
  0x13   : > { %s1448_s28 = scalar_lea.vmem (%p78_p3), %s1669_s1, %s1202_s24 }
  0x14   : > { %v199_v0 = vld [vmem:[%s1448_s28] sm:$0xff] (%p78_p3)  ;;  %v201_v1 = vld [vmem:[%s1448_s28 + $0x18] sm:$0xff] (%p78_p3)  ;;  %v203_v2 = vld [vmem:[%s1448_s28 + $0x30] sm:$0xff] (%p78_p3)  ;;  %s1453_s29 = scalar_lea.vmem (%p78_p3), [#allocation3], %s1230_s25 }
  0x15   : > { %200 = vst [vmem:[%s1453_s29] sm:$0xff] %v199_v0  ;;  %202 = vst [vmem:[%s1453_s29 + $0xc] sm:$0xff] %v201_v1  ;;  %v205_v3 = vld [vmem:[%s1448_s28 + $0x48] sm:$0xff]  ;;  %v207_v4 = vld [vmem:[%s1448_s28 + $0x60] sm:$0xff] }
  0x16   : > { %204 = vst [vmem:[%s1453_s29 + $0x18] sm:$0xff] %v203_v2  ;;  %v209_v5 = vld [vmem:[%s1448_s28 + $0x78] sm:$0xff]  ;;  %206 = vst [vmem:[%s1453_s29 + $0x24] sm:$0xff] %v205_v3  ;;  %v211_v6 = vld [vmem:[%s1448_s28 + $0x90] sm:$0xff] }
  0x17   : > { %208 = vst [vmem:[%s1453_s29 + $0x30] sm:$0xff] %v207_v4  ;;  %210 = vst [vmem:[%s1453_s29 + $0x3c] sm:$0xff] %v209_v5  ;;  %v213_v7 = vld [vmem:[%s1448_s28 + $0xa8] sm:$0xff]  ;;  %v215_v8 = vld [vmem:[%s1448_s28 + $0xc0] sm:$0xff] }
  0x18   : > { %212 = vst [vmem:[%s1453_s29 + $0x48] sm:$0xff] %v211_v6  ;;  %214 = vst [vmem:[%s1453_s29 + $0x54] sm:$0xff] %v213_v7  ;;  %v217_v9 = vld [vmem:[%s1448_s28 + $0xd8] sm:$0xff]  ;;  %v219_v10 = vld [vmem:[%s1448_s28 + $0xf0] sm:$0xff] }
  0x19   : > { %216 = vst [vmem:[%s1453_s29 + $0x60] sm:$0xff] %v215_v8  ;;  %v221_v11 = vld [vmem:[%s1448_s28 + $0x108] sm:$0xff]  ;;  %218 = vst [vmem:[%s1453_s29 + $0x6c] sm:$0xff] %v217_v9  ;;  %v223_v12 = vld [vmem:[%s1448_s28 + $0x120] sm:$0xff] }
  0x1a   : > { %220 = vst [vmem:[%s1453_s29 + $0x78] sm:$0xff] %v219_v10  ;;  %222 = vst [vmem:[%s1453_s29 + $0x84] sm:$0xff] %v221_v11  ;;  %v225_v13 = vld [vmem:[%s1448_s28 + $0x138] sm:$0xff]  ;;  %v227_v14 = vld [vmem:[%s1448_s28 + $0x150] sm:$0xff] }
  0x1b   : > { %224 = vst [vmem:[%s1453_s29 + $0x90] sm:$0xff] %v223_v12  ;;  %226 = vst [vmem:[%s1453_s29 + $0x9c] sm:$0xff] %v225_v13  ;;  %v229_v15 = vld [vmem:[%s1448_s28 + $0x168] sm:$0xff]  ;;  %v231_v16 = vld [vmem:[%s1448_s28 + $0x180] sm:$0xff] }
  0x1c   : > { %228 = vst [vmem:[%s1453_s29 + $0xa8] sm:$0xff] %v227_v14  ;;  %v233_v17 = vld [vmem:[%s1448_s28 + $0x198] sm:$0xff]  ;;  %230 = vst [vmem:[%s1453_s29 + $0xb4] sm:$0xff] %v229_v15  ;;  %v235_v18 = vld [vmem:[%s1448_s28 + $0x1b0] sm:$0xff] }
  0x1d   : > { %232 = vst [vmem:[%s1453_s29 + $0xc0] sm:$0xff] %v231_v16  ;;  %234 = vst [vmem:[%s1453_s29 + $0xcc] sm:$0xff] %v233_v17  ;;  %v237_v19 = vld [vmem:[%s1448_s28 + $0x1c8] sm:$0xff]  ;;  %v239_v20 = vld [vmem:[%s1448_s28 + $0x1e0] sm:$0xff] }
  0x1e   : > { %236 = vst [vmem:[%s1453_s29 + $0xd8] sm:$0xff] %v235_v18  ;;  %238 = vst [vmem:[%s1453_s29 + $0xe4] sm:$0xff] %v237_v19  ;;  %v241_v21 = vld [vmem:[%s1448_s28 + $0x1f8] sm:$0xff]  ;;  %v243_v22 = vld [vmem:[%s1448_s28 + $0x210] sm:$0xff] }
  0x1f   : > { %240 = vst [vmem:[%s1453_s29 + $0xf0] sm:$0xff] %v239_v20  ;;  %v245_v23 = vld [vmem:[%s1448_s28 + $0x228] sm:$0xff]  ;;  %242 = vst [vmem:[%s1453_s29 + $0xfc] sm:$0xff] %v241_v21  ;;  %v247_v24 = vld [vmem:[%s1448_s28 + $0x240] sm:$0xff] }
  0x20   : > { %244 = vst [vmem:[%s1453_s29 + $0x108] sm:$0xff] %v243_v22  ;;  %246 = vst [vmem:[%s1453_s29 + $0x114] sm:$0xff] %v245_v23  ;;  %v249_v25 = vld [vmem:[%s1448_s28 + $0x258] sm:$0xff]  ;;  %v251_v26 = vld [vmem:[%s1448_s28 + $0x270] sm:$0xff] }
  0x21   : > { %248 = vst [vmem:[%s1453_s29 + $0x120] sm:$0xff] %v247_v24  ;;  %250 = vst [vmem:[%s1453_s29 + $0x12c] sm:$0xff] %v249_v25  ;;  %v253_v27 = vld [vmem:[%s1448_s28 + $0x288] sm:$0xff]  ;;  %v255_v28 = vld [vmem:[%s1448_s28 + $0x2a0] sm:$0xff] }
  0x22   : > { %252 = vst [vmem:[%s1453_s29 + $0x138] sm:$0xff] %v251_v26  ;;  %v257_v29 = vld [vmem:[%s1448_s28 + $0x2b8] sm:$0xff]  ;;  %254 = vst [vmem:[%s1453_s29 + $0x144] sm:$0xff] %v253_v27  ;;  %v259_v30 = vld [vmem:[%s1448_s28 + $0x2d0] sm:$0xff] }
  0x23   : > { %256 = vst [vmem:[%s1453_s29 + $0x150] sm:$0xff] %v255_v28  ;;  %258 = vst [vmem:[%s1453_s29 + $0x15c] sm:$0xff] %v257_v29  ;;  %v261_v31 = vld [vmem:[%s1448_s28 + $0x2e8] sm:$0xff]  ;;  %v1078_v33 = vld [vmem:[%s1448_s28 + $0x20] sm:$0xf] }
  0x24   : > { %v1076_v32 = vld [vmem:[%s1448_s28 + $0x8] sm:$0xf]  ;;  %260 = vst [vmem:[%s1453_s29 + $0x168] sm:$0xff] %v259_v30  ;;  %262 = vst [vmem:[%s1453_s29 + $0x174] sm:$0xff] %v261_v31  ;;  %v1080_v34 = vld [vmem:[%s1448_s28 + $0x38] sm:$0xf] }
  0x25   : > { %1077 = vst [vmem:[%s1453_s29 + $0x8] sm:$0xf] %v1076_v32  ;;  %v1082_v35 = vld [vmem:[%s1448_s28 + $0x50] sm:$0xf]  ;;  %1079 = vst [vmem:[%s1453_s29 + $0x14] sm:$0xf] %v1078_v33 }
  0x26   : > { %1081 = vst [vmem:[%s1453_s29 + $0x20] sm:$0xf] %v1080_v34  ;;  %1083 = vst [vmem:[%s1453_s29 + $0x2c] sm:$0xf] %v1082_v35  ;;  %v1084_v36 = vld [vmem:[%s1448_s28 + $0x68] sm:$0xf] }
  0x27   : > { %v1086_v37 = vld [vmem:[%s1448_s28 + $0x80] sm:$0xf]  ;;  %v1088_v38 = vld [vmem:[%s1448_s28 + $0x98] sm:$0xf]  ;;  %1085 = vst [vmem:[%s1453_s29 + $0x38] sm:$0xf] %v1084_v36 }
  0x28   : > { %1087 = vst [vmem:[%s1453_s29 + $0x44] sm:$0xf] %v1086_v37  ;;  %1089 = vst [vmem:[%s1453_s29 + $0x50] sm:$0xf] %v1088_v38  ;;  %v1090_v39 = vld [vmem:[%s1448_s28 + $0xb0] sm:$0xf] }
  0x29   : > { %v1092_v40 = vld [vmem:[%s1448_s28 + $0xc8] sm:$0xf]  ;;  %v1094_v41 = vld [vmem:[%s1448_s28 + $0xe0] sm:$0xf]  ;;  %1091 = vst [vmem:[%s1453_s29 + $0x5c] sm:$0xf] %v1090_v39 }
  0x2a   : > { %1093 = vst [vmem:[%s1453_s29 + $0x68] sm:$0xf] %v1092_v40  ;;  %1095 = vst [vmem:[%s1453_s29 + $0x74] sm:$0xf] %v1094_v41  ;;  %v1096_v42 = vld [vmem:[%s1448_s28 + $0xf8] sm:$0xf] }
  0x2b   : > { %v1098_v43 = vld [vmem:[%s1448_s28 + $0x110] sm:$0xf]  ;;  %v1100_v44 = vld [vmem:[%s1448_s28 + $0x128] sm:$0xf]  ;;  %1097 = vst [vmem:[%s1453_s29 + $0x80] sm:$0xf] %v1096_v42 }
  0x2c   : > { %1099 = vst [vmem:[%s1453_s29 + $0x8c] sm:$0xf] %v1098_v43  ;;  %1101 = vst [vmem:[%s1453_s29 + $0x98] sm:$0xf] %v1100_v44  ;;  %v1102_v45 = vld [vmem:[%s1448_s28 + $0x140] sm:$0xf] }
  0x2d   : > { %v1104_v46 = vld [vmem:[%s1448_s28 + $0x158] sm:$0xf]  ;;  %v1106_v47 = vld [vmem:[%s1448_s28 + $0x170] sm:$0xf]  ;;  %1103 = vst [vmem:[%s1453_s29 + $0xa4] sm:$0xf] %v1102_v45 }
  0x2e   : > { %1105 = vst [vmem:[%s1453_s29 + $0xb0] sm:$0xf] %v1104_v46  ;;  %1107 = vst [vmem:[%s1453_s29 + $0xbc] sm:$0xf] %v1106_v47  ;;  %v1108_v48 = vld [vmem:[%s1448_s28 + $0x188] sm:$0xf] }
  0x2f   : > { %v1110_v49 = vld [vmem:[%s1448_s28 + $0x1a0] sm:$0xf]  ;;  %v1112_v50 = vld [vmem:[%s1448_s28 + $0x1b8] sm:$0xf]  ;;  %1109 = vst [vmem:[%s1453_s29 + $0xc8] sm:$0xf] %v1108_v48 }
  0x30   : > { %1111 = vst [vmem:[%s1453_s29 + $0xd4] sm:$0xf] %v1110_v49  ;;  %1113 = vst [vmem:[%s1453_s29 + $0xe0] sm:$0xf] %v1112_v50  ;;  %v1114_v51 = vld [vmem:[%s1448_s28 + $0x1d0] sm:$0xf] }
  0x31   : > { %v1116_v52 = vld [vmem:[%s1448_s28 + $0x1e8] sm:$0xf]  ;;  %v1118_v53 = vld [vmem:[%s1448_s28 + $0x200] sm:$0xf]  ;;  %1115 = vst [vmem:[%s1453_s29 + $0xec] sm:$0xf] %v1114_v51 }
  0x32   : > { %1117 = vst [vmem:[%s1453_s29 + $0xf8] sm:$0xf] %v1116_v52  ;;  %1119 = vst [vmem:[%s1453_s29 + $0x104] sm:$0xf] %v1118_v53  ;;  %v1120_v54 = vld [vmem:[%s1448_s28 + $0x218] sm:$0xf] }
  0x33   : > { %v1122_v55 = vld [vmem:[%s1448_s28 + $0x230] sm:$0xf]  ;;  %v1124_v56 = vld [vmem:[%s1448_s28 + $0x248] sm:$0xf]  ;;  %1121 = vst [vmem:[%s1453_s29 + $0x110] sm:$0xf] %v1120_v54 }
  0x34   : > { %1123 = vst [vmem:[%s1453_s29 + $0x11c] sm:$0xf] %v1122_v55  ;;  %1125 = vst [vmem:[%s1453_s29 + $0x128] sm:$0xf] %v1124_v56  ;;  %v1126_v57 = vld [vmem:[%s1448_s28 + $0x260] sm:$0xf] }
  0x35   : > { %v1128_v58 = vld [vmem:[%s1448_s28 + $0x278] sm:$0xf]  ;;  %v1130_v59 = vld [vmem:[%s1448_s28 + $0x290] sm:$0xf]  ;;  %1127 = vst [vmem:[%s1453_s29 + $0x134] sm:$0xf] %v1126_v57 }
  0x36   : > { %1129 = vst [vmem:[%s1453_s29 + $0x140] sm:$0xf] %v1128_v58  ;;  %1131 = vst [vmem:[%s1453_s29 + $0x14c] sm:$0xf] %v1130_v59  ;;  %v1132_v60 = vld [vmem:[%s1448_s28 + $0x2a8] sm:$0xf] }
  0x37   : > { %v1134_v61 = vld [vmem:[%s1448_s28 + $0x2c0] sm:$0xf]  ;;  %v1136_v62 = vld [vmem:[%s1448_s28 + $0x2d8] sm:$0xf]  ;;  %1133 = vst [vmem:[%s1453_s29 + $0x158] sm:$0xf] %v1132_v60 }
  0x38   : > { %1135 = vst [vmem:[%s1453_s29 + $0x164] sm:$0xf] %v1134_v61  ;;  %1137 = vst [vmem:[%s1453_s29 + $0x170] sm:$0xf] %v1136_v62  ;;  %v1138_v63 = vld [vmem:[%s1448_s28 + $0x2f0] sm:$0xf] }
  0x39   : > { %1139 = vst [vmem:[%s1453_s29 + $0x17c] sm:$0xf] %v1138_v63 }
  0x3a PF: > { %p1140_p8 = scmp.ge.s32.totalorder %s1378_s16, 1  ;;  %p347_p9 = scmp.lt.s32.totalorder %s1378_s16, 3 }
  0x3c   : > { %p348_p10 = pnand %p1140_p8, %p347_p9 }
  0x3d   : > { %s354_s30 = sand.u32 (!%p348_p10), 1, %s1362_s12   ;;  %s404_s10 = smul.u32 (!%p348_p10), 3, %s1370_s14 }
  0x3e   : > { %351 = sbr.rel (%p348_p10) target bundleno = 345 (0x159), region = 54 }
  0x3f   : > { %s1231_s4 = smul.u32 (!%p348_p10), 384, %s354_s30  ;;  %p405_p11 = scmp.lt.s32.totalorder (!%p348_p10), %s404_s10, 5 }
  0x40   : > { %s1232_s20 = smul.u32 (!%p348_p10), 24, %s354_s30 }
  0x41   : > { %s1588_s7 = scalar_lea.vmem (!%p348_p10), [#allocation3], %s1231_s4 }
  0x42   : > { %s389_s23 = scalar_lea.vmem (!%p348_p10), [#allocation4], %s1232_s20 }
  0x43   : > { %v1333_v0 = vld [vmem:[%s1668_s0 + $0x4] ss:$8 sps:$4 sm:$0xff]   ;;  %v1275_v2 = vld [vmem:[%s1588_s7 + $0xa8] ss:$12 sps:$4 sm:$0xff]   ;;  %v1278_v4 = vld [vmem:[%s1588_s7 + $0x90] ss:$12 sps:$4 sm:$0xff]   ;;  %v867_v50 = vlaneseq }
  0x44   : > { %835 = vmatprep.mubr.bf16.mxu1 %v1333_v0  ;;  %792 = vmatprep.mubr.bf16.mxu0 %v1333_v0  ;;  %v1273_v1 = vld [vmem:[%s1588_s7 + $0xac] ss:$12 sps:$4 sm:$0xff]   ;;  %v1276_v3 = vld [vmem:[%s1588_s7 + $0x94] ss:$12 sps:$4 sm:$0xff]   ;;  %v1279_v5 = vld [vmem:[%s1588_s7 + $0x7c] ss:$12 sps:$4 sm:$0xff]  }
  0x45   : > { %760 = vmatprep.subr.bf16.mxu0 %v1273_v1  ;;  %v1281_v6 = vld [vmem:[%s1588_s7 + $0x78] ss:$12 sps:$4 sm:$0xff]   ;;  %v1293_v8 = vld [vmem:[%s1588_s7 + $0x170] ss:$12 sps:$4 sm:$0xff]   ;;  %v1284_v9 = vld [vmem:[%s1588_s7 + $0x60] ss:$12 sps:$4 sm:$0xff]  }
  0x46   : > { %761 = vmatpush1.bf16.msra.mxu0 %v1275_v2  ;;  %v1282_v7 = vld [vmem:[%s1588_s7 + $0x64] ss:$12 sps:$4 sm:$0xff]   ;;  %1208 = vmatprep.subr.bf16.mxu1 %v1293_v8  ;;  %v1285_v11 = vld [vmem:[%s1588_s7 + $0x4c] ss:$12 sps:$4 sm:$0xff]   ;;  %v1287_v14 = vld [vmem:[%s1588_s7 + $0x48] ss:$12 sps:$4 sm:$0xff]  }
  0x47   : > { %762 = vmatprep.subr.bf16.mxu0 %v1276_v3  ;;  %v1295_v10 = vld [vmem:[%s1588_s7 + $0xb0] ss:$12 sps:$4 sm:$0xff]   ;;  %v1298_v12 = vld [vmem:[%s1588_s7 + $0x158] ss:$12 sps:$4 sm:$0xff]   ;;  %v1288_v15 = vld [vmem:[%s1588_s7 + $0x34] ss:$12 sps:$4 sm:$0xff]  }
  0x48   : > { %1209 = vmatpush3.bf16.msra.mxu1 %v1295_v10  ;;  %v1300_v13 = vld [vmem:[%s1588_s7 + $0x98] ss:$12 sps:$4 sm:$0xff]   ;;  %v1303_v16 = vld [vmem:[%s1588_s7 + $0x140] ss:$12 sps:$4 sm:$0xff]   ;;  %v1290_v18 = vld [vmem:[%s1588_s7 + $0x30] ss:$12 sps:$4 sm:$0xff]  }
  0x49   : > { %1210 = vmatprep.subr.bf16.mxu1 %v1298_v12  ;;  %v1305_v17 = vld [vmem:[%s1588_s7 + $0x80] ss:$12 sps:$4 sm:$0xff]   ;;  %v1308_v19 = vld [vmem:[%s1588_s7 + $0x128] ss:$12 sps:$4 sm:$0xff]   ;;  %v1294_v22 = vld [vmem:[%s1588_s7 + $0x18] ss:$12 sps:$4 sm:$0xff]  }
  0x4a   : > { %763 = vmatpush1.bf16.msra.mxu0 %v1278_v4  ;;  %v1291_v20 = vld [vmem:[%s1588_s7 + $0x1c] ss:$12 sps:$4 sm:$0xff]   ;;  %v1296_v24 = vld [vmem:[%s1588_s7 + $0x4] ss:$12 sps:$4 sm:$0xff]   ;;  %v1299_v27 = vld [vmem:[%s1588_s7] ss:$12 sps:$4 sm:$0xff]  }
  0x4b   : > { %764 = vmatprep.subr.bf16.mxu0 %v1279_v5  ;;  %v1310_v21 = vld [vmem:[%s1588_s7 + $0x68] ss:$12 sps:$4 sm:$0xff]   ;;  %v1313_v23 = vld [vmem:[%s1588_s7 + $0x110] ss:$12 sps:$4 sm:$0xff]   ;;  %v1318_v26 = vld [vmem:[%s1588_s7 + $0xf8] ss:$12 sps:$4 sm:$0xff]  }
  0x4c   : > { %1211 = vmatpush3.bf16.msra.mxu1 %v1300_v13  ;;  %v1315_v25 = vld [vmem:[%s1588_s7 + $0x50] ss:$12 sps:$4 sm:$0xff]   ;;  %v1301_v28 = vld [vmem:[%s1588_s7 + $0x16c] ss:$12 sps:$4 sm:$0xff]   ;;  %v1304_v31 = vld [vmem:[%s1588_s7 + $0x168] ss:$12 sps:$4 sm:$0xff]  }
  0x4d   : > { %1212 = vmatprep.subr.bf16.mxu1 %v1303_v16  ;;  %v1320_v29 = vld [vmem:[%s1588_s7 + $0x38] ss:$12 sps:$4 sm:$0xff]   ;;  %v1323_v30 = vld [vmem:[%s1588_s7 + $0xe0] ss:$12 sps:$4 sm:$0xff]   ;;  %v1328_v34 = vld [vmem:[%s1588_s7 + $0xc8] ss:$12 sps:$4 sm:$0xff]  }
  0x4e   : > { %765 = vmatpush1.bf16.msra.mxu0 %v1281_v6  ;;  %v1306_v32 = vld [vmem:[%s1588_s7 + $0x154] ss:$12 sps:$4 sm:$0xff]   ;;  %v1309_v35 = vld [vmem:[%s1588_s7 + $0x150] ss:$12 sps:$4 sm:$0xff]   ;;  %v1314_v38 = vld [vmem:[%s1588_s7 + $0x138] ss:$12 sps:$4 sm:$0xff]  }
  0x4f   : > { %766 = vmatprep.subr.bf16.mxu0 %v1282_v7  ;;  %v1325_v33 = vld [vmem:[%s1588_s7 + $0x20] ss:$12 sps:$4 sm:$0xff]   ;;  %v1311_v36 = vld [vmem:[%s1588_s7 + $0x13c] ss:$12 sps:$4 sm:$0xff]   ;;  %v1316_v39 = vld [vmem:[%s1588_s7 + $0x124] ss:$12 sps:$4 sm:$0xff]  }
  0x50   : > { %1213 = vmatpush3.bf16.msra.mxu1 %v1305_v17  ;;  %v1330_v37 = vld [vmem:[%s1588_s7 + $0x8] ss:$12 sps:$4 sm:$0xff]   ;;  %v1319_v41 = vld [vmem:[%s1588_s7 + $0x120] ss:$12 sps:$4 sm:$0xff]   ;;  %v1329_v45 = vld [vmem:[%s1588_s7 + $0xf0] ss:$12 sps:$4 sm:$0xff]  }
  0x51   : > { %1214 = vmatprep.subr.bf16.mxu1 %v1308_v19  ;;  %v1331_v40 = vld [vmem:[%s1668_s0] ss:$8 sps:$4 sm:$0xff]   ;;  %v1321_v42 = vld [vmem:[%s1588_s7 + $0x10c] ss:$12 sps:$4 sm:$0xff]   ;;  %v1337_v48 = vld [vmem:[%s1588_s7 + $0xc4] ss:$12 sps:$4 sm:$0xff]  }
  0x52   : > { %767 = vmatpush1.bf16.msra.mxu0 %v1284_v9  ;;  %v1324_v43 = vld [vmem:[%s1588_s7 + $0x108] ss:$12 sps:$4 sm:$0xff]   ;;  %v1336_v47 = vld [vmem:[%s1588_s7 + $0xd8] ss:$12 sps:$4 sm:$0xff]   ;;  %v1339_v49 = vld [vmem:[%s1588_s7 + $0xc0] ss:$12 sps:$4 sm:$0xff]  }
  0x53   : > { %768 = vmatprep.subr.bf16.mxu0 %v1285_v11  ;;  %v1326_v44 = vld [vmem:[%s1588_s7 + $0xf4] ss:$12 sps:$4 sm:$0xff]   ;;  %v1334_v46 = vld [vmem:[%s1588_s7 + $0xdc] ss:$12 sps:$4 sm:$0xff]   ;;  %s1680_s10 = smov (!%p405_p11, %s404_s10), 5  ;;  %v868_v51 = vshrl.u32 %v867_v50, 7 }
  0x54   : > { %1215 = vmatpush3.bf16.msra.mxu1 %v1310_v21  ;;  %s407_s19 = scalar_lea.vmem %s1670_s2, %s1680_s10  ;;  %s1207_s12 = smul.u32 (%p1435_p6), 12, %s1370_s14 }
  0x55   : > { %1216 = vmatprep.subr.bf16.mxu1 %v1313_v23  ;;  %v877_v52 = vsub.s32 2, %v868_v51  ;;  %v865_v53 = vld [vmem:[%s407_s19] sm:$0x7]  ;;  %v869_v1 = vsub.s32 0, %v868_v51  ;;  %v873_v2 = vsub.s32 1, %v868_v51 }
  0x56   : > { %769 = vmatpush1.bf16.msra.mxu0 %v1287_v14  ;;  %s924_s26 = scalar_lea.vmem (%p1435_p6), %s1671_s3, %s1207_s12 }
  0x57   : > { %770 = vmatprep.subr.bf16.mxu0 %v1288_v15  ;;  %v878_v55 = vrot.slane %v865_v53, %v877_v52  ;;  %v870_v3 = vrot.slane %v865_v53, %v869_v1  ;;  %v874_v4 = vrot.slane %v865_v53, %v873_v2 }
  0x58   : > { %1217 = vmatpush3.bf16.msra.mxu1 %v1315_v25 }
  0x59   : > { %1218 = vmatprep.subr.bf16.mxu1 %v1318_v26 }
  0x5a   : > { %771 = vmatpush1.bf16.msra.mxu0 %v1290_v18 }
  0x5b   : > { %772 = vmatprep.subr.bf16.mxu0 %v1291_v20 }
  0x5c   : > { %1219 = vmatpush3.bf16.msra.mxu1 %v1320_v29 }
  0x5d   : > { %1220 = vmatprep.subr.bf16.mxu1 %v1323_v30 }
  0x5e   : > { %773 = vmatpush1.bf16.msra.mxu0 %v1294_v22 }
  0x5f   : > { %774 = vmatprep.subr.bf16.mxu0 %v1296_v24 }
  0x60   : > { %1221 = vmatpush3.bf16.msra.mxu1 %v1325_v33 }
  0x61   : > { %1222 = vmatprep.subr.bf16.mxu1 %v1328_v34 }
  0x62   : > { %775 = vmatpush1.bf16.msra.mxu0 %v1299_v27 }
  0x63   : > { %776 = vmatprep.subr.bf16.mxu0 %v1301_v28 }
  0x64   : > { %1223 = vmatpush3.bf16.msra.mxu1 %v1330_v37 }
  0x66   : > { %777 = vmatpush2.bf16.msra.mxu0 %v1304_v31 }
  0x67   : > { %778 = vmatprep.subr.bf16.mxu0 %v1306_v32  ;;  %836 = vmatmul.mubr.bf16.vlgmr.msra.gmra.mxu1 %v1331_v40 }
  0x6a   : > { %779 = vmatpush2.bf16.msra.mxu0 %v1309_v35 }
  0x6b   : > { %780 = vmatprep.subr.bf16.mxu0 %v1311_v36 }
  0x6e   : > { %781 = vmatpush2.bf16.msra.mxu0 %v1314_v38 }
  0x6f   : > { %782 = vmatprep.subr.bf16.mxu0 %v1316_v39 }
  0x72   : > { %783 = vmatpush2.bf16.msra.mxu0 %v1319_v41 }
  0x73   : > { %784 = vmatprep.subr.bf16.mxu0 %v1321_v42 }
  0x76   : > { %785 = vmatpush2.bf16.msra.mxu0 %v1324_v43 }
  0x77   : > { %786 = vmatprep.subr.bf16.mxu0 %v1326_v44 }
  0x7a   : > { %787 = vmatpush2.bf16.msra.mxu0 %v1329_v45 }
  0x7b   : > { %788 = vmatprep.subr.bf16.mxu0 %v1334_v46 }
  0x7e   : > { %789 = vmatpush2.bf16.msra.mxu0 %v1336_v47 }
  0x7f   : > { %790 = vmatprep.subr.bf16.mxu0 %v1337_v48 }
  0x82   : > { %791 = vmatpush2.bf16.msra.mxu0 %v1339_v49 }
  0x85   : > { %793 = vmatmul.mubr.bf16.vlgmr.msra.gmra.mxu0 %v1331_v40 }
 0x127   : > { %v1224_v54 = vpop.f32.mrf.mxu1 }
 0x129   : > { %v1225_v56 = vpop.f32.mrf.mxu1 }
 0x12a   : > { %v1226_v57 = vadd.f32 %v1225_v56, %v1224_v54 }
 0x12b   : > { %v1227_v58 = vpop.f32.mrf.mxu1 }
 0x12c   : > { %v884_v59 = vadd.f32 %v1226_v57, %v878_v55 }
 0x12d   : > { %v1228_v60 = vpop.f32.mrf.mxu1 }
 0x12e   : > { %v1204_v61 = vpack.c.bf16 %v884_v59, %v884_v59  ;;  %v1229_v62 = vadd.f32 %v1228_v60, %v1227_v58 }
 0x130   : > { %909 = vst [vmem:[%s389_s23 + $0x8] sm:$0xf] %v1204_v61  ;;  %v887_v63 = vadd.f32 %v1229_v62, %v878_v55 }
 0x132   : > { %v1206_v0 = vpack.c.bf16 %v887_v63, %v887_v63 }
 0x134   : > { %911 = vst [vmem:[%s389_s23 + $0x14] sm:$0xf] %v1206_v0 }
 0x137   : > { %v1196_v17 = vld [vmem:[%s389_s23 + $0x8] sm:$0xf] (%p1435_p6) }
 0x138   : > { %1197 = vst [vmem:[%s924_s26 + $0x8] sm:$0xf] (%p1435_p6), %v1196_v17 }
 0x13b   : > { %v1198_v18 = vld [vmem:[%s389_s23 + $0x14] sm:$0xf] (%p1435_p6) }
 0x13c   : > { %1199 = vst [vmem:[%s924_s26 + $0x20] sm:$0xf] (%p1435_p6), %v1198_v18 }
 0x145   : > { %v794_v5 = vpop.f32.mrf.mxu0 }
 0x146   : > { %v882_v7 = vadd.f32 %v870_v3, %v794_v5 }
 0x147   : > { %v796_v6 = vpop.f32.mrf.mxu0 }
 0x148   : > { %v883_v8 = vadd.f32 %v874_v4, %v796_v6 }
 0x149   : > { %v798_v9 = vpop.f32.mrf.mxu0 }
 0x14a   : > { %v1203_v10 = vpack.c.bf16 %v883_v8, %v882_v7  ;;  %v885_v12 = vadd.f32 %v870_v3, %v798_v9 }
 0x14b   : > { %v800_v11 = vpop.f32.mrf.mxu0 }
 0x14c   : > { %908 = vst [vmem:[%s389_s23] sm:$0xff] %v1203_v10  ;;  %v886_v13 = vadd.f32 %v874_v4, %v800_v11  ;;  %918 = sbr.rel (!%p1435_p6) target bundleno = 345 (0x159), region = 70 }
 0x14e   : > { %v1205_v14 = vpack.c.bf16 %v886_v13, %v885_v12 }
 0x150   : > { %910 = vst [vmem:[%s389_s23 + $0xc] sm:$0xff] %v1205_v14 }
 0x153   : > { %v939_v15 = vld [vmem:[%s389_s23] sm:$0xff] }
 0x154   : > { %940 = vst [vmem:[%s924_s26] sm:$0xff] %v939_v15 }
 0x157   : > { %v941_v16 = vld [vmem:[%s389_s23 + $0xc] sm:$0xff] }
 0x158   : > { %942 = vst [vmem:[%s924_s26 + $0x18] sm:$0xff] %v941_v16 }
 0x159 PF: > { %s13_s16 = sadd.s32 1, %s1378_s16   ;;  %s1673_s12 = smov %s1366_s13 }
 0x15a   : > { %p10_p12 = scmp.ge.s32.totalorder %s13_s16, 4   ;;  %s1674_s13 = smov %s1440_s22 }
 0x15b   : > { %s1675_s14 = smov %s1374_s15  ;;  %s1676_s15 = smov %s1678_s17 }
 0x15c   :  { %12 = sbr.rel (!%p10_p12) target bundleno = 3 (0x3), region = 145 }

// kernel: transformer_forward.61
= control target key start
LH: loop header
LB: loop body
LE: loop exit
PB: predicated region body
PF: predicated region fallthrough
CT: control target
= control target key end

     0   :  { %s1011_s1 = inlined_call_operand.vmem [shape: bf16[256,512], index: 1, kind: input, shape index: {}]   ;;  %s1012_s0 = inlined_call_operand.vmem [shape: bf16[16,256], index: 0, kind: input, shape index: {}]   ;;  %s1013_s2 = inlined_call_operand.vmem [shape: f32[1,512], index: 2, kind: input, shape index: {}]   ;;  %s1014_s3 = inlined_call_operand.vmem [shape: bf16[16,512], index: 3, kind: output, shape index: {}]  }
   0x1   :  { %v679_v0 = vld [vmem:[%s1011_s1 + $0xe4] ss:$16 sps:$4 sm:$0xff]   ;;  %v681_v1 = vld [vmem:[%s1011_s1 + $0xec] ss:$16 sps:$4 sm:$0xff]   ;;  %v683_v2 = vld [vmem:[%s1011_s1 + $0xe0] ss:$16 sps:$4 sm:$0xff]  }
   0x2   :  { %430 = vmatprep.subr.bf16.mxu0 %v679_v0  ;;  %v684_v3 = vld [vmem:[%s1011_s1 + $0xe8] ss:$16 sps:$4 sm:$0xff]   ;;  %473 = vmatprep.subr.bf16.mxu1 %v681_v1  ;;  %v685_v4 = vld [vmem:[%s1011_s1 + $0xc4] ss:$16 sps:$4 sm:$0xff]   ;;  %v687_v5 = vld [vmem:[%s1011_s1 + $0xcc] ss:$16 sps:$4 sm:$0xff]  }
   0x3   :  { %431 = vmatpush1.bf16.msra.mxu0 %v683_v2  ;;  %474 = vmatpush1.bf16.msra.mxu1 %v684_v3  ;;  %v689_v6 = vld [vmem:[%s1011_s1 + $0xc0] ss:$16 sps:$4 sm:$0xff]   ;;  %v690_v7 = vld [vmem:[%s1011_s1 + $0xc8] ss:$16 sps:$4 sm:$0xff]   ;;  %v691_v8 = vld [vmem:[%s1011_s1 + $0xa4] ss:$16 sps:$4 sm:$0xff]   ;;  %v545_v2 = vlaneseq }
   0x4   :  { %432 = vmatprep.subr.bf16.mxu0 %v685_v4  ;;  %475 = vmatprep.subr.bf16.mxu1 %v687_v5  ;;  %v693_v9 = vld [vmem:[%s1011_s1 + $0xac] ss:$16 sps:$4 sm:$0xff]   ;;  %v695_v10 = vld [vmem:[%s1011_s1 + $0xa0] ss:$16 sps:$4 sm:$0xff]   ;;  %v696_v11 = vld [vmem:[%s1011_s1 + $0xa8] ss:$16 sps:$4 sm:$0xff]  }
   0x5   :  { %v697_v12 = vld [vmem:[%s1011_s1 + $0x84] ss:$16 sps:$4 sm:$0xff]   ;;  %v699_v13 = vld [vmem:[%s1011_s1 + $0x8c] ss:$16 sps:$4 sm:$0xff]   ;;  %v701_v14 = vld [vmem:[%s1011_s1 + $0x80] ss:$16 sps:$4 sm:$0xff]  }
   0x6   :  { %v702_v15 = vld [vmem:[%s1011_s1 + $0x88] ss:$16 sps:$4 sm:$0xff]   ;;  %v703_v16 = vld [vmem:[%s1011_s1 + $0x64] ss:$16 sps:$4 sm:$0xff]   ;;  %v705_v17 = vld [vmem:[%s1011_s1 + $0x6c] ss:$16 sps:$4 sm:$0xff]  }
   0x7   :  { %433 = vmatpush1.bf16.msra.mxu0 %v689_v6  ;;  %476 = vmatpush1.bf16.msra.mxu1 %v690_v7  ;;  %v707_v18 = vld [vmem:[%s1011_s1 + $0x60] ss:$16 sps:$4 sm:$0xff]   ;;  %v708_v19 = vld [vmem:[%s1011_s1 + $0x68] ss:$16 sps:$4 sm:$0xff]   ;;  %v709_v20 = vld [vmem:[%s1011_s1 + $0x44] ss:$16 sps:$4 sm:$0xff]  }
   0x8   :  { %434 = vmatprep.subr.bf16.mxu0 %v691_v8  ;;  %477 = vmatprep.subr.bf16.mxu1 %v693_v9  ;;  %v711_v21 = vld [vmem:[%s1011_s1 + $0x4c] ss:$16 sps:$4 sm:$0xff]   ;;  %v713_v22 = vld [vmem:[%s1011_s1 + $0x40] ss:$16 sps:$4 sm:$0xff]   ;;  %v714_v23 = vld [vmem:[%s1011_s1 + $0x48] ss:$16 sps:$4 sm:$0xff]  }
   0x9   :  { %v715_v24 = vld [vmem:[%s1011_s1 + $0x24] ss:$16 sps:$4 sm:$0xff]   ;;  %v717_v25 = vld [vmem:[%s1011_s1 + $0x2c] ss:$16 sps:$4 sm:$0xff]   ;;  %v719_v26 = vld [vmem:[%s1011_s1 + $0x20] ss:$16 sps:$4 sm:$0xff]  }
   0xa   :  { %v720_v27 = vld [vmem:[%s1011_s1 + $0x28] ss:$16 sps:$4 sm:$0xff]   ;;  %v721_v28 = vld [vmem:[%s1011_s1 + $0x4] ss:$16 sps:$4 sm:$0xff]   ;;  %v723_v29 = vld [vmem:[%s1011_s1 + $0xc] ss:$16 sps:$4 sm:$0xff]  }
   0xb   :  { %435 = vmatpush1.bf16.msra.mxu0 %v695_v10  ;;  %478 = vmatpush1.bf16.msra.mxu1 %v696_v11  ;;  %v725_v30 = vld [vmem:[%s1011_s1] ss:$16 sps:$4 sm:$0xff]   ;;  %v726_v31 = vld [vmem:[%s1011_s1 + $0x8] ss:$16 sps:$4 sm:$0xff]   ;;  %v727_v32 = vld [vmem:[%s1011_s1 + $0x1e4] ss:$16 sps:$4 sm:$0xff]  }
   0xc   :  { %436 = vmatprep.subr.bf16.mxu0 %v697_v12  ;;  %479 = vmatprep.subr.bf16.mxu1 %v699_v13  ;;  %v729_v33 = vld [vmem:[%s1011_s1 + $0x1ec] ss:$16 sps:$4 sm:$0xff]   ;;  %v731_v34 = vld [vmem:[%s1011_s1 + $0x1e0] ss:$16 sps:$4 sm:$0xff]   ;;  %v732_v35 = vld [vmem:[%s1011_s1 + $0x1e8] ss:$16 sps:$4 sm:$0xff]  }
   0xd   :  { %v733_v36 = vld [vmem:[%s1011_s1 + $0x1c4] ss:$16 sps:$4 sm:$0xff]   ;;  %v735_v37 = vld [vmem:[%s1011_s1 + $0x1cc] ss:$16 sps:$4 sm:$0xff]   ;;  %v737_v38 = vld [vmem:[%s1011_s1 + $0x1c0] ss:$16 sps:$4 sm:$0xff]  }
   0xe   :  { %v738_v39 = vld [vmem:[%s1011_s1 + $0x1c8] ss:$16 sps:$4 sm:$0xff]   ;;  %v739_v40 = vld [vmem:[%s1011_s1 + $0x1a4] ss:$16 sps:$4 sm:$0xff]   ;;  %v741_v41 = vld [vmem:[%s1011_s1 + $0x1ac] ss:$16 sps:$4 sm:$0xff]  }
   0xf   :  { %437 = vmatpush1.bf16.msra.mxu0 %v701_v14  ;;  %480 = vmatpush1.bf16.msra.mxu1 %v702_v15  ;;  %v743_v42 = vld [vmem:[%s1011_s1 + $0x1a0] ss:$16 sps:$4 sm:$0xff]   ;;  %v744_v43 = vld [vmem:[%s1011_s1 + $0x1a8] ss:$16 sps:$4 sm:$0xff]   ;;  %v745_v44 = vld [vmem:[%s1011_s1 + $0x184] ss:$16 sps:$4 sm:$0xff]  }
  0x10   :  { %438 = vmatprep.subr.bf16.mxu0 %v703_v16  ;;  %481 = vmatprep.subr.bf16.mxu1 %v705_v17  ;;  %v747_v45 = vld [vmem:[%s1011_s1 + $0x18c] ss:$16 sps:$4 sm:$0xff]   ;;  %v749_v47 = vld [vmem:[%s1011_s1 + $0x180] ss:$16 sps:$4 sm:$0xff]   ;;  %v750_v48 = vld [vmem:[%s1011_s1 + $0x188] ss:$16 sps:$4 sm:$0xff]  }
  0x11   :  { %v777_v46 = vld [vmem:[%s1012_s0 + $0x4] ss:$8 sps:$4 sm:$0xff]   ;;  %v755_v51 = vld [vmem:[%s1011_s1 + $0x160] ss:$16 sps:$4 sm:$0xff]   ;;  %v756_v52 = vld [vmem:[%s1011_s1 + $0x168] ss:$16 sps:$4 sm:$0xff]  }
  0x12   :  { %v751_v49 = vld [vmem:[%s1011_s1 + $0x164] ss:$16 sps:$4 sm:$0xff]   ;;  %v753_v50 = vld [vmem:[%s1011_s1 + $0x16c] ss:$16 sps:$4 sm:$0xff]   ;;  %462 = vmatprep.mubr.bf16.mxu0 %v777_v46  ;;  %505 = vmatprep.mubr.bf16.mxu1 %v777_v46  ;;  %v761_v55 = vld [vmem:[%s1011_s1 + $0x140] ss:$16 sps:$4 sm:$0xff]  }
  0x13   :  { %439 = vmatpush1.bf16.msra.mxu0 %v707_v18  ;;  %482 = vmatpush1.bf16.msra.mxu1 %v708_v19  ;;  %v757_v53 = vld [vmem:[%s1011_s1 + $0x144] ss:$16 sps:$4 sm:$0xff]   ;;  %v759_v54 = vld [vmem:[%s1011_s1 + $0x14c] ss:$16 sps:$4 sm:$0xff]   ;;  %v762_v56 = vld [vmem:[%s1011_s1 + $0x148] ss:$16 sps:$4 sm:$0xff]  }
  0x14   :  { %440 = vmatprep.subr.bf16.mxu0 %v709_v20  ;;  %483 = vmatprep.subr.bf16.mxu1 %v711_v21  ;;  %v763_v57 = vld [vmem:[%s1011_s1 + $0x124] ss:$16 sps:$4 sm:$0xff]   ;;  %v765_v58 = vld [vmem:[%s1011_s1 + $0x12c] ss:$16 sps:$4 sm:$0xff]   ;;  %v767_v59 = vld [vmem:[%s1011_s1 + $0x120] ss:$16 sps:$4 sm:$0xff]  }
  0x15   :  { %v768_v60 = vld [vmem:[%s1011_s1 + $0x128] ss:$16 sps:$4 sm:$0xff]   ;;  %v769_v61 = vld [vmem:[%s1011_s1 + $0x104] ss:$16 sps:$4 sm:$0xff]   ;;  %v771_v62 = vld [vmem:[%s1011_s1 + $0x10c] ss:$16 sps:$4 sm:$0xff]  }
  0x16   :  { %v773_v63 = vld [vmem:[%s1011_s1 + $0x100] ss:$16 sps:$4 sm:$0xff]   ;;  %v774_v0 = vld [vmem:[%s1011_s1 + $0x108] ss:$16 sps:$4 sm:$0xff]   ;;  %v546_v3 = vshrl.u32 %v545_v2, 7 }
  0x17   :  { %441 = vmatpush1.bf16.msra.mxu0 %v713_v22  ;;  %484 = vmatpush1.bf16.msra.mxu1 %v714_v23  ;;  %v775_v1 = vld [vmem:[%s1012_s0] ss:$8 sps:$4 sm:$0xff]  }
  0x18   :  { %442 = vmatprep.subr.bf16.mxu0 %v715_v24  ;;  %485 = vmatprep.subr.bf16.mxu1 %v717_v25  ;;  %v547_v4 = vsub.s32 0, %v546_v3  ;;  %v555_v5 = vsub.s32 2, %v546_v3  ;;  %v551_v6 = vsub.s32 1, %v546_v3  ;;  %v559_v7 = vsub.s32 3, %v546_v3  ;;  %v543_v8 = vld [vmem:[%s1013_s2] sm:$0xf] }
  0x1a   :  { %v548_v9 = vrot.slane %v543_v8, %v547_v4  ;;  %v556_v10 = vrot.slane %v543_v8, %v555_v5  ;;  %v552_v11 = vrot.slane %v543_v8, %v551_v6  ;;  %v560_v12 = vrot.slane %v543_v8, %v559_v7 }
  0x1b   :  { %443 = vmatpush1.bf16.msra.mxu0 %v719_v26  ;;  %486 = vmatpush1.bf16.msra.mxu1 %v720_v27 }
  0x1c   :  { %444 = vmatprep.subr.bf16.mxu0 %v721_v28  ;;  %487 = vmatprep.subr.bf16.mxu1 %v723_v29 }
  0x1f   :  { %445 = vmatpush1.bf16.msra.mxu0 %v725_v30  ;;  %488 = vmatpush1.bf16.msra.mxu1 %v726_v31 }
  0x20   :  { %446 = vmatprep.subr.bf16.mxu0 %v727_v32  ;;  %489 = vmatprep.subr.bf16.mxu1 %v729_v33 }
  0x23   :  { %447 = vmatpush2.bf16.msra.mxu0 %v731_v34  ;;  %490 = vmatpush2.bf16.msra.mxu1 %v732_v35 }
  0x24   :  { %448 = vmatprep.subr.bf16.mxu0 %v733_v36  ;;  %491 = vmatprep.subr.bf16.mxu1 %v735_v37 }
  0x27   :  { %449 = vmatpush2.bf16.msra.mxu0 %v737_v38  ;;  %492 = vmatpush2.bf16.msra.mxu1 %v738_v39 }
  0x28   :  { %450 = vmatprep.subr.bf16.mxu0 %v739_v40  ;;  %493 = vmatprep.subr.bf16.mxu1 %v741_v41 }
  0x2b   :  { %451 = vmatpush2.bf16.msra.mxu0 %v743_v42  ;;  %494 = vmatpush2.bf16.msra.mxu1 %v744_v43 }
  0x2c   :  { %452 = vmatprep.subr.bf16.mxu0 %v745_v44  ;;  %495 = vmatprep.subr.bf16.mxu1 %v747_v45 }
  0x2f   :  { %453 = vmatpush2.bf16.msra.mxu0 %v749_v47  ;;  %496 = vmatpush2.bf16.msra.mxu1 %v750_v48 }
  0x30   :  { %454 = vmatprep.subr.bf16.mxu0 %v751_v49  ;;  %497 = vmatprep.subr.bf16.mxu1 %v753_v50 }
  0x33   :  { %455 = vmatpush2.bf16.msra.mxu0 %v755_v51  ;;  %498 = vmatpush2.bf16.msra.mxu1 %v756_v52 }
  0x34   :  { %456 = vmatprep.subr.bf16.mxu0 %v757_v53  ;;  %499 = vmatprep.subr.bf16.mxu1 %v759_v54 }
  0x37   :  { %457 = vmatpush2.bf16.msra.mxu0 %v761_v55  ;;  %500 = vmatpush2.bf16.msra.mxu1 %v762_v56 }
  0x38   :  { %458 = vmatprep.subr.bf16.mxu0 %v763_v57  ;;  %501 = vmatprep.subr.bf16.mxu1 %v765_v58 }
  0x3b   :  { %459 = vmatpush2.bf16.msra.mxu0 %v767_v59  ;;  %502 = vmatpush2.bf16.msra.mxu1 %v768_v60 }
  0x3c   :  { %460 = vmatprep.subr.bf16.mxu0 %v769_v61  ;;  %503 = vmatprep.subr.bf16.mxu1 %v771_v62 }
  0x3f   :  { %461 = vmatpush2.bf16.msra.mxu0 %v773_v63  ;;  %504 = vmatpush2.bf16.msra.mxu1 %v774_v0 }
  0x42   :  { %463 = vmatmul.mubr.bf16.vlgmr.msra.gmra.mxu0 %v775_v1  ;;  %506 = vmatmul.mubr.bf16.vlgmr.msra.gmra.mxu1 %v775_v1 }
 0x102   :  { %v464_v13 = vpop.f32.mrf.mxu0  ;;  %v507_v14 = vpop.f32.mrf.mxu1 }
 0x103   :  { %v565_v17 = vadd.f32 %v548_v9, %v464_v13  ;;  %v567_v18 = vadd.f32 %v556_v10, %v507_v14 }
 0x104   :  { %v466_v15 = vpop.f32.mrf.mxu0  ;;  %v509_v16 = vpop.f32.mrf.mxu1 }
 0x105   :  { %v566_v19 = vadd.f32 %v552_v11, %v466_v15  ;;  %v568_v20 = vadd.f32 %v560_v12, %v509_v16 }
 0x106   :  { %v468_v21 = vpop.f32.mrf.mxu0  ;;  %v511_v22 = vpop.f32.mrf.mxu1 }
 0x107   :  { %v675_v23 = vpack.c.bf16 %v566_v19, %v565_v17  ;;  %v676_v24 = vpack.c.bf16 %v568_v20, %v567_v18  ;;  %v569_v27 = vadd.f32 %v548_v9, %v468_v21  ;;  %v571_v28 = vadd.f32 %v556_v10, %v511_v22 }
 0x108   :  { %v470_v25 = vpop.f32.mrf.mxu0  ;;  %v513_v26 = vpop.f32.mrf.mxu1 }
 0x109   :  { %597 = vst [vmem:[%s1014_s3] sm:$0xff] %v675_v23  ;;  %598 = vst [vmem:[%s1014_s3 + $0x8] sm:$0xff] %v676_v24  ;;  %v570_v29 = vadd.f32 %v552_v11, %v470_v25  ;;  %v572_v30 = vadd.f32 %v560_v12, %v513_v26 }
 0x10b   :  { %v677_v31 = vpack.c.bf16 %v570_v29, %v569_v27  ;;  %v678_v32 = vpack.c.bf16 %v572_v30, %v571_v28 }
 0x10d   :  { %599 = vst [vmem:[%s1014_s3 + $0x10] sm:$0xff] %v677_v31  ;;  %600 = vst [vmem:[%s1014_s3 + $0x18] sm:$0xff] %v678_v32 }

// kernel: transformer_forward.57
= control target key start
LH: loop header
LB: loop body
LE: loop exit
PB: predicated region body
PF: predicated region fallthrough
CT: control target
= control target key end

     0   :  { %s541_s9 = smov 0   ;;  %s588_s0 = inlined_call_operand.vmem [shape: bf16[2,8,768], index: 0, kind: input, shape index: {}]   ;;  %s589_s1 = inlined_call_operand.vmem [shape: f32[2,1,8], index: 1, kind: input, shape index: {}]   ;;  %s590_s2 = inlined_call_operand.vmem [shape: bf16[2,8,256], index: 2, kind: output, shape index: {}]  }
   0x1 LB: > { %s449_s10 = sadd.s32 4294967295, %s521_s9   ;;  %p453_p0 = scmp.ge.s32.totalorder %s521_s9, 1  ;;  %s521_s9 = sphi %s541_s9, %s12_s9  }
   0x2   : > { %p120_p1 = scmp.lt.s32.totalorder %s521_s9, 3 }
   0x4   : > { %p121_p2 = pnand %p453_p0, %p120_p1 }
   0x5   : > { %p145_p3 = scmp.lt.s32.totalorder (!%p121_p2), %s449_s10, 1 }
   0x6   : > { %124 = sbr.rel (%p121_p2) target bundleno = 1252 (0x4e4), region = 28 }
   0xb   : > { %v523_v0 = vmov 0.0   ;;  %vm524_vm0 = vmmov 0   ;;  %s592_s10 = smov (!%p145_p3, %s449_s10), 1  ;;  %v160_v3 = vlaneseq  ;;  %v525_v7 = vmov -1e+30  }
   0xc   : > { %471 = vmatprep.subr.bf16.mxu0 %v523_v0  ;;  %473 = vmatprep.mubr.msk.bf16.mxu0 %vm524_vm0, %v523_v0  ;;  %s495_s11 = smul.u32 24, %s592_s10  ;;  %s152_s17 = scalar_lea.vmem %s589_s1, %s592_s10  ;;  %vm218_vm2 = vcmask 64512   ;;  %vm234_vm3 = vcmask 1043456  }
   0xd   : > { %477 = vmatprep.subr.bf16.mxu1 %v523_v0  ;;  %479 = vmatprep.mubr.msk.bf16.mxu1 %vm524_vm0, %v523_v0  ;;  %v161_v4 = vshrl.u32 %v160_v3, 7  ;;  %v163_v5 = vand.u32 127, %v160_v3  ;;  %v457_v6 = vld [vmem:[%s152_s17] ss:$0 sm:$0xff]  ;;  %s462_s18 = sshll.u32 %s592_s10, 3 }
   0xe   : > { %s557_s14 = scalar_lea.vmem %s588_s0, %s495_s11  ;;  %s578_s21 = scalar_lea.vmem %s590_s2, %s462_s18 }
   0xf   : > { %v174_v1 = vld [vmem:[%s557_s14 + $0x8] sm:$0xf]  ;;  %v173_v2 = vld [vmem:[%s557_s14] sm:$0xf]  ;;  %vm164_vm1 = vcmp.le.s32.totalorder %v163_v5, %v161_v4  ;;  %v175_v22 = vld [vmem:[%s557_s14 + $0x10] sm:$0xf] }
  0x10   : > { %472 = vmatpush3.bf16.xpose.msra.mxu0 %v174_v1  ;;  %v165_v8 = vsel %vm164_vm1, 0.0, %v525_v7  ;;  %v282_v23 = vld [vmem:[%s557_s14 + $0x14] sm:$0xf]  ;;  %v236_v24 = vsel %vm234_vm3, %v175_v22, 0  ;;  %v281_v30 = vld [vmem:[%s557_s14 + $0xc] sm:$0xf] }
  0x11   : > { %489 = vmatprep.subr.bf16.mxu0 %v523_v0  ;;  %v172_v9 = vadd.f32 %v457_v6, %v165_v8  ;;  %v341_v25 = vsel %vm234_vm3, %v282_v23, 0  ;;  %478 = vmatpush3.bf16.msra.mxu1 %v236_v24  ;;  %v280_v31 = vld [vmem:[%s557_s14 + $0x4] sm:$0xf] }
  0x12   : > { %483 = vmatprep.subr.bf16.mxu1 %v523_v0 }
  0x17   : > { %474 = vmatmul.mubr.bf16.vlgmr.msra.gmra.mxu0 %v173_v2 }
  0x18   : > { %491 = vmatprep.mubr.msk.bf16.mxu0 %vm524_vm0, %v523_v0  ;;  %490 = vmatpush3.bf16.msra.mxu0 %v341_v25 }
  0xd7   : > { %v210_v10 = vpop.f32.mrf.mxu0 }
  0xd8   : > { %v216_v11 = vmul.f32 0.088388346, %v210_v10 }
  0xd9   : > { %v475_v12 = vpop.f32.mrf.mxu0 }
  0xda   : > { %v217_v13 = vadd.f32 %v216_v11, %v172_v9 }
  0xdb   : > { %v213_v14 = vpop.f32.mrf.mxu0 }
  0xdc   : > { %v219_v15 = vsel %vm218_vm2, %v217_v13, -inf }
  0xdd   : > { %220 = vmax.xlane.f32.xlu0 %v219_v15  ;;  %v476_v16 = vpop.f32.mrf.mxu0 }
 0x166   : > { %v221_v17 = vpop.xlane.xlu0 %220 }
 0x167   : > { %v222_v18 = vsub.f32 %v217_v13, %v221_v17 }
 0x169   : > { %v223_v19 = vmul.f32 1.442695, %v222_v18 }
 0x16b   : > { %507 = vpow2.f32 %v223_v19 }
 0x178   : > { %v508_v20 = vpop.eup %507 }
 0x179   : > { %v225_v21 = vsel %vm218_vm2, %v508_v20, 0.0 }
 0x17a   : > { %226 = vadd.xlane.f32.xlu0 %v225_v21 }
 0x203   : > { %v227_v26 = vpop.xlane.xlu0 %226 }
 0x204   : > { %509 = vrcp.f32 %v227_v26 }
 0x211   : > { %v510_v27 = vpop.eup %509 }
 0x212   : > { %v229_v28 = vmul.f32 %v510_v27, %v508_v20 }
 0x214   : > { %v230_v29 = vpack.c.bf16 %v229_v28, %v229_v28 }
 0x216   : > { %480 = vmatmul.mubr.msk.bf16.vlgmr.msra.gmra.mxu1 %vm218_vm2, %v230_v29 }
 0x217   : > { %484 = vmatpush3.bf16.xpose.msra.mxu1 %v281_v30  ;;  %485 = vmatprep.mubr.msk.bf16.mxu1 %vm524_vm0, %v523_v0 }
 0x21e   : > { %486 = vmatmul.mubr.bf16.vlgmr.msra.gmra.mxu1 %v280_v31 }
 0x2d6   : > { %v272_v32 = vpop.f32.mrf.mxu1 }
 0x2d7   : > { %v278_v33 = vpack.c.bf16 %v272_v32, %v272_v32 }
 0x2d8   : > { %v481_v34 = vpop.f32.mrf.mxu1 }
 0x2d9   : > { %279 = vst [vmem:[%s578_s21] sm:$0xf] %v278_v33 }
 0x2da   : > { %v275_v35 = vpop.f32.mrf.mxu1 }
 0x2dc   : > { %v482_v36 = vpop.f32.mrf.mxu1 }
 0x2de   : > { %v317_v37 = vpop.f32.mrf.mxu1 }
 0x2df   : > { %v323_v38 = vmul.f32 0.088388346, %v317_v37 }
 0x2e0   : > { %v487_v39 = vpop.f32.mrf.mxu1 }
 0x2e1   : > { %v324_v40 = vadd.f32 %v323_v38, %v172_v9 }
 0x2e2   : > { %v320_v41 = vpop.f32.mrf.mxu1 }
 0x2e3   : > { %v325_v42 = vsel %vm218_vm2, %v324_v40, -inf }
 0x2e4   : > { %326 = vmax.xlane.f32.xlu1 %v325_v42  ;;  %v488_v43 = vpop.f32.mrf.mxu1 }
 0x36d   : > { %v327_v44 = vpop.xlane.xlu1 %326 }
 0x36e   : > { %v328_v45 = vsub.f32 %v324_v40, %v327_v44 }
 0x370   : > { %v329_v46 = vmul.f32 1.442695, %v328_v45 }
 0x372   : > { %511 = vpow2.f32 %v329_v46 }
 0x37f   : > { %v512_v47 = vpop.eup %511 }
 0x380   : > { %v331_v48 = vsel %vm218_vm2, %v512_v47, 0.0 }
 0x381   : > { %332 = vadd.xlane.f32.xlu1 %v331_v48 }
 0x40a   : > { %v333_v49 = vpop.xlane.xlu1 %332 }
 0x40b   : > { %513 = vrcp.f32 %v333_v49 }
 0x418   : > { %v514_v50 = vpop.eup %513 }
 0x419   : > { %v335_v51 = vmul.f32 %v514_v50, %v512_v47 }
 0x41b   : > { %v336_v52 = vpack.c.bf16 %v335_v51, %v335_v51 }
 0x41d   : > { %492 = vmatmul.mubr.msk.bf16.vlgmr.msra.gmra.mxu0 %vm218_vm2, %v336_v52 }
 0x4dd   : > { %v377_v53 = vpop.f32.mrf.mxu0 }
 0x4de   : > { %v383_v54 = vpack.c.bf16 %v377_v53, %v377_v53 }
 0x4df   : > { %v493_v55 = vpop.f32.mrf.mxu0 }
 0x4e0   : > { %384 = vst [vmem:[%s578_s21 + $0x4] sm:$0xf] %v383_v54 }
 0x4e1   : > { %v380_v56 = vpop.f32.mrf.mxu0 }
 0x4e3   : > { %v494_v57 = vpop.f32.mrf.mxu0 }
 0x4e4 PF: > { %s12_s9 = sadd.s32 1, %s521_s9  }
 0x4e5   : > { %p9_p4 = scmp.ge.s32.totalorder %s12_s9, 4  }
 0x4e7   :  { %11 = sbr.rel (!%p9_p4) target bundleno = 1 (0x1), region = 61 }

// kernel: transformer_forward.60
= control target key start
LH: loop header
LB: loop body
LE: loop exit
PB: predicated region body
PF: predicated region fallthrough
CT: control target
= control target key end

     0   :  { %v290_v34 = vlaneseq  ;;  %s542_s1 = inlined_call_operand.vmem [shape: bf16[256,256], index: 1, kind: input, shape index: {}]   ;;  %s543_s0 = inlined_call_operand.vmem [shape: bf16[16,256], index: 0, kind: input, shape index: {}]   ;;  %s544_s2 = inlined_call_operand.vmem [shape: f32[1,256], index: 2, kind: input, shape index: {}]   ;;  %s545_s3 = inlined_call_operand.vmem [shape: bf16[16,256], index: 3, kind: output, shape index: {}]  }
   0x1   :  { %v360_v0 = vld [vmem:[%s542_s1 + $0x74] ss:$8 sps:$4 sm:$0xff]   ;;  %v362_v1 = vld [vmem:[%s542_s1 + $0x70] ss:$8 sps:$4 sm:$0xff]   ;;  %v363_v2 = vld [vmem:[%s542_s1 + $0x64] ss:$8 sps:$4 sm:$0xff]  }
   0x2   :  { %230 = vmatprep.subr.bf16.mxu0 %v360_v0  ;;  %v365_v3 = vld [vmem:[%s542_s1 + $0x60] ss:$8 sps:$4 sm:$0xff]   ;;  %v366_v4 = vld [vmem:[%s542_s1 + $0x54] ss:$8 sps:$4 sm:$0xff]   ;;  %v368_v5 = vld [vmem:[%s542_s1 + $0x50] ss:$8 sps:$4 sm:$0xff]  }
   0x3   :  { %231 = vmatpush1.bf16.msra.mxu0 %v362_v1  ;;  %v369_v6 = vld [vmem:[%s542_s1 + $0x44] ss:$8 sps:$4 sm:$0xff]   ;;  %v371_v7 = vld [vmem:[%s542_s1 + $0x40] ss:$8 sps:$4 sm:$0xff]   ;;  %v372_v8 = vld [vmem:[%s542_s1 + $0x34] ss:$8 sps:$4 sm:$0xff]  }
   0x4   :  { %232 = vmatprep.subr.bf16.mxu0 %v363_v2  ;;  %v374_v9 = vld [vmem:[%s542_s1 + $0x30] ss:$8 sps:$4 sm:$0xff]   ;;  %v375_v10 = vld [vmem:[%s542_s1 + $0x24] ss:$8 sps:$4 sm:$0xff]   ;;  %v377_v11 = vld [vmem:[%s542_s1 + $0x20] ss:$8 sps:$4 sm:$0xff]  }
   0x5   :  { %v378_v12 = vld [vmem:[%s542_s1 + $0x14] ss:$8 sps:$4 sm:$0xff]   ;;  %v410_v13 = vld [vmem:[%s543_s0 + $0x4] ss:$8 sps:$4 sm:$0xff]   ;;  %v380_v14 = vld [vmem:[%s542_s1 + $0x10] ss:$8 sps:$4 sm:$0xff]  }
   0x6   :  { %v381_v15 = vld [vmem:[%s542_s1 + $0x4] ss:$8 sps:$4 sm:$0xff]   ;;  %262 = vmatprep.mubr.bf16.mxu0 %v410_v13  ;;  %v383_v16 = vld [vmem:[%s542_s1] ss:$8 sps:$4 sm:$0xff]   ;;  %v384_v17 = vld [vmem:[%s542_s1 + $0xf4] ss:$8 sps:$4 sm:$0xff]  }
   0x7   :  { %233 = vmatpush1.bf16.msra.mxu0 %v365_v3  ;;  %v386_v18 = vld [vmem:[%s542_s1 + $0xf0] ss:$8 sps:$4 sm:$0xff]   ;;  %v387_v19 = vld [vmem:[%s542_s1 + $0xe4] ss:$8 sps:$4 sm:$0xff]   ;;  %v389_v20 = vld [vmem:[%s542_s1 + $0xe0] ss:$8 sps:$4 sm:$0xff]  }
   0x8   :  { %234 = vmatprep.subr.bf16.mxu0 %v366_v4  ;;  %v390_v21 = vld [vmem:[%s542_s1 + $0xd4] ss:$8 sps:$4 sm:$0xff]   ;;  %v392_v22 = vld [vmem:[%s542_s1 + $0xd0] ss:$8 sps:$4 sm:$0xff]   ;;  %v393_v23 = vld [vmem:[%s542_s1 + $0xc4] ss:$8 sps:$4 sm:$0xff]  }
   0x9   :  { %v395_v24 = vld [vmem:[%s542_s1 + $0xc0] ss:$8 sps:$4 sm:$0xff]   ;;  %v396_v25 = vld [vmem:[%s542_s1 + $0xb4] ss:$8 sps:$4 sm:$0xff]   ;;  %v398_v26 = vld [vmem:[%s542_s1 + $0xb0] ss:$8 sps:$4 sm:$0xff]  }
   0xa   :  { %v399_v27 = vld [vmem:[%s542_s1 + $0xa4] ss:$8 sps:$4 sm:$0xff]   ;;  %v401_v28 = vld [vmem:[%s542_s1 + $0xa0] ss:$8 sps:$4 sm:$0xff]   ;;  %v402_v29 = vld [vmem:[%s542_s1 + $0x94] ss:$8 sps:$4 sm:$0xff]  }
   0xb   :  { %235 = vmatpush1.bf16.msra.mxu0 %v368_v5  ;;  %v404_v30 = vld [vmem:[%s542_s1 + $0x90] ss:$8 sps:$4 sm:$0xff]   ;;  %v405_v31 = vld [vmem:[%s542_s1 + $0x84] ss:$8 sps:$4 sm:$0xff]   ;;  %v407_v32 = vld [vmem:[%s542_s1 + $0x80] ss:$8 sps:$4 sm:$0xff]  }
   0xc   :  { %236 = vmatprep.subr.bf16.mxu0 %v369_v6  ;;  %v408_v33 = vld [vmem:[%s543_s0] ss:$8 sps:$4 sm:$0xff]   ;;  %v291_v35 = vshrl.u32 %v290_v34, 7 }
   0xd   :  { %v288_v38 = vld [vmem:[%s544_s2] sm:$0x3] }
   0xe   :  { %v292_v36 = vsub.s32 0, %v291_v35  ;;  %v296_v37 = vsub.s32 1, %v291_v35 }
   0xf   :  { %237 = vmatpush1.bf16.msra.mxu0 %v371_v7 }
  0x10   :  { %238 = vmatprep.subr.bf16.mxu0 %v372_v8  ;;  %v293_v39 = vrot.slane %v288_v38, %v292_v36  ;;  %v297_v40 = vrot.slane %v288_v38, %v296_v37 }
  0x13   :  { %239 = vmatpush1.bf16.msra.mxu0 %v374_v9 }
  0x14   :  { %240 = vmatprep.subr.bf16.mxu0 %v375_v10 }
  0x17   :  { %241 = vmatpush1.bf16.msra.mxu0 %v377_v11 }
  0x18   :  { %242 = vmatprep.subr.bf16.mxu0 %v378_v12 }
  0x1b   :  { %243 = vmatpush1.bf16.msra.mxu0 %v380_v14 }
  0x1c   :  { %244 = vmatprep.subr.bf16.mxu0 %v381_v15 }
  0x1f   :  { %245 = vmatpush1.bf16.msra.mxu0 %v383_v16 }
  0x20   :  { %246 = vmatprep.subr.bf16.mxu0 %v384_v17 }
  0x23   :  { %247 = vmatpush2.bf16.msra.mxu0 %v386_v18 }
  0x24   :  { %248 = vmatprep.subr.bf16.mxu0 %v387_v19 }
  0x27   :  { %249 = vmatpush2.bf16.msra.mxu0 %v389_v20 }
  0x28   :  { %250 = vmatprep.subr.bf16.mxu0 %v390_v21 }
  0x2b   :  { %251 = vmatpush2.bf16.msra.mxu0 %v392_v22 }
  0x2c   :  { %252 = vmatprep.subr.bf16.mxu0 %v393_v23 }
  0x2f   :  { %253 = vmatpush2.bf16.msra.mxu0 %v395_v24 }
  0x30   :  { %254 = vmatprep.subr.bf16.mxu0 %v396_v25 }
  0x33   :  { %255 = vmatpush2.bf16.msra.mxu0 %v398_v26 }
  0x34   :  { %256 = vmatprep.subr.bf16.mxu0 %v399_v27 }
  0x37   :  { %257 = vmatpush2.bf16.msra.mxu0 %v401_v28 }
  0x38   :  { %258 = vmatprep.subr.bf16.mxu0 %v402_v29 }
  0x3b   :  { %259 = vmatpush2.bf16.msra.mxu0 %v404_v30 }
  0x3c   :  { %260 = vmatprep.subr.bf16.mxu0 %v405_v31 }
  0x3f   :  { %261 = vmatpush2.bf16.msra.mxu0 %v407_v32 }
  0x42   :  { %263 = vmatmul.mubr.bf16.vlgmr.msra.gmra.mxu0 %v408_v33 }
 0x102   :  { %v264_v41 = vpop.f32.mrf.mxu0 }
 0x103   :  { %v300_v43 = vadd.f32 %v293_v39, %v264_v41 }
 0x104   :  { %v266_v42 = vpop.f32.mrf.mxu0 }
 0x105   :  { %v301_v44 = vadd.f32 %v297_v40, %v266_v42 }
 0x106   :  { %v268_v45 = vpop.f32.mrf.mxu0 }
 0x107   :  { %v358_v46 = vpack.c.bf16 %v301_v44, %v300_v43  ;;  %v302_v48 = vadd.f32 %v293_v39, %v268_v45 }
 0x108   :  { %v270_v47 = vpop.f32.mrf.mxu0 }
 0x109   :  { %316 = vst [vmem:[%s545_s3] sm:$0xff] %v358_v46  ;;  %v303_v49 = vadd.f32 %v297_v40, %v270_v47 }
 0x10b   :  { %v359_v50 = vpack.c.bf16 %v303_v49, %v302_v48 }
 0x10d   :  { %317 = vst [vmem:[%s545_s3 + $0x8] sm:$0xff] %v359_v50 }

// kernel: transformer_forward.62
= control target key start
LH: loop header
LB: loop body
LE: loop exit
PB: predicated region body
PF: predicated region fallthrough
CT: control target
= control target key end

     0   :  { %s600_s12 = smov 0   ;;  %s656_s0 = inlined_call_operand.vmem [shape: bf16[2,8,256], index: 0, kind: input, shape index: {}]   ;;  %s657_s1 = inlined_call_operand.vmem [shape: bf16[2,8,512], index: 1, kind: input, shape index: {}]   ;;  %s658_s2 = inlined_call_operand.vmem [shape: f32[2,1,8], index: 2, kind: input, shape index: {}]   ;;  %s659_s3 = inlined_call_operand.vmem [shape: bf16[2,8,256], index: 3, kind: output, shape index: {}]  }
   0x1 LB: > { %s501_s13 = sadd.s32 4294967295, %s576_s12   ;;  %p505_p0 = scmp.ge.s32.totalorder %s576_s12, 1  ;;  %s576_s12 = sphi %s600_s12, %s13_s12  }
   0x2   : > { %p155_p1 = scmp.lt.s32.totalorder %s576_s12, 3 }
   0x4   : > { %p156_p2 = pnand %p505_p0, %p155_p1 }
   0x5   : > { %p187_p3 = scmp.lt.s32.totalorder (!%p156_p2), %s501_s13, 1 }
   0x6   : > { %159 = sbr.rel (%p156_p2) target bundleno = 1251 (0x4e3), region = 32 }
   0xb   : > { %v578_v0 = vmov 0.0   ;;  %vm579_vm0 = vmmov 0   ;;  %s661_s13 = smov (!%p187_p3, %s501_s13), 1  ;;  %vm258_vm1 = vcmask 64512   ;;  %vm274_vm2 = vcmask 1043456  }
   0xc   : > { %528 = vmatprep.subr.bf16.mxu0 %v578_v0  ;;  %530 = vmatprep.mubr.msk.bf16.mxu0 %vm579_vm0, %v578_v0  ;;  %s518_s14 = sshll.u32 %s661_s13, 4  ;;  %s517_s18 = sshll.u32 %s661_s13, 3 }
   0xd   : > { %534 = vmatprep.subr.bf16.mxu1 %v578_v0  ;;  %536 = vmatprep.mubr.msk.bf16.mxu1 %vm579_vm0, %v578_v0  ;;  %s616_s17 = scalar_lea.vmem %s657_s1, %s518_s14  ;;  %s625_s21 = scalar_lea.vmem %s656_s0, %s517_s18 }
   0xe   : > { %v208_v1 = vld [vmem:[%s616_s17] sm:$0xf]  ;;  %s199_s24 = scalar_lea.vmem %s658_s2, %s661_s13  ;;  %v209_v16 = vld [vmem:[%s616_s17 + $0x8] sm:$0xf]  ;;  %v322_v17 = vld [vmem:[%s616_s17 + $0xc] sm:$0xf]  ;;  %s646_s27 = scalar_lea.vmem %s659_s3, %s517_s18 }
   0xf   : > { %529 = vmatpush3.bf16.xpose.msra.mxu0 %v208_v1  ;;  %v207_v2 = vld [vmem:[%s625_s21] sm:$0xf]  ;;  %v276_v18 = vsel %vm274_vm2, %v209_v16, 0  ;;  %v381_v19 = vsel %vm274_vm2, %v322_v17, 0  ;;  %v321_v24 = vld [vmem:[%s616_s17 + $0x4] sm:$0xf] }
  0x10   : > { %546 = vmatprep.subr.bf16.mxu0 %v578_v0  ;;  %v512_v4 = vld [vmem:[%s199_s24] ss:$0 sm:$0xff]  ;;  %535 = vmatpush3.bf16.msra.mxu1 %v276_v18  ;;  %v320_v25 = vld [vmem:[%s625_s21 + $0x4] sm:$0xf] }
  0x11   : > { %540 = vmatprep.subr.bf16.mxu1 %v578_v0 }
  0x16   : > { %531 = vmatmul.mubr.bf16.vlgmr.msra.gmra.mxu0 %v207_v2 }
  0x17   : > { %548 = vmatprep.mubr.msk.bf16.mxu0 %vm579_vm0, %v578_v0  ;;  %547 = vmatpush3.bf16.msra.mxu0 %v381_v19 }
  0xd6   : > { %v244_v3 = vpop.f32.mrf.mxu0 }
  0xd7   : > { %v250_v5 = vmul.f32 0.088388346, %v244_v3 }
  0xd8   : > { %v532_v6 = vpop.f32.mrf.mxu0 }
  0xd9   : > { %v257_v7 = vadd.f32 %v512_v4, %v250_v5 }
  0xda   : > { %v247_v8 = vpop.f32.mrf.mxu0 }
  0xdb   : > { %v259_v9 = vsel %vm258_vm1, %v257_v7, -inf }
  0xdc   : > { %260 = vmax.xlane.f32.xlu0 %v259_v9  ;;  %v533_v10 = vpop.f32.mrf.mxu0 }
 0x165   : > { %v261_v11 = vpop.xlane.xlu0 %260 }
 0x166   : > { %v262_v12 = vsub.f32 %v257_v7, %v261_v11 }
 0x168   : > { %v263_v13 = vmul.f32 1.442695, %v262_v12 }
 0x16a   : > { %562 = vpow2.f32 %v263_v13 }
 0x177   : > { %v563_v14 = vpop.eup %562 }
 0x178   : > { %v265_v15 = vsel %vm258_vm1, %v563_v14, 0.0 }
 0x179   : > { %266 = vadd.xlane.f32.xlu0 %v265_v15 }
 0x202   : > { %v267_v20 = vpop.xlane.xlu0 %266 }
 0x203   : > { %564 = vrcp.f32 %v267_v20 }
 0x210   : > { %v565_v21 = vpop.eup %564 }
 0x211   : > { %v269_v22 = vmul.f32 %v565_v21, %v563_v14 }
 0x213   : > { %v270_v23 = vpack.c.bf16 %v269_v22, %v269_v22 }
 0x215   : > { %537 = vmatmul.mubr.msk.bf16.vlgmr.msra.gmra.mxu1 %vm258_vm1, %v270_v23 }
 0x216   : > { %541 = vmatpush3.bf16.xpose.msra.mxu1 %v321_v24  ;;  %542 = vmatprep.mubr.msk.bf16.mxu1 %vm579_vm0, %v578_v0 }
 0x21d   : > { %543 = vmatmul.mubr.bf16.vlgmr.msra.gmra.mxu1 %v320_v25 }
 0x2d5   : > { %v312_v26 = vpop.f32.mrf.mxu1 }
 0x2d6   : > { %v318_v27 = vpack.c.bf16 %v312_v26, %v312_v26 }
 0x2d7   : > { %v538_v28 = vpop.f32.mrf.mxu1 }
 0x2d8   : > { %319 = vst [vmem:[%s646_s27] sm:$0xf] %v318_v27 }
 0x2d9   : > { %v315_v29 = vpop.f32.mrf.mxu1 }
 0x2db   : > { %v539_v30 = vpop.f32.mrf.mxu1 }
 0x2dd   : > { %v357_v31 = vpop.f32.mrf.mxu1 }
 0x2de   : > { %v363_v32 = vmul.f32 0.088388346, %v357_v31 }
 0x2df   : > { %v544_v33 = vpop.f32.mrf.mxu1 }
 0x2e0   : > { %v364_v34 = vadd.f32 %v512_v4, %v363_v32 }
 0x2e1   : > { %v360_v35 = vpop.f32.mrf.mxu1 }
 0x2e2   : > { %v365_v36 = vsel %vm258_vm1, %v364_v34, -inf }
 0x2e3   : > { %366 = vmax.xlane.f32.xlu1 %v365_v36  ;;  %v545_v37 = vpop.f32.mrf.mxu1 }
 0x36c   : > { %v367_v38 = vpop.xlane.xlu1 %366 }
 0x36d   : > { %v368_v39 = vsub.f32 %v364_v34, %v367_v38 }
 0x36f   : > { %v369_v40 = vmul.f32 1.442695, %v368_v39 }
 0x371   : > { %566 = vpow2.f32 %v369_v40 }
 0x37e   : > { %v567_v41 = vpop.eup %566 }
 0x37f   : > { %v371_v42 = vsel %vm258_vm1, %v567_v41, 0.0 }
 0x380   : > { %372 = vadd.xlane.f32.xlu1 %v371_v42 }
 0x409   : > { %v373_v43 = vpop.xlane.xlu1 %372 }
 0x40a   : > { %568 = vrcp.f32 %v373_v43 }
 0x417   : > { %v569_v44 = vpop.eup %568 }
 0x418   : > { %v375_v45 = vmul.f32 %v569_v44, %v567_v41 }
 0x41a   : > { %v376_v46 = vpack.c.bf16 %v375_v45, %v375_v45 }
 0x41c   : > { %549 = vmatmul.mubr.msk.bf16.vlgmr.msra.gmra.mxu0 %vm258_vm1, %v376_v46 }
 0x4dc   : > { %v417_v47 = vpop.f32.mrf.mxu0 }
 0x4dd   : > { %v423_v48 = vpack.c.bf16 %v417_v47, %v417_v47 }
 0x4de   : > { %v550_v49 = vpop.f32.mrf.mxu0 }
 0x4df   : > { %424 = vst [vmem:[%s646_s27 + $0x4] sm:$0xf] %v423_v48 }
 0x4e0   : > { %v420_v50 = vpop.f32.mrf.mxu0 }
 0x4e2   : > { %v551_v51 = vpop.f32.mrf.mxu0 }
 0x4e3 PF: > { %s13_s12 = sadd.s32 1, %s576_s12  }
 0x4e4   : > { %p10_p4 = scmp.ge.s32.totalorder %s13_s12, 4  }
 0x4e6   :  { %12 = sbr.rel (!%p10_p4) target bundleno = 1 (0x1), region = 68 }

// kernel: transformer_forward.81
= control target key start
LH: loop header
LB: loop body
LE: loop exit
PB: predicated region body
PF: predicated region fallthrough
CT: control target
= control target key end

     0   :  { %v470_v50 = vlaneseq  ;;  %s831_s1 = inlined_call_operand.vmem [shape: bf16[256,384], index: 1, kind: input, shape index: {}]   ;;  %s832_s0 = inlined_call_operand.vmem [shape: bf16[16,256], index: 0, kind: input, shape index: {}]   ;;  %s833_s2 = inlined_call_operand.vmem [shape: f32[1,384], index: 2, kind: input, shape index: {}]   ;;  %s834_s3 = inlined_call_operand.vmem [shape: f32[16,384], index: 3, kind: output, shape index: {}]  }
   0x1   :  { %v573_v0 = vld [vmem:[%s831_s1 + $0xac] ss:$12 sps:$4 sm:$0xff]   ;;  %v575_v1 = vld [vmem:[%s831_s1 + $0xa8] ss:$12 sps:$4 sm:$0xff]   ;;  %v578_v3 = vld [vmem:[%s831_s1 + $0x90] ss:$12 sps:$4 sm:$0xff]  }
   0x2   :  { %363 = vmatprep.subr.bf16.mxu0 %v573_v0  ;;  %v576_v2 = vld [vmem:[%s831_s1 + $0x94] ss:$12 sps:$4 sm:$0xff]   ;;  %v579_v4 = vld [vmem:[%s831_s1 + $0x7c] ss:$12 sps:$4 sm:$0xff]   ;;  %v581_v5 = vld [vmem:[%s831_s1 + $0x78] ss:$12 sps:$4 sm:$0xff]  }
   0x3   :  { %364 = vmatpush1.bf16.msra.mxu0 %v575_v1  ;;  %v582_v6 = vld [vmem:[%s831_s1 + $0x64] ss:$12 sps:$4 sm:$0xff]   ;;  %v584_v8 = vld [vmem:[%s831_s1 + $0x60] ss:$12 sps:$4 sm:$0xff]   ;;  %v587_v13 = vld [vmem:[%s831_s1 + $0x48] ss:$12 sps:$4 sm:$0xff]  }
   0x4   :  { %365 = vmatprep.subr.bf16.mxu0 %v576_v2  ;;  %v593_v7 = vld [vmem:[%s831_s1 + $0x170] ss:$12 sps:$4 sm:$0xff]   ;;  %v585_v10 = vld [vmem:[%s831_s1 + $0x4c] ss:$12 sps:$4 sm:$0xff]   ;;  %v588_v14 = vld [vmem:[%s831_s1 + $0x34] ss:$12 sps:$4 sm:$0xff]  }
   0x5   :  { %551 = vmatprep.subr.bf16.mxu1 %v593_v7  ;;  %v595_v9 = vld [vmem:[%s831_s1 + $0xb0] ss:$12 sps:$4 sm:$0xff]   ;;  %v598_v11 = vld [vmem:[%s831_s1 + $0x158] ss:$12 sps:$4 sm:$0xff]   ;;  %v603_v15 = vld [vmem:[%s831_s1 + $0x140] ss:$12 sps:$4 sm:$0xff]  }
   0x6   :  { %552 = vmatpush3.bf16.msra.mxu1 %v595_v9  ;;  %v600_v12 = vld [vmem:[%s831_s1 + $0x98] ss:$12 sps:$4 sm:$0xff]   ;;  %v605_v16 = vld [vmem:[%s831_s1 + $0x80] ss:$12 sps:$4 sm:$0xff]   ;;  %v590_v17 = vld [vmem:[%s831_s1 + $0x30] ss:$12 sps:$4 sm:$0xff]  }
   0x7   :  { %366 = vmatpush1.bf16.msra.mxu0 %v578_v3  ;;  %553 = vmatprep.subr.bf16.mxu1 %v598_v11  ;;  %v608_v18 = vld [vmem:[%s831_s1 + $0x128] ss:$12 sps:$4 sm:$0xff]   ;;  %v594_v21 = vld [vmem:[%s831_s1 + $0x18] ss:$12 sps:$4 sm:$0xff]   ;;  %v613_v22 = vld [vmem:[%s831_s1 + $0x110] ss:$12 sps:$4 sm:$0xff]  }
   0x8   :  { %367 = vmatprep.subr.bf16.mxu0 %v579_v4  ;;  %v591_v19 = vld [vmem:[%s831_s1 + $0x1c] ss:$12 sps:$4 sm:$0xff]   ;;  %v596_v23 = vld [vmem:[%s831_s1 + $0x4] ss:$12 sps:$4 sm:$0xff]   ;;  %v599_v26 = vld [vmem:[%s831_s1] ss:$12 sps:$4 sm:$0xff]  }
   0x9   :  { %v610_v20 = vld [vmem:[%s831_s1 + $0x68] ss:$12 sps:$4 sm:$0xff]   ;;  %v615_v24 = vld [vmem:[%s831_s1 + $0x50] ss:$12 sps:$4 sm:$0xff]   ;;  %v618_v25 = vld [vmem:[%s831_s1 + $0xf8] ss:$12 sps:$4 sm:$0xff]  }
   0xa   :  { %554 = vmatpush3.bf16.msra.mxu1 %v600_v12  ;;  %v601_v27 = vld [vmem:[%s831_s1 + $0x16c] ss:$12 sps:$4 sm:$0xff]   ;;  %v604_v30 = vld [vmem:[%s831_s1 + $0x168] ss:$12 sps:$4 sm:$0xff]   ;;  %v609_v34 = vld [vmem:[%s831_s1 + $0x150] ss:$12 sps:$4 sm:$0xff]  }
   0xb   :  { %368 = vmatpush1.bf16.msra.mxu0 %v581_v5  ;;  %555 = vmatprep.subr.bf16.mxu1 %v603_v15  ;;  %v620_v28 = vld [vmem:[%s831_s1 + $0x38] ss:$12 sps:$4 sm:$0xff]   ;;  %v623_v29 = vld [vmem:[%s831_s1 + $0xe0] ss:$12 sps:$4 sm:$0xff]   ;;  %v628_v33 = vld [vmem:[%s831_s1 + $0xc8] ss:$12 sps:$4 sm:$0xff]  }
   0xc   :  { %369 = vmatprep.subr.bf16.mxu0 %v582_v6  ;;  %v606_v31 = vld [vmem:[%s831_s1 + $0x154] ss:$12 sps:$4 sm:$0xff]   ;;  %v633_v35 = vld [vmem:[%s832_s0 + $0x4] ss:$8 sps:$4 sm:$0xff]   ;;  %v611_v36 = vld [vmem:[%s831_s1 + $0x13c] ss:$12 sps:$4 sm:$0xff]  }
   0xd   :  { %v625_v32 = vld [vmem:[%s831_s1 + $0x20] ss:$12 sps:$4 sm:$0xff]   ;;  %v630_v37 = vld [vmem:[%s831_s1 + $0x8] ss:$12 sps:$4 sm:$0xff]   ;;  %438 = vmatprep.mubr.bf16.mxu1 %v633_v35  ;;  %395 = vmatprep.mubr.bf16.mxu0 %v633_v35  ;;  %v614_v38 = vld [vmem:[%s831_s1 + $0x138] ss:$12 sps:$4 sm:$0xff]  }
   0xe   :  { %556 = vmatpush3.bf16.msra.mxu1 %v605_v16  ;;  %v616_v39 = vld [vmem:[%s831_s1 + $0x124] ss:$12 sps:$4 sm:$0xff]   ;;  %v631_v40 = vld [vmem:[%s832_s0] ss:$8 sps:$4 sm:$0xff]   ;;  %v621_v42 = vld [vmem:[%s831_s1 + $0x10c] ss:$12 sps:$4 sm:$0xff]  }
   0xf   :  { %370 = vmatpush1.bf16.msra.mxu0 %v584_v8  ;;  %557 = vmatprep.subr.bf16.mxu1 %v608_v18  ;;  %v619_v41 = vld [vmem:[%s831_s1 + $0x120] ss:$12 sps:$4 sm:$0xff]   ;;  %v624_v43 = vld [vmem:[%s831_s1 + $0x108] ss:$12 sps:$4 sm:$0xff]   ;;  %v629_v45 = vld [vmem:[%s831_s1 + $0xf0] ss:$12 sps:$4 sm:$0xff]  }
  0x10   :  { %371 = vmatprep.subr.bf16.mxu0 %v585_v10  ;;  %v626_v44 = vld [vmem:[%s831_s1 + $0xf4] ss:$12 sps:$4 sm:$0xff]   ;;  %v634_v46 = vld [vmem:[%s831_s1 + $0xdc] ss:$12 sps:$4 sm:$0xff]   ;;  %v636_v47 = vld [vmem:[%s831_s1 + $0xd8] ss:$12 sps:$4 sm:$0xff]  }
  0x11   :  { %v637_v48 = vld [vmem:[%s831_s1 + $0xc4] ss:$12 sps:$4 sm:$0xff]   ;;  %v639_v49 = vld [vmem:[%s831_s1 + $0xc0] ss:$12 sps:$4 sm:$0xff]   ;;  %v471_v51 = vshrl.u32 %v470_v50, 7 }
  0x12   :  { %558 = vmatpush3.bf16.msra.mxu1 %v610_v20  ;;  %v468_v53 = vld [vmem:[%s833_s2] sm:$0x7] }
  0x13   :  { %372 = vmatpush1.bf16.msra.mxu0 %v587_v13  ;;  %559 = vmatprep.subr.bf16.mxu1 %v613_v22  ;;  %v480_v52 = vsub.s32 2, %v471_v51  ;;  %v472_v63 = vsub.s32 0, %v471_v51  ;;  %v476_v0 = vsub.s32 1, %v471_v51 }
  0x14   :  { %373 = vmatprep.subr.bf16.mxu0 %v588_v14 }
  0x15   :  { %v481_v55 = vrot.slane %v468_v53, %v480_v52  ;;  %v473_v1 = vrot.slane %v468_v53, %v472_v63  ;;  %v477_v2 = vrot.slane %v468_v53, %v476_v0 }
  0x16   :  { %560 = vmatpush3.bf16.msra.mxu1 %v615_v24 }
  0x17   :  { %374 = vmatpush1.bf16.msra.mxu0 %v590_v17  ;;  %561 = vmatprep.subr.bf16.mxu1 %v618_v25 }
  0x18   :  { %375 = vmatprep.subr.bf16.mxu0 %v591_v19 }
  0x1a   :  { %562 = vmatpush3.bf16.msra.mxu1 %v620_v28 }
  0x1b   :  { %376 = vmatpush1.bf16.msra.mxu0 %v594_v21  ;;  %563 = vmatprep.subr.bf16.mxu1 %v623_v29 }
  0x1c   :  { %377 = vmatprep.subr.bf16.mxu0 %v596_v23 }
  0x1e   :  { %564 = vmatpush3.bf16.msra.mxu1 %v625_v32 }
  0x1f   :  { %378 = vmatpush1.bf16.msra.mxu0 %v599_v26  ;;  %565 = vmatprep.subr.bf16.mxu1 %v628_v33 }
  0x20   :  { %379 = vmatprep.subr.bf16.mxu0 %v601_v27 }
  0x22   :  { %566 = vmatpush3.bf16.msra.mxu1 %v630_v37 }
  0x23   :  { %380 = vmatpush2.bf16.msra.mxu0 %v604_v30 }
  0x24   :  { %381 = vmatprep.subr.bf16.mxu0 %v606_v31 }
  0x25   :  { %439 = vmatmul.mubr.bf16.vlgmr.msra.gmra.mxu1 %v631_v40 }
  0x27   :  { %382 = vmatpush2.bf16.msra.mxu0 %v609_v34 }
  0x28   :  { %383 = vmatprep.subr.bf16.mxu0 %v611_v36 }
  0x2b   :  { %384 = vmatpush2.bf16.msra.mxu0 %v614_v38 }
  0x2c   :  { %385 = vmatprep.subr.bf16.mxu0 %v616_v39 }
  0x2f   :  { %386 = vmatpush2.bf16.msra.mxu0 %v619_v41 }
  0x30   :  { %387 = vmatprep.subr.bf16.mxu0 %v621_v42 }
  0x33   :  { %388 = vmatpush2.bf16.msra.mxu0 %v624_v43 }
  0x34   :  { %389 = vmatprep.subr.bf16.mxu0 %v626_v44 }
  0x37   :  { %390 = vmatpush2.bf16.msra.mxu0 %v629_v45 }
  0x38   :  { %391 = vmatprep.subr.bf16.mxu0 %v634_v46 }
  0x3b   :  { %392 = vmatpush2.bf16.msra.mxu0 %v636_v47 }
  0x3c   :  { %393 = vmatprep.subr.bf16.mxu0 %v637_v48 }
  0x3f   :  { %394 = vmatpush2.bf16.msra.mxu0 %v639_v49 }
  0x42   :  { %396 = vmatmul.mubr.bf16.vlgmr.msra.gmra.mxu0 %v631_v40 }
  0xe5   :  { %v567_v54 = vpop.f32.mrf.mxu1 }
  0xe7   :  { %v568_v56 = vpop.f32.mrf.mxu1 }
  0xe8   :  { %v569_v57 = vadd.f32 %v568_v56, %v567_v54 }
  0xe9   :  { %v570_v58 = vpop.f32.mrf.mxu1 }
  0xea   :  { %v487_v59 = vadd.f32 %v569_v57, %v481_v55 }
  0xeb   :  { %v571_v60 = vpop.f32.mrf.mxu1 }
  0xec   :  { %493 = vst [vmem:[%s834_s3 + $0x10] sm:$0xff] %v487_v59  ;;  %v572_v61 = vadd.f32 %v571_v60, %v570_v58 }
  0xee   :  { %v490_v62 = vadd.f32 %v572_v61, %v481_v55 }
  0xf0   :  { %496 = vst [vmem:[%s834_s3 + $0x28] sm:$0xff] %v490_v62 }
 0x102   :  { %v397_v3 = vpop.f32.mrf.mxu0 }
 0x103   :  { %v485_v4 = vadd.f32 %v473_v1, %v397_v3 }
 0x104   :  { %v399_v5 = vpop.f32.mrf.mxu0 }
 0x105   :  { %491 = vst [vmem:[%s834_s3] sm:$0xff] %v485_v4  ;;  %v486_v6 = vadd.f32 %v477_v2, %v399_v5 }
 0x106   :  { %v401_v7 = vpop.f32.mrf.mxu0 }
 0x107   :  { %492 = vst [vmem:[%s834_s3 + $0x8] sm:$0xff] %v486_v6  ;;  %v488_v8 = vadd.f32 %v473_v1, %v401_v7 }
 0x108   :  { %v403_v9 = vpop.f32.mrf.mxu0 }
 0x109   :  { %494 = vst [vmem:[%s834_s3 + $0x18] sm:$0xff] %v488_v8  ;;  %v489_v10 = vadd.f32 %v477_v2, %v403_v9 }
 0x10b   :  { %495 = vst [vmem:[%s834_s3 + $0x20] sm:$0xff] %v489_v10 }

</bundles_post_ra>
